<compile_context>
chip_gen: v7x
topology: tpu7x:2x2x1
jax: 0.10.0
libtpu: 0.0.40
codegen_flags: <defaults>
</compile_context>

<pallas_src>
import functools
import math

import jax
import jax.numpy as jnp
from jax import lax
from jax.experimental import pallas as pl
from jax.experimental.pallas import tpu as pltpu

HEAD_LANES = 128          # packed head/output slab width (lane-dense stores)
TARGET_TILE_ROWS = 512    # aim for ~this many padded-width pixel rows per grid step


def _cdiv(a, b):
    return -(-a // b)


def _pick_tile_h(h, wp):
    # (tile_h * wp) is the sublane extent of the output block -> keep it a
    # multiple of 8.  Sized modestly so the (tile, 128) slab + halo buffer stay
    # well inside v7x's smaller (64 MiB physical / 32 MiB scoped) VMEM budget.
    k0 = 8 // math.gcd(wp, 8)
    max_th = k0 * _cdiv(h, k0)                       # smallest multiple of k0 covering H
    want_th = k0 * max(1, TARGET_TILE_ROWS // (wp * k0))
    return min(max_th, max(k0, want_th))


def _build_fused_kernel(*, hidden, num_classes, tile_h, wp, dma_rows, ht):
    mt = tile_h * wp          # rows produced per grid step (incl. 2 junk pad columns/row)

    def kernel(img_ref, w1_ref, b1_ref, w2_ref, b2_ref, wh_ref, bh_ref,
               out_ref, buf_ref, sem_ref):
        b = pl.program_id(0)          # batch image
        i = pl.program_id(1)          # row tile within the image

        # ---- image rows (+1-row halo top/bottom) : HBM -> VMEM --------------
        row0 = (b * (ht + 2) + i * tile_h) * wp
        cp = pltpu.make_async_copy(img_ref.at[pl.ds(row0, dma_rows)], buf_ref, sem_ref)
        cp.start()
        # image stream (C floats/pixel) is ~40x smaller than the 128-lane output
        # slab, so a blocking wait here costs negligible overlap.
        cp.wait()

        # ---- backbone: 3x3 SAME conv as 9 shifted matmuls + ReLU ------------
        # buf is the padded image flattened as (row*wp + col, C); a contiguous
        # sublane shift by dh*wp+dw realizes tap (dh, dw) for every output pixel
        # (the 2 pad columns per row produce junk lanes that are cropped later).
        acc = jnp.zeros((mt, hidden), jnp.float32)
        for dh in range(3):
            for dw in range(3):
                off = dh * wp + dw
                tap = buf_ref[off:off + mt, :]                       # (mt, C)
                acc += jnp.dot(tap, w1_ref[dh * 3 + dw],
                               preferred_element_type=jnp.float32)
        h1 = jnp.maximum(acc + b1_ref[...], 0.0)

        # ---- 1x1 conv + ReLU (bf16 MXU operands, f32 accumulation) ----------
        f = jnp.dot(h1.astype(jnp.bfloat16), w2_ref[...].astype(jnp.bfloat16),
                    preferred_element_type=jnp.float32) + b2_ref[...]
        feat = jnp.maximum(f, 0.0)

        # ---- packed heads: one lane-dense (mt, 128) slab --------------------
        heads = jnp.dot(feat.astype(jnp.bfloat16), wh_ref[...].astype(jnp.bfloat16),
                        preferred_element_type=jnp.float32) + bh_ref[...]
        out_ref[...] = heads                                          # dense 128-wide store

        # ---- post-processing: softmax + argmax over the sem-logit lanes -----
        s = heads[:, :num_classes]
        m = jnp.max(s, axis=-1, keepdims=True)
        e = jnp.exp(s - m)
        prob = e * pl.reciprocal(jnp.sum(e, axis=-1, keepdims=True), approx=True)
        idx = lax.broadcasted_iota(jnp.int32, s.shape, 1)
        pred = jnp.min(jnp.where(s == m, idx, jnp.int32(2 ** 30)),
                       axis=-1, keepdims=True)                        # first-max, like torch
        extra = jnp.concatenate([prob, pred.astype(jnp.float32)], axis=-1)
        out_ref[:, num_classes + 3:2 * num_classes + 4] = extra

    return kernel


def panoptic_lmffnet_forward(images_nchw, params, num_classes):
    n, c, h, w = images_nchw.shape
    hidden = params["w2"].shape[0]
    feat_dim = params["w2"].shape[1]
    assert 2 * num_classes + 4 <= HEAD_LANES, "packed output slab overflow"

    wp = w + 2
    tile_h = _pick_tile_h(h, wp)
    n_row_tiles = _cdiv(h, tile_h)
    ht = n_row_tiles * tile_h
    mt = tile_h * wp
    dma_rows = (tile_h + 2) * wp + 8      # +8 rows of slack for the (2,2)-tap overshoot

    # NCHW -> NHWC; zero-pad: 1-pixel conv halo + pad H up to the tile multiple.
    x = jnp.transpose(images_nchw, (0, 2, 3, 1)).astype(jnp.float32)
    xp = jnp.pad(x, ((0, 0), (1, 1 + ht - h), (1, 1), (0, 0)))        # (N, ht+2, wp, C)
    img_flat = jnp.pad(xp.reshape(n * (ht + 2) * wp, c), ((0, 8), (0, 0)))

    # Fold the (x - 0)/255 normalization into the first conv weights.
    w1 = (params["w1"] * (1.0 / 255.0)).reshape(9, c, hidden)
    b1, w2, b2 = params["b1"], params["w2"], params["b2"]
    nh = num_classes + 3
    wh = jnp.pad(jnp.concatenate([params["w_sem"], params["w_cen"], params["w_off"]], axis=1),
                 ((0, 0), (0, HEAD_LANES - nh)))
    bh = jnp.pad(jnp.concatenate([params["b_sem"], params["b_cen"], params["b_off"]], axis=1),
                 ((0, 0), (0, HEAD_LANES - nh)))

    kernel = _build_fused_kernel(hidden=hidden, num_classes=num_classes,
                                 tile_h=tile_h, wp=wp, dma_rows=dma_rows, ht=ht)

    def _full(shape):
        return pl.BlockSpec(shape, lambda *_: (0,) * len(shape))

    out = pl.pallas_call(
        kernel,
        out_shape=jax.ShapeDtypeStruct((n * n_row_tiles * mt, HEAD_LANES), jnp.float32),
        grid_spec=pltpu.PrefetchScalarGridSpec(
            num_scalar_prefetch=0,
            grid=(n, n_row_tiles),
            in_specs=[
                pl.BlockSpec(memory_space=pl.ANY),           # padded image stays in HBM
                _full((9, c, hidden)), _full((1, hidden)),
                _full((hidden, feat_dim)), _full((1, feat_dim)),
                _full((feat_dim, HEAD_LANES)), _full((1, HEAD_LANES)),
            ],
            out_specs=pl.BlockSpec((mt, HEAD_LANES),
                                   lambda bi, ri: (bi * n_row_tiles + ri, 0)),
            scratch_shapes=[
                pltpu.VMEM((dma_rows, c), jnp.float32),      # halo'd image row tile
                pltpu.SemaphoreType.DMA(()),
            ],
        ),
        compiler_params=pltpu.CompilerParams(
            dimension_semantics=("parallel", "parallel"),    # lets v7x use both TCs
            vmem_limit_bytes=48 * 1024 * 1024,
        ),
    )(img_flat, w1, b1, w2, b2, wh, bh)

    # (N*tiles*mt, 128) -> (N, ht, wp, 128), crop padding / junk pad columns.
    out = out.reshape(n, ht, wp, HEAD_LANES)[:, :h, :w, :]

    sem = out[..., :num_classes]
    cen = out[..., num_classes:num_classes + 1]
    off = out[..., num_classes + 1:num_classes + 3]
    prob = out[..., num_classes + 3:2 * num_classes + 3]
    pred = out[..., 2 * num_classes + 3].astype(jnp.int32)

    # TODO(synk): get_panoptic_segmentation (center NMS / instance grouping),
    # Instances/BitMasks extraction and variable-size ImageList batching have no
    # clean Pallas equivalent; only the dense tensor path is implemented.
    return {
        "sem_seg": sem,            # logits,   (N, H, W, num_classes)  [NHWC]
        "semantic_prob": prob,     # softmax,  (N, H, W, num_classes)
        "sem_pred": pred,          # argmax,   (N, H, W) int32
        "center": cen,             # (N, H, W, 1)
        "offset": off,             # (N, H, W, 2)
    }


def init_params(key, c_in, hidden, feat_dim, num_classes):
    ks = jax.random.split(key, 6)
    s = 0.1
    return {
        "w1": s * jax.random.normal(ks[0], (9 * c_in, hidden), jnp.float32),
        "b1": jnp.zeros((1, hidden), jnp.float32),
        "w2": s * jax.random.normal(ks[1], (hidden, feat_dim), jnp.float32),
        "b2": jnp.zeros((1, feat_dim), jnp.float32),
        "w_sem": s * jax.random.normal(ks[2], (feat_dim, num_classes), jnp.float32),
        "b_sem": jnp.zeros((1, num_classes), jnp.float32),
        "w_cen": s * jax.random.normal(ks[3], (feat_dim, 1), jnp.float32),
        "b_cen": jnp.zeros((1, 1), jnp.float32),
        "w_off": s * jax.random.normal(ks[4], (feat_dim, 2), jnp.float32),
        "b_off": jnp.zeros((1, 2), jnp.float32),
    }


if __name__ == "__main__":
    key = jax.random.PRNGKey(0)
    k_img, k_par = jax.random.split(key)

    N, C_IN, H, W = 2, 3, 16, 16          # NCHW images, values in [0, 255)
    HIDDEN, FEAT_DIM, NUM_CLASSES = 32, 32, 8

    images = jax.random.uniform(k_img, (N, C_IN, H, W),
                                minval=0.0, maxval=255.0, dtype=jnp.float32)
    params = init_params(k_par, C_IN, HIDDEN, FEAT_DIM, NUM_CLASSES)

    fwd = jax.jit(functools.partial(panoptic_lmffnet_forward,
                                    num_classes=NUM_CLASSES))
    out = fwd(images, params)
    jax.block_until_ready(out)

    assert out["sem_seg"].shape == (N, H, W, NUM_CLASSES)
    assert out["semantic_prob"].shape == (N, H, W, NUM_CLASSES)
    assert out["sem_pred"].shape == (N, H, W)
    assert out["center"].shape == (N, H, W, 1)
    assert out["offset"].shape == (N, H, W, 2)

    # light numerical sanity checks
    prob_sum = jnp.sum(out["semantic_prob"], axis=-1)
    assert bool(jnp.all(jnp.abs(prob_sum - 1.0) < 5e-2)), "softmax rows must sum to ~1"
    assert bool(jnp.all(out["sem_pred"] == jnp.argmax(out["sem_seg"], axis=-1))), \
        "in-kernel argmax must match logits argmax"

    print("KERNEL_OK")
</pallas_src>

<mosaic_0001>
module attributes {stable_mosaic.version = 11 : i64} {
  func.func @kernel(%arg0: i32, %arg1: i32, %arg2: memref<656x3xf32, #tpu.memory_space<any>>, %arg3: memref<9x3x32xf32, #tpu.memory_space<vmem>>, %arg4: memref<1x32xf32, #tpu.memory_space<vmem>>, %arg5: memref<32x32xf32, #tpu.memory_space<vmem>>, %arg6: memref<1x32xf32, #tpu.memory_space<vmem>>, %arg7: memref<32x128xf32, #tpu.memory_space<vmem>>, %arg8: memref<1x128xf32, #tpu.memory_space<vmem>>, %arg9: memref<288x128xf32, #tpu.memory_space<vmem>>, %arg10: memref<332x3xf32, #tpu.memory_space<vmem>>, %arg11: memref<!tpu.dma_semaphore, #tpu.memory_space<semaphore_mem>>) attributes {dimension_semantics = [#tpu.dimension_semantics<parallel>, #tpu.dimension_semantics<parallel>], iteration_bounds = array<i64: 2, 1>, scalar_prefetch = 0 : i64, scratch_operands = 2 : i64, tpu.core_type = #tpu.core_type<tc>, window_params = [{}, {pipeline_mode = #tpu.pipeline_mode<synchronous>, transform_indices = @transform_1, window_bounds = array<i64: 9, 3, 32>}, {pipeline_mode = #tpu.pipeline_mode<synchronous>, transform_indices = @transform_2, window_bounds = array<i64: 1, 32>}, {pipeline_mode = #tpu.pipeline_mode<synchronous>, transform_indices = @transform_3, window_bounds = array<i64: 32, 32>}, {pipeline_mode = #tpu.pipeline_mode<synchronous>, transform_indices = @transform_4, window_bounds = array<i64: 1, 32>}, {pipeline_mode = #tpu.pipeline_mode<synchronous>, transform_indices = @transform_5, window_bounds = array<i64: 32, 128>}, {pipeline_mode = #tpu.pipeline_mode<synchronous>, transform_indices = @transform_6, window_bounds = array<i64: 1, 128>}, {transform_indices = @transform_7, window_bounds = array<i64: 288, 128>}]} {
    %c18_i32 = arith.constant 18 : i32
    %0 = arith.muli %arg0, %c18_i32 : i32
    %c16_i32 = arith.constant 16 : i32
    %1 = arith.muli %arg1, %c16_i32 : i32
    %2 = arith.addi %0, %1 : i32
    %c18_i32_0 = arith.constant 18 : i32
    %3 = arith.muli %2, %c18_i32_0 : i32
    %c0_i32 = arith.constant 0 : i32
    %4 = tpu.memref_slice %arg2[%3, %c0_i32] : memref<656x3xf32, #tpu.memory_space<any>> -> memref<332x3xf32, #tpu.memory_space<any>>
    tpu.enqueue_dma source(%4 : memref<332x3xf32, #tpu.memory_space<any>>) target(%arg10 : memref<332x3xf32, #tpu.memory_space<vmem>>) target_semaphore(%arg11 : memref<!tpu.dma_semaphore, #tpu.memory_space<semaphore_mem>>)
    %c0_i32_1 = arith.constant 0 : i32
    %5 = tpu.memref_slice %arg2[%3, %c0_i32_1] : memref<656x3xf32, #tpu.memory_space<any>> -> memref<332x3xf32, #tpu.memory_space<any>>
    tpu.wait_dma2 semaphore(%arg11 : memref<!tpu.dma_semaphore, #tpu.memory_space<semaphore_mem>>) src(%5 : memref<332x3xf32, #tpu.memory_space<any>>) dst(%arg10 : memref<332x3xf32, #tpu.memory_space<vmem>>)
    %cst = arith.constant 0.000000e+00 : f32
    %6 = vector.broadcast %cst : f32 to vector<288x32xf32>
    %c0 = arith.constant 0 : index
    %c0_2 = arith.constant 0 : index
    %7 = vector.load %arg10[%c0, %c0_2] : memref<332x3xf32, #tpu.memory_space<vmem>>, vector<288x3xf32>
    %c0_3 = arith.constant 0 : index
    %c0_4 = arith.constant 0 : index
    %c0_5 = arith.constant 0 : index
    %8 = vector.load %arg3[%c0_3, %c0_4, %c0_5] : memref<9x3x32xf32, #tpu.memory_space<vmem>>, vector<1x3x32xf32>
    %9 = vector.shape_cast %8 : vector<1x3x32xf32> to vector<3x32xf32>
    %cst_6 = arith.constant dense<0.000000e+00> : vector<288x32xf32>
    %10 = tpu.matmul %7, %9, %cst_6 {dimension_numbers = #tpu.dot_dimension_numbers<[1], [0], [0], [1], [0, 0, 1, 1], [], []>} : vector<288x3xf32>, vector<3x32xf32>, vector<288x32xf32> -> vector<288x32xf32>
    %11 = arith.addf %6, %10 : vector<288x32xf32>
    %c1 = arith.constant 1 : index
    %c0_7 = arith.constant 0 : index
    %12 = vector.load %arg10[%c1, %c0_7] : memref<332x3xf32, #tpu.memory_space<vmem>>, vector<288x3xf32>
    %c1_8 = arith.constant 1 : index
    %c0_9 = arith.constant 0 : index
    %c0_10 = arith.constant 0 : index
    %13 = vector.load %arg3[%c1_8, %c0_9, %c0_10] : memref<9x3x32xf32, #tpu.memory_space<vmem>>, vector<1x3x32xf32>
    %14 = vector.shape_cast %13 : vector<1x3x32xf32> to vector<3x32xf32>
    %cst_11 = arith.constant dense<0.000000e+00> : vector<288x32xf32>
    %15 = tpu.matmul %12, %14, %cst_11 {dimension_numbers = #tpu.dot_dimension_numbers<[1], [0], [0], [1], [0, 0, 1, 1], [], []>} : vector<288x3xf32>, vector<3x32xf32>, vector<288x32xf32> -> vector<288x32xf32>
    %16 = arith.addf %11, %15 : vector<288x32xf32>
    %c2 = arith.constant 2 : index
    %c0_12 = arith.constant 0 : index
    %17 = vector.load %arg10[%c2, %c0_12] : memref<332x3xf32, #tpu.memory_space<vmem>>, vector<288x3xf32>
    %c2_13 = arith.constant 2 : index
    %c0_14 = arith.constant 0 : index
    %c0_15 = arith.constant 0 : index
    %18 = vector.load %arg3[%c2_13, %c0_14, %c0_15] : memref<9x3x32xf32, #tpu.memory_space<vmem>>, vector<1x3x32xf32>
    %19 = vector.shape_cast %18 : vector<1x3x32xf32> to vector<3x32xf32>
    %cst_16 = arith.constant dense<0.000000e+00> : vector<288x32xf32>
    %20 = tpu.matmul %17, %19, %cst_16 {dimension_numbers = #tpu.dot_dimension_numbers<[1], [0], [0], [1], [0, 0, 1, 1], [], []>} : vector<288x3xf32>, vector<3x32xf32>, vector<288x32xf32> -> vector<288x32xf32>
    %21 = arith.addf %16, %20 : vector<288x32xf32>
    %c18 = arith.constant 18 : index
    %c0_17 = arith.constant 0 : index
    %22 = vector.load %arg10[%c18, %c0_17] : memref<332x3xf32, #tpu.memory_space<vmem>>, vector<288x3xf32>
    %c3 = arith.constant 3 : index
    %c0_18 = arith.constant 0 : index
    %c0_19 = arith.constant 0 : index
    %23 = vector.load %arg3[%c3, %c0_18, %c0_19] : memref<9x3x32xf32, #tpu.memory_space<vmem>>, vector<1x3x32xf32>
    %24 = vector.shape_cast %23 : vector<1x3x32xf32> to vector<3x32xf32>
    %cst_20 = arith.constant dense<0.000000e+00> : vector<288x32xf32>
    %25 = tpu.matmul %22, %24, %cst_20 {dimension_numbers = #tpu.dot_dimension_numbers<[1], [0], [0], [1], [0, 0, 1, 1], [], []>} : vector<288x3xf32>, vector<3x32xf32>, vector<288x32xf32> -> vector<288x32xf32>
    %26 = arith.addf %21, %25 : vector<288x32xf32>
    %c19 = arith.constant 19 : index
    %c0_21 = arith.constant 0 : index
    %27 = vector.load %arg10[%c19, %c0_21] : memref<332x3xf32, #tpu.memory_space<vmem>>, vector<288x3xf32>
    %c4 = arith.constant 4 : index
    %c0_22 = arith.constant 0 : index
    %c0_23 = arith.constant 0 : index
    %28 = vector.load %arg3[%c4, %c0_22, %c0_23] : memref<9x3x32xf32, #tpu.memory_space<vmem>>, vector<1x3x32xf32>
    %29 = vector.shape_cast %28 : vector<1x3x32xf32> to vector<3x32xf32>
    %cst_24 = arith.constant dense<0.000000e+00> : vector<288x32xf32>
    %30 = tpu.matmul %27, %29, %cst_24 {dimension_numbers = #tpu.dot_dimension_numbers<[1], [0], [0], [1], [0, 0, 1, 1], [], []>} : vector<288x3xf32>, vector<3x32xf32>, vector<288x32xf32> -> vector<288x32xf32>
    %31 = arith.addf %26, %30 : vector<288x32xf32>
    %c20 = arith.constant 20 : index
    %c0_25 = arith.constant 0 : index
    %32 = vector.load %arg10[%c20, %c0_25] : memref<332x3xf32, #tpu.memory_space<vmem>>, vector<288x3xf32>
    %c5 = arith.constant 5 : index
    %c0_26 = arith.constant 0 : index
    %c0_27 = arith.constant 0 : index
    %33 = vector.load %arg3[%c5, %c0_26, %c0_27] : memref<9x3x32xf32, #tpu.memory_space<vmem>>, vector<1x3x32xf32>
    %34 = vector.shape_cast %33 : vector<1x3x32xf32> to vector<3x32xf32>
    %cst_28 = arith.constant dense<0.000000e+00> : vector<288x32xf32>
    %35 = tpu.matmul %32, %34, %cst_28 {dimension_numbers = #tpu.dot_dimension_numbers<[1], [0], [0], [1], [0, 0, 1, 1], [], []>} : vector<288x3xf32>, vector<3x32xf32>, vector<288x32xf32> -> vector<288x32xf32>
    %36 = arith.addf %31, %35 : vector<288x32xf32>
    %c36 = arith.constant 36 : index
    %c0_29 = arith.constant 0 : index
    %37 = vector.load %arg10[%c36, %c0_29] : memref<332x3xf32, #tpu.memory_space<vmem>>, vector<288x3xf32>
    %c6 = arith.constant 6 : index
    %c0_30 = arith.constant 0 : index
    %c0_31 = arith.constant 0 : index
    %38 = vector.load %arg3[%c6, %c0_30, %c0_31] : memref<9x3x32xf32, #tpu.memory_space<vmem>>, vector<1x3x32xf32>
    %39 = vector.shape_cast %38 : vector<1x3x32xf32> to vector<3x32xf32>
    %cst_32 = arith.constant dense<0.000000e+00> : vector<288x32xf32>
    %40 = tpu.matmul %37, %39, %cst_32 {dimension_numbers = #tpu.dot_dimension_numbers<[1], [0], [0], [1], [0, 0, 1, 1], [], []>} : vector<288x3xf32>, vector<3x32xf32>, vector<288x32xf32> -> vector<288x32xf32>
    %41 = arith.addf %36, %40 : vector<288x32xf32>
    %c37 = arith.constant 37 : index
    %c0_33 = arith.constant 0 : index
    %42 = vector.load %arg10[%c37, %c0_33] : memref<332x3xf32, #tpu.memory_space<vmem>>, vector<288x3xf32>
    %c7 = arith.constant 7 : index
    %c0_34 = arith.constant 0 : index
    %c0_35 = arith.constant 0 : index
    %43 = vector.load %arg3[%c7, %c0_34, %c0_35] : memref<9x3x32xf32, #tpu.memory_space<vmem>>, vector<1x3x32xf32>
    %44 = vector.shape_cast %43 : vector<1x3x32xf32> to vector<3x32xf32>
    %cst_36 = arith.constant dense<0.000000e+00> : vector<288x32xf32>
    %45 = tpu.matmul %42, %44, %cst_36 {dimension_numbers = #tpu.dot_dimension_numbers<[1], [0], [0], [1], [0, 0, 1, 1], [], []>} : vector<288x3xf32>, vector<3x32xf32>, vector<288x32xf32> -> vector<288x32xf32>
    %46 = arith.addf %41, %45 : vector<288x32xf32>
    %c38 = arith.constant 38 : index
    %c0_37 = arith.constant 0 : index
    %47 = vector.load %arg10[%c38, %c0_37] : memref<332x3xf32, #tpu.memory_space<vmem>>, vector<288x3xf32>
    %c8 = arith.constant 8 : index
    %c0_38 = arith.constant 0 : index
    %c0_39 = arith.constant 0 : index
    %48 = vector.load %arg3[%c8, %c0_38, %c0_39] : memref<9x3x32xf32, #tpu.memory_space<vmem>>, vector<1x3x32xf32>
    %49 = vector.shape_cast %48 : vector<1x3x32xf32> to vector<3x32xf32>
    %cst_40 = arith.constant dense<0.000000e+00> : vector<288x32xf32>
    %50 = tpu.matmul %47, %49, %cst_40 {dimension_numbers = #tpu.dot_dimension_numbers<[1], [0], [0], [1], [0, 0, 1, 1], [], []>} : vector<288x3xf32>, vector<3x32xf32>, vector<288x32xf32> -> vector<288x32xf32>
    %51 = arith.addf %46, %50 : vector<288x32xf32>
    %c0_41 = arith.constant 0 : index
    %c0_42 = arith.constant 0 : index
    %52 = vector.load %arg4[%c0_41, %c0_42] : memref<1x32xf32, #tpu.memory_space<vmem>>, vector<1x32xf32>
    %53 = vector.broadcast %52 : vector<1x32xf32> to vector<288x32xf32>
    %54 = arith.addf %51, %53 : vector<288x32xf32>
    %cst_43 = arith.constant 0.000000e+00 : f32
    %55 = vector.broadcast %cst_43 : f32 to vector<288x32xf32>
    %56 = arith.maximumf %54, %55 : vector<288x32xf32>
    %57 = arith.truncf %56 : vector<288x32xf32> to vector<288x32xbf16>
    %c0_44 = arith.constant 0 : index
    %c0_45 = arith.constant 0 : index
    %58 = vector.load %arg5[%c0_44, %c0_45] : memref<32x32xf32, #tpu.memory_space<vmem>>, vector<32x32xf32>
    %59 = arith.truncf %58 : vector<32x32xf32> to vector<32x32xbf16>
    %cst_46 = arith.constant dense<0.000000e+00> : vector<288x32xf32>
    %60 = tpu.matmul %57, %59, %cst_46 {dimension_numbers = #tpu.dot_dimension_numbers<[1], [0], [0], [1], [0, 0, 1, 1], [], []>} : vector<288x32xbf16>, vector<32x32xbf16>, vector<288x32xf32> -> vector<288x32xf32>
    %c0_47 = arith.constant 0 : index
    %c0_48 = arith.constant 0 : index
    %61 = vector.load %arg6[%c0_47, %c0_48] : memref<1x32xf32, #tpu.memory_space<vmem>>, vector<1x32xf32>
    %62 = vector.broadcast %61 : vector<1x32xf32> to vector<288x32xf32>
    %63 = arith.addf %60, %62 : vector<288x32xf32>
    %cst_49 = arith.constant 0.000000e+00 : f32
    %64 = vector.broadcast %cst_49 : f32 to vector<288x32xf32>
    %65 = arith.maximumf %63, %64 : vector<288x32xf32>
    %66 = arith.truncf %65 : vector<288x32xf32> to vector<288x32xbf16>
    %c0_50 = arith.constant 0 : index
    %c0_51 = arith.constant 0 : index
    %67 = vector.load %arg7[%c0_50, %c0_51] : memref<32x128xf32, #tpu.memory_space<vmem>>, vector<32x128xf32>
    %68 = arith.truncf %67 : vector<32x128xf32> to vector<32x128xbf16>
    %cst_52 = arith.constant dense<0.000000e+00> : vector<288x128xf32>
    %69 = tpu.matmul %66, %68, %cst_52 {dimension_numbers = #tpu.dot_dimension_numbers<[1], [0], [0], [1], [0, 0, 1, 1], [], []>} : vector<288x32xbf16>, vector<32x128xbf16>, vector<288x128xf32> -> vector<288x128xf32>
    %c0_53 = arith.constant 0 : index
    %c0_54 = arith.constant 0 : index
    %70 = vector.load %arg8[%c0_53, %c0_54] : memref<1x128xf32, #tpu.memory_space<vmem>>, vector<1x128xf32>
    %71 = vector.broadcast %70 : vector<1x128xf32> to vector<288x128xf32>
    %72 = arith.addf %69, %71 : vector<288x128xf32>
    %c0_55 = arith.constant 0 : index
    %c0_56 = arith.constant 0 : index
    %73 = vector.load %arg9[%c0_55, %c0_56] : memref<288x128xf32, #tpu.memory_space<vmem>>, vector<288x128xf32>
    tpu.vector_store %arg9[%c0_55, %c0_56], %72 {strides = array<i32>} : memref<288x128xf32, #tpu.memory_space<vmem>>, vector<288x128xf32>,
    %74 = vector.extract_strided_slice %72 {offsets = [0, 0], sizes = [288, 8], strides = [1, 1]} : vector<288x128xf32> to vector<288x8xf32>
    %cst_57 = arith.constant dense<0xFF800000> : vector<288xf32>
    %75 = vector.multi_reduction <maximumf>, %74, %cst_57 [1] : vector<288x8xf32> to vector<288xf32>
    %76 = vector.shape_cast %75 : vector<288xf32> to vector<288x1xf32>
    %77 = vector.broadcast %76 : vector<288x1xf32> to vector<288x8xf32>
    %78 = arith.subf %74, %77 : vector<288x8xf32>
    %79 = math.exp %78 : vector<288x8xf32>
    %cst_58 = arith.constant dense<0.000000e+00> : vector<288xf32>
    %80 = vector.multi_reduction <add>, %79, %cst_58 [1] : vector<288x8xf32> to vector<288xf32>
    %81 = vector.shape_cast %80 : vector<288xf32> to vector<288x1xf32>
    %82 = tpu.reciprocal %81 {approx = true} : vector<288x1xf32> -> vector<288x1xf32>
    %83 = vector.broadcast %82 : vector<288x1xf32> to vector<288x8xf32>
    %84 = arith.mulf %79, %83 : vector<288x8xf32>
    %85 = tpu.iota {dimensions = array<i32: 1>} : vector<288x8xi32>
    %86 = vector.broadcast %76 : vector<288x1xf32> to vector<288x8xf32>
    %87 = arith.cmpf oeq, %74, %86 : vector<288x8xf32>
    %c1073741824_i32 = arith.constant 1073741824 : i32
    %88 = vector.broadcast %c1073741824_i32 : i32 to vector<288x8xi32>
    %89 = arith.select %87, %85, %88 : vector<288x8xi1>, vector<288x8xi32>
    %cst_59 = arith.constant dense<2147483647> : vector<288xi32>
    %90 = vector.multi_reduction <minsi>, %89, %cst_59 [1] : vector<288x8xi32> to vector<288xi32>
    %91 = vector.shape_cast %90 : vector<288xi32> to vector<288x1xi32>
    %92 = arith.sitofp %91 : vector<288x1xi32> to vector<288x1xf32>
    %93 = tpu.concatenate %84, %92 in 1 : vector<288x8xf32>, vector<288x1xf32> -> vector<288x9xf32>
    %c0_60 = arith.constant 0 : index
    %c11 = arith.constant 11 : index
    %94 = vector.load %arg9[%c0_60, %c11] : memref<288x128xf32, #tpu.memory_space<vmem>>, vector<288x9xf32>
    tpu.vector_store %arg9[%c0_60, %c11], %93 {strides = array<i32>} : memref<288x128xf32, #tpu.memory_space<vmem>>, vector<288x9xf32>,
    return
  }
  func.func @transform_1(%arg0: i32, %arg1: i32) -> (i32, i32, i32) {
    %c0_i32 = arith.constant 0 : i32
    %c0_i32_0 = arith.constant 0 : i32
    %c0_i32_1 = arith.constant 0 : i32
    %c0_i32_2 = arith.constant 0 : i32
    return %c0_i32, %c0_i32_0, %c0_i32_1 : i32, i32, i32
  }
  func.func @transform_2(%arg0: i32, %arg1: i32) -> (i32, i32) {
    %c0_i32 = arith.constant 0 : i32
    %c0_i32_0 = arith.constant 0 : i32
    %c0_i32_1 = arith.constant 0 : i32
    return %c0_i32, %c0_i32_0 : i32, i32
  }
  func.func @transform_3(%arg0: i32, %arg1: i32) -> (i32, i32) {
    %c0_i32 = arith.constant 0 : i32
    %c0_i32_0 = arith.constant 0 : i32
    %c0_i32_1 = arith.constant 0 : i32
    return %c0_i32, %c0_i32_0 : i32, i32
  }
  func.func @transform_4(%arg0: i32, %arg1: i32) -> (i32, i32) {
    %c0_i32 = arith.constant 0 : i32
    %c0_i32_0 = arith.constant 0 : i32
    %c0_i32_1 = arith.constant 0 : i32
    return %c0_i32, %c0_i32_0 : i32, i32
  }
  func.func @transform_5(%arg0: i32, %arg1: i32) -> (i32, i32) {
    %c0_i32 = arith.constant 0 : i32
    %c0_i32_0 = arith.constant 0 : i32
    %c0_i32_1 = arith.constant 0 : i32
    return %c0_i32, %c0_i32_0 : i32, i32
  }
  func.func @transform_6(%arg0: i32, %arg1: i32) -> (i32, i32) {
    %c0_i32 = arith.constant 0 : i32
    %c0_i32_0 = arith.constant 0 : i32
    %c0_i32_1 = arith.constant 0 : i32
    return %c0_i32, %c0_i32_0 : i32, i32
  }
  func.func @transform_7(%arg0: i32, %arg1: i32) -> (i32, i32) {
    %c1_i32 = arith.constant 1 : i32
    %0 = arith.muli %arg0, %c1_i32 : i32
    %1 = arith.addi %0, %arg1 : i32
    %c0_i32 = arith.constant 0 : i32
    %c0_i32_0 = arith.constant 0 : i32
    return %1, %c0_i32 : i32, i32
  }
}

</mosaic_0001>

<bundles_post_ra>
// kernel: panoptic_lmffnet_forward.1
= control target key start
LH: loop header
LB: loop body
LE: loop exit
PB: predicated region body
PF: predicated region fallthrough
CT: control target
= control target key end

     0   :  { %s8087_s24 = smov 0   ;;  %s8089_s25 = smov 0   ;;  %s10335_s0 = inlined_call_operand.vmem [shape: f32[656,3], index: 0, kind: input, shape index: {}]   ;;  %s10336_s1 = inlined_call_operand.vmem [shape: f32[9,3,32], index: 1, kind: input, shape index: {}]   ;;  %s10337_s2 = inlined_call_operand.vmem [shape: f32[1,32], index: 2, kind: input, shape index: {}]   ;;  %s10338_s3 = inlined_call_operand.vmem [shape: f32[32,32], index: 3, kind: input, shape index: {}]   ;;  %s10339_s4 = inlined_call_operand.vmem [shape: f32[1,32], index: 4, kind: input, shape index: {}]   ;;  %s10340_s5 = inlined_call_operand.vmem [shape: f32[32,128], index: 5, kind: input, shape index: {}]   ;;  %s10341_s6 = inlined_call_operand.vmem [shape: f32[1,128], index: 6, kind: input, shape index: {}]   ;;  %s10342_s7 = inlined_call_operand.vmem [shape: f32[576,128], index: 7, kind: output, shape index: {}]  }
   0x1   :  { %s8091_s26 = smov 0  }
   0x2 LB: > { %s29_s27 = sadd.s32 1, %s8040_s25  ;;  %p6217_p0 = scmp.ge.s32.totalorder %s8044_s26, 1  ;;  %s8044_s26 = sphi %s8091_s26, %s17_s26   ;;  %s8040_s25 = sphi %s8089_s25, %s10587_s25   ;;  %s8036_s24 = sphi %s8087_s24, %s10586_s24  }
   0x3   : > { %p31_p1 = scmp.ge.s32.totalorder %s29_s27, 2  ;;  %p217_p2 = scmp.lt.s32.totalorder %s8044_s26, 3 }
   0x5   : > { %s10589_s27 = smov (%p31_p1, %s29_s27), 0  ;;  %p218_p3 = pnand %p6217_p0, %p217_p2 }
   0x7   : > { %221 = sbr.rel (%p218_p3) target bundleno = 1735 (0x6c7), region = 44 }
   0xe   : > { %s244_s28 = smul.u32 36, %s8036_s24 }
   0xf   : > { %s6219_s29 = smul.u32 324, %s8036_s24 }
  0x10   : > { %p245_p4 = scmp.lt.s32.totalorder %s244_s28, 71 }
  0x11   : > { %s8108_s9 = scalar_lea.vmem %s10335_s0, %s6219_s29 }
  0x12   : > { %s10591_s28 = smov (!%p245_p4, %s244_s28), 71  ;;  %v294_v0 = vld [vmem:[%s8108_s9] sm:$0xff]  ;;  %v296_v1 = vld [vmem:[%s8108_s9 + $0x8] sm:$0xff]  ;;  %v298_v2 = vld [vmem:[%s8108_s9 + $0x10] sm:$0xff] }
  0x13   : > { %295 = vst [vmem:[#allocation2] sm:$0xff] %v294_v0  ;;  %297 = vst [vmem:[#allocation2 + $0x8] sm:$0xff] %v296_v1  ;;  %v300_v3 = vld [vmem:[%s8108_s9 + $0x18] sm:$0xff]  ;;  %v302_v4 = vld [vmem:[%s8108_s9 + $0x20] sm:$0xff]  ;;  %s6218_s10 = sshll.u32 %s10591_s28, 3 }
  0x14   : > { %299 = vst [vmem:[#allocation2 + $0x10] sm:$0xff] %v298_v2  ;;  %v304_v5 = vld [vmem:[%s8108_s9 + $0x28] sm:$0xff]  ;;  %301 = vst [vmem:[#allocation2 + $0x18] sm:$0xff] %v300_v3  ;;  %v306_v6 = vld [vmem:[%s8108_s9 + $0x30] sm:$0xff]  ;;  %s8122_s13 = scalar_lea.vmem %s10342_s7, %s6218_s10 }
  0x15   : > { %303 = vst [vmem:[#allocation2 + $0x20] sm:$0xff] %v302_v4  ;;  %305 = vst [vmem:[#allocation2 + $0x28] sm:$0xff] %v304_v5  ;;  %v308_v7 = vld [vmem:[%s8108_s9 + $0x38] sm:$0xff]  ;;  %v310_v8 = vld [vmem:[%s8108_s9 + $0x40] sm:$0xff] }
  0x16   : > { %307 = vst [vmem:[#allocation2 + $0x30] sm:$0xff] %v306_v6  ;;  %309 = vst [vmem:[#allocation2 + $0x38] sm:$0xff] %v308_v7  ;;  %v312_v9 = vld [vmem:[%s8108_s9 + $0x48] sm:$0xff]  ;;  %v314_v10 = vld [vmem:[%s8108_s9 + $0x50] sm:$0xff] }
  0x17   : > { %311 = vst [vmem:[#allocation2 + $0x40] sm:$0xff] %v310_v8  ;;  %v316_v11 = vld [vmem:[%s8108_s9 + $0x58] sm:$0xff]  ;;  %313 = vst [vmem:[#allocation2 + $0x48] sm:$0xff] %v312_v9  ;;  %v318_v12 = vld [vmem:[%s8108_s9 + $0x60] sm:$0xff] }
  0x18   : > { %315 = vst [vmem:[#allocation2 + $0x50] sm:$0xff] %v314_v10  ;;  %317 = vst [vmem:[#allocation2 + $0x58] sm:$0xff] %v316_v11  ;;  %v320_v13 = vld [vmem:[%s8108_s9 + $0x68] sm:$0xff]  ;;  %v322_v14 = vld [vmem:[%s8108_s9 + $0x70] sm:$0xff] }
  0x19   : > { %319 = vst [vmem:[#allocation2 + $0x60] sm:$0xff] %v318_v12  ;;  %321 = vst [vmem:[#allocation2 + $0x68] sm:$0xff] %v320_v13  ;;  %v324_v15 = vld [vmem:[%s8108_s9 + $0x78] sm:$0xff]  ;;  %v326_v16 = vld [vmem:[%s8108_s9 + $0x80] sm:$0xff] }
  0x1a   : > { %323 = vst [vmem:[#allocation2 + $0x70] sm:$0xff] %v322_v14  ;;  %v328_v17 = vld [vmem:[%s8108_s9 + $0x88] sm:$0xff]  ;;  %325 = vst [vmem:[#allocation2 + $0x78] sm:$0xff] %v324_v15  ;;  %v330_v18 = vld [vmem:[%s8108_s9 + $0x90] sm:$0xff] }
  0x1b   : > { %327 = vst [vmem:[#allocation2 + $0x80] sm:$0xff] %v326_v16  ;;  %329 = vst [vmem:[#allocation2 + $0x88] sm:$0xff] %v328_v17  ;;  %v332_v19 = vld [vmem:[%s8108_s9 + $0x98] sm:$0xff]  ;;  %v334_v20 = vld [vmem:[%s8108_s9 + $0xa0] sm:$0xff] }
  0x1c   : > { %331 = vst [vmem:[#allocation2 + $0x90] sm:$0xff] %v330_v18  ;;  %333 = vst [vmem:[#allocation2 + $0x98] sm:$0xff] %v332_v19  ;;  %v336_v21 = vld [vmem:[%s8108_s9 + $0xa8] sm:$0xff]  ;;  %v338_v22 = vld [vmem:[%s8108_s9 + $0xb0] sm:$0xff] }
  0x1d   : > { %335 = vst [vmem:[#allocation2 + $0xa0] sm:$0xff] %v334_v20  ;;  %v340_v23 = vld [vmem:[%s8108_s9 + $0xb8] sm:$0xff]  ;;  %337 = vst [vmem:[#allocation2 + $0xa8] sm:$0xff] %v336_v21  ;;  %v342_v24 = vld [vmem:[%s8108_s9 + $0xc0] sm:$0xff] }
  0x1e   : > { %339 = vst [vmem:[#allocation2 + $0xb0] sm:$0xff] %v338_v22  ;;  %341 = vst [vmem:[#allocation2 + $0xb8] sm:$0xff] %v340_v23  ;;  %v344_v25 = vld [vmem:[%s8108_s9 + $0xc8] sm:$0xff]  ;;  %v346_v26 = vld [vmem:[%s8108_s9 + $0xd0] sm:$0xff] }
  0x1f   : > { %343 = vst [vmem:[#allocation2 + $0xc0] sm:$0xff] %v342_v24  ;;  %345 = vst [vmem:[#allocation2 + $0xc8] sm:$0xff] %v344_v25  ;;  %v348_v27 = vld [vmem:[%s8108_s9 + $0xd8] sm:$0xff]  ;;  %v350_v28 = vld [vmem:[%s8108_s9 + $0xe0] sm:$0xff] }
  0x20   : > { %347 = vst [vmem:[#allocation2 + $0xd0] sm:$0xff] %v346_v26  ;;  %v352_v29 = vld [vmem:[%s8108_s9 + $0xe8] sm:$0xff]  ;;  %349 = vst [vmem:[#allocation2 + $0xd8] sm:$0xff] %v348_v27  ;;  %v354_v30 = vld [vmem:[%s8108_s9 + $0xf0] sm:$0xff] }
  0x21   : > { %351 = vst [vmem:[#allocation2 + $0xe0] sm:$0xff] %v350_v28  ;;  %353 = vst [vmem:[#allocation2 + $0xe8] sm:$0xff] %v352_v29  ;;  %v356_v31 = vld [vmem:[%s8108_s9 + $0xf8] sm:$0xff]  ;;  %v358_v32 = vld [vmem:[%s8108_s9 + $0x100] sm:$0xff] }
  0x22   : > { %355 = vst [vmem:[#allocation2 + $0xf0] sm:$0xff] %v354_v30  ;;  %357 = vst [vmem:[#allocation2 + $0xf8] sm:$0xff] %v356_v31  ;;  %v360_v33 = vld [vmem:[%s8108_s9 + $0x108] sm:$0xff]  ;;  %v362_v34 = vld [vmem:[%s8108_s9 + $0x110] sm:$0xff] }
  0x23   : > { %359 = vst [vmem:[#allocation2 + $0x100] sm:$0xff] %v358_v32  ;;  %v364_v35 = vld [vmem:[%s8108_s9 + $0x118] sm:$0xff]  ;;  %361 = vst [vmem:[#allocation2 + $0x108] sm:$0xff] %v360_v33  ;;  %v366_v36 = vld [vmem:[%s8108_s9 + $0x120] sm:$0xff] }
  0x24   : > { %363 = vst [vmem:[#allocation2 + $0x110] sm:$0xff] %v362_v34  ;;  %365 = vst [vmem:[#allocation2 + $0x118] sm:$0xff] %v364_v35  ;;  %v368_v37 = vld [vmem:[%s8108_s9 + $0x128] sm:$0xff]  ;;  %v370_v38 = vld [vmem:[%s8108_s9 + $0x130] sm:$0xff] }
  0x25   : > { %367 = vst [vmem:[#allocation2 + $0x120] sm:$0xff] %v366_v36  ;;  %369 = vst [vmem:[#allocation2 + $0x128] sm:$0xff] %v368_v37  ;;  %v372_v39 = vld [vmem:[%s8108_s9 + $0x138] sm:$0xff]  ;;  %v374_v40 = vld [vmem:[%s8108_s9 + $0x140] sm:$0xff] }
  0x26   : > { %371 = vst [vmem:[#allocation2 + $0x130] sm:$0xff] %v370_v38  ;;  %373 = vst [vmem:[#allocation2 + $0x138] sm:$0xff] %v372_v39 }
  0x27   : > { %375 = vst [vmem:[#allocation2 + $0x140] sm:$0xff] %v374_v40 }
  0x28   : > { %390 = vsyncadd [#allocation3], 5312 }
  0x29   : > { %8032 = dma.done.wait [#allocation3], 5312 }
  0x2a   : > { %8033 = vsyncadd [#allocation3], 4294961984  ;;  %vm578_vm0 = vcmask 1042432   ;;  %vm469_vm1 = vcmask 23552   ;;  %v6221_v41 = vld [vmem:[%s10336_s1 + $0x4] sm:$0x7] }
  0x2b   : > { %v8162_v42 = vld [vmem:[%s10336_s1 + $0xc] sm:$0x7]  ;;  %v431_v43 = vld [vmem:[#allocation2 + $0x1] sm:$0xff]  ;;  %6977 = vmatprep.subr.msk.mxu1 %vm578_vm0, %v6221_v41  ;;  %v8167_v44 = vld [vmem:[#allocation2 + $0x12] sm:$0xff]  ;;  %vm4303_vm2 = vcmask 261120   ;;  %vm4869_vm3 = vcmask 64512  }
  0x2c   : > { %7145 = vmatprep.subr.msk.mxu0 %vm578_vm0, %v8162_v42  ;;  %v432_v45 = vld [vmem:[#allocation2 + $0x9] sm:$0xff]  ;;  %v8169_v46 = vld [vmem:[#allocation2 + $0x1a] sm:$0xff]  ;;  %6978 = vmatpush3.msk.msra.mxu1 %vm578_vm0, %v6221_v41  ;;  %v433_v48 = vld [vmem:[#allocation2 + $0x11] sm:$0xff]  ;;  %s8046_s16 = smov 11  }
  0x2d   : > { %6979 = vmatprep.mubr.msk.f32.mxu1 %vm469_vm1, %v431_v43  ;;  %v6372_v47 = vld [vmem:[%s10336_s1 + $0x10] sm:$0x7]  ;;  %7146 = vmatpush3.msk.msra.mxu0 %vm578_vm0, %v8162_v42  ;;  %v8180_v49 = vld [vmem:[#allocation2 + $0x22] sm:$0xff]  ;;  %v434_v50 = vld [vmem:[#allocation2 + $0x19] sm:$0xff] }
  0x2e   : > { %7147 = vmatprep.mubr.msk.f32.mxu0 %vm469_vm1, %v8167_v44  ;;  %6980 = vmatmul.mubr.msk.f32.vlgmr.msra.gmra.mrb[0].mxu1 %vm469_vm1, %v432_v45  ;;  %v8187_v51 = vld [vmem:[#allocation2 + $0x2a] sm:$0xff]  ;;  %v435_v52 = vld [vmem:[#allocation2 + $0x21] sm:$0xff]  ;;  %v8192_v53 = vld [vmem:[#allocation2 + $0x32] sm:$0xff] }
  0x2f   : > { %7148 = vmatmul.mubr.msk.f32.vlgmr.msra.gmra.mrb[0].mxu0 %vm469_vm1, %v8169_v46  ;;  %7201 = vmatprep.subr.msk.mxu0 %vm578_vm0, %v6372_v47  ;;  %v436_v54 = vld [vmem:[#allocation2 + $0x29] sm:$0xff]  ;;  %v8200_v55 = vld [vmem:[#allocation2 + $0x3a] sm:$0xff]  ;;  %v437_v56 = vld [vmem:[#allocation2 + $0x31] sm:$0xff] }
  0x30   : > { %6982 = vmatprep.mubr.msk.f32.mxu1 %vm469_vm1, %v433_v48  ;;  %7202 = vmatpush3.msk.msra.mxu0 %vm578_vm0, %v6372_v47  ;;  %v8202_v57 = vld [vmem:[#allocation2 + $0x42] sm:$0xff]  ;;  %v438_v58 = vld [vmem:[#allocation2 + $0x39] sm:$0xff]  ;;  %v8210_v59 = vld [vmem:[#allocation2 + $0x4a] sm:$0xff] }
  0x31   : > { %7150 = vmatprep.mubr.msk.f32.mxu0 %vm469_vm1, %v8180_v49  ;;  %v439_v60 = vld [vmem:[#allocation2 + $0x41] sm:$0xff]  ;;  %v8212_v61 = vld [vmem:[#allocation2 + $0x52] sm:$0xff]  ;;  %v440_v63 = vld [vmem:[#allocation2 + $0x49] sm:$0xff] }
  0x32   : > { %6983 = vmatmul.mubr.msk.f32.gmra.mrb[2].mxu1 %vm469_vm1, %v434_v50  ;;  %v6410_v62 = vld [vmem:[%s10336_s1 + $0x14] sm:$0x7]  ;;  %v8224_v0 = vld [vmem:[#allocation2 + $0x5a] sm:$0xff]  ;;  %v8226_v2 = vld [vmem:[#allocation2 + $0x62] sm:$0xff] }
  0x33   : > { %7151 = vmatmul.mubr.msk.f32.gmra.mrb[2].mxu0 %vm469_vm1, %v8187_v51  ;;  %6985 = vmatprep.mubr.msk.f32.mxu1 %vm469_vm1, %v435_v52  ;;  %v441_v1 = vld [vmem:[#allocation2 + $0x51] sm:$0xff]  ;;  %v442_v3 = vld [vmem:[#allocation2 + $0x59] sm:$0xff]  ;;  %v443_v5 = vld [vmem:[#allocation2 + $0x61] sm:$0xff] }
  0x34   : > { %7153 = vmatprep.mubr.msk.f32.mxu0 %vm469_vm1, %v8192_v53  ;;  %7257 = vmatprep.subr.msk.mxu0 %vm578_vm0, %v6410_v62  ;;  %v8234_v4 = vld [vmem:[#allocation2 + $0x6a] sm:$0xff]  ;;  %v8236_v6 = vld [vmem:[#allocation2 + $0x72] sm:$0xff]  ;;  %v8244_v8 = vld [vmem:[#allocation2 + $0x7a] sm:$0xff] }
  0x35   : > { %v444_v7 = vld [vmem:[#allocation2 + $0x69] sm:$0xff]  ;;  %v430_v9 = vld [vmem:[%s10336_s1] sm:$0x7]  ;;  %v445_v10 = vld [vmem:[#allocation2 + $0x71] sm:$0xff] }
  0x36   : > { %6986 = vmatmul.mubr.msk.f32.gmra.mrb[4].mxu1 %vm469_vm1, %v436_v54  ;;  %v8249_v11 = vld [vmem:[#allocation2 + $0x82] sm:$0xff]  ;;  %7033 = vmatprep.subr.msk.mxu1 %vm578_vm0, %v430_v9  ;;  %v446_v12 = vld [vmem:[#allocation2 + $0x79] sm:$0xff]  ;;  %v8259_v13 = vld [vmem:[#allocation2 + $0x8a] sm:$0xff] }
  0x37   : > { %7154 = vmatmul.mubr.msk.f32.gmra.mrb[4].mxu0 %vm469_vm1, %v8200_v55  ;;  %6988 = vmatprep.mubr.msk.f32.mxu1 %vm469_vm1, %v437_v56  ;;  %v447_v14 = vld [vmem:[#allocation2 + $0x81] sm:$0xff]  ;;  %v8261_v15 = vld [vmem:[#allocation2 + $0x92] sm:$0xff]  ;;  %v448_v16 = vld [vmem:[#allocation2 + $0x89] sm:$0xff] }
  0x38   : > { %7156 = vmatprep.mubr.msk.f32.mxu0 %vm469_vm1, %v8202_v57  ;;  %7034 = vmatpush3.msk.msra.mxu1 %vm578_vm0, %v430_v9  ;;  %v8269_v17 = vld [vmem:[#allocation2 + $0x9a] sm:$0xff]  ;;  %v449_v18 = vld [vmem:[#allocation2 + $0x91] sm:$0xff]  ;;  %v2045_v23 = vld [vmem:[#allocation2 + $0x23] sm:$0xff] }
  0x39   : > { %v2043_v19 = vld [vmem:[#allocation2 + $0x13] sm:$0xff]  ;;  %v2044_v21 = vld [vmem:[#allocation2 + $0x1b] sm:$0xff]  ;;  %v452_v25 = vld [vmem:[#allocation2 + $0xa9] sm:$0xff] }
  0x3a   : > { %6989 = vmatmul.mubr.msk.f32.gmra.mrb[6].mxu1 %vm469_vm1, %v438_v58  ;;  %v450_v20 = vld [vmem:[#allocation2 + $0x99] sm:$0xff]  ;;  %v451_v22 = vld [vmem:[#allocation2 + $0xa1] sm:$0xff]  ;;  %v2046_v26 = vld [vmem:[#allocation2 + $0x2b] sm:$0xff] }
  0x3b   : > { %7157 = vmatmul.mubr.msk.f32.gmra.mrb[6].mxu0 %vm469_vm1, %v8210_v59  ;;  %6991 = vmatprep.mubr.msk.f32.mxu1 %vm469_vm1, %v439_v60  ;;  %v8279_v24 = vld [vmem:[%s10336_s1 + $0x18] sm:$0x7]  ;;  %v2048_v30 = vld [vmem:[#allocation2 + $0x3b] sm:$0xff]  ;;  %v2049_v32 = vld [vmem:[#allocation2 + $0x43] sm:$0xff] }
  0x3c   : > { %7159 = vmatprep.mubr.msk.f32.mxu0 %vm469_vm1, %v8212_v61  ;;  %v453_v27 = vld [vmem:[#allocation2 + $0xb1] sm:$0xff]  ;;  %v454_v29 = vld [vmem:[#allocation2 + $0xb9] sm:$0xff]  ;;  %v455_v31 = vld [vmem:[#allocation2 + $0xc1] sm:$0xff] }
  0x3d   : > { %v2047_v28 = vld [vmem:[#allocation2 + $0x33] sm:$0xff]  ;;  %v456_v33 = vld [vmem:[#allocation2 + $0xc9] sm:$0xff]  ;;  %v2052_v39 = vld [vmem:[#allocation2 + $0x5b] sm:$0xff] }
  0x3e   : > { %6992 = vmatmul.mubr.msk.f32.gmra.mrb[8].mxu1 %vm469_vm1, %v440_v63  ;;  %v2050_v34 = vld [vmem:[#allocation2 + $0x4b] sm:$0xff]  ;;  %v2051_v36 = vld [vmem:[#allocation2 + $0x53] sm:$0xff]  ;;  %v6296_v37 = vld [vmem:[%s10336_s1 + $0x8] sm:$0x7] }
  0x3f   : > { %7160 = vmatmul.mubr.msk.f32.gmra.mrb[8].mxu0 %vm469_vm1, %v8224_v0  ;;  %6994 = vmatprep.mubr.msk.f32.mxu1 %vm469_vm1, %v441_v1  ;;  %v457_v35 = vld [vmem:[#allocation2 + $0xd1] sm:$0xff]  ;;  %v458_v38 = vld [vmem:[#allocation2 + $0xd9] sm:$0xff]  ;;  %v459_v40 = vld [vmem:[#allocation2 + $0xe1] sm:$0xff] }
  0x40   : > { %7162 = vmatprep.mubr.msk.f32.mxu0 %vm469_vm1, %v8226_v2  ;;  %7089 = vmatprep.subr.msk.mxu1 %vm578_vm0, %v6296_v37  ;;  %v2053_v41 = vld [vmem:[#allocation2 + $0x63] sm:$0xff]  ;;  %v2054_v45 = vld [vmem:[#allocation2 + $0x6b] sm:$0xff]  ;;  %v2055_v48 = vld [vmem:[#allocation2 + $0x73] sm:$0xff] }
  0x41   : > { %v460_v43 = vld [vmem:[#allocation2 + $0xe9] sm:$0xff]  ;;  %v461_v47 = vld [vmem:[#allocation2 + $0xf1] sm:$0xff]  ;;  %v462_v50 = vld [vmem:[#allocation2 + $0xf9] sm:$0xff] }
  0x42   : > { %6995 = vmatmul.mubr.msk.f32.gmra.mrb[10].mxu1 %vm469_vm1, %v442_v3  ;;  %v2056_v52 = vld [vmem:[#allocation2 + $0x7b] sm:$0xff]  ;;  %v2057_v56 = vld [vmem:[#allocation2 + $0x83] sm:$0xff]  ;;  %v2058_v60 = vld [vmem:[#allocation2 + $0x8b] sm:$0xff] }
  0x43   : > { %7163 = vmatmul.mubr.msk.f32.gmra.mrb[10].mxu0 %vm469_vm1, %v8234_v4  ;;  %6997 = vmatprep.mubr.msk.f32.mxu1 %vm469_vm1, %v443_v5  ;;  %v463_v54 = vld [vmem:[#allocation2 + $0x101] sm:$0xff]  ;;  %v464_v58 = vld [vmem:[#allocation2 + $0x109] sm:$0xff]  ;;  %v2059_v63 = vld [vmem:[#allocation2 + $0x93] sm:$0xff] }
  0x44   : > { %7165 = vmatprep.mubr.msk.f32.mxu0 %vm469_vm1, %v8236_v6  ;;  %v466_v1 = vld [vmem:[#allocation2 + $0x119] sm:$0xff]  ;;  %v395_v9 = vld [vmem:[#allocation2 + $0x8] sm:$0xff] }
  0x45   : > { %v2060_v3 = vld [vmem:[#allocation2 + $0x9b] sm:$0xff] }
  0x46   : > { %6998 = vmatmul.mubr.msk.f32.gmra.mrb[12].mxu1 %vm469_vm1, %v444_v7  ;;  %v394_v5 = vld [vmem:[#allocation2] sm:$0xff] }
  0x47   : > { %7166 = vmatmul.mubr.msk.f32.gmra.mrb[12].mxu0 %vm469_vm1, %v8244_v8  ;;  %7000 = vmatprep.mubr.msk.f32.mxu1 %vm469_vm1, %v445_v10  ;;  %v2061_v7 = vld [vmem:[#allocation2 + $0xa3] sm:$0xff]  ;;  %v2062_v10 = vld [vmem:[#allocation2 + $0xab] sm:$0xff] }
  0x48   : > { %7168 = vmatprep.mubr.msk.f32.mxu0 %vm469_vm1, %v8249_v11 }
  0x4a   : > { %7001 = vmatmul.mubr.msk.f32.gmra.mrb[14].mxu1 %vm469_vm1, %v446_v12  ;;  %v396_v12 = vld [vmem:[#allocation2 + $0x10] sm:$0xff] }
  0x4b   : > { %7169 = vmatmul.mubr.msk.f32.gmra.mrb[14].mxu0 %vm469_vm1, %v8259_v13  ;;  %7003 = vmatprep.mubr.msk.f32.mxu1 %vm469_vm1, %v447_v14  ;;  %v2063_v14 = vld [vmem:[#allocation2 + $0xb3] sm:$0xff] }
  0x4c   : > { %7171 = vmatprep.mubr.msk.f32.mxu0 %vm469_vm1, %v8261_v15 }
  0x4e   : > { %7004 = vmatmul.mubr.msk.f32.gmra.mrb[16].mxu1 %vm469_vm1, %v448_v16  ;;  %v397_v16 = vld [vmem:[#allocation2 + $0x18] sm:$0xff] }
  0x4f   : > { %7172 = vmatmul.mubr.msk.f32.gmra.mrb[16].mxu0 %vm469_vm1, %v8269_v17  ;;  %7006 = vmatprep.mubr.msk.f32.mxu1 %vm469_vm1, %v449_v18  ;;  %v2064_v18 = vld [vmem:[#allocation2 + $0xbb] sm:$0xff] }
  0x50   : > { %7203 = vmatprep.mubr.msk.f32.mxu0 %vm469_vm1, %v2043_v19  ;;  %v398_v19 = vld [vmem:[#allocation2 + $0x20] sm:$0xff] }
  0x52   : > { %7007 = vmatmul.mubr.msk.f32.gmra.mrb[18].mxu1 %vm469_vm1, %v450_v20  ;;  %v2065_v20 = vld [vmem:[#allocation2 + $0xc3] sm:$0xff] }
  0x53   : > { %7204 = vmatmul.mubr.msk.f32.vlgmr.msra.gmra.mrb[0].mxu0 %vm469_vm1, %v2044_v21  ;;  %7009 = vmatprep.mubr.msk.f32.mxu1 %vm469_vm1, %v451_v22  ;;  %v399_v21 = vld [vmem:[#allocation2 + $0x28] sm:$0xff] }
  0x54   : > { %7258 = vmatpush3.msk.msra.mxu0 %vm578_vm0, %v6410_v62  ;;  %7206 = vmatprep.mubr.msk.f32.mxu0 %vm469_vm1, %v2045_v23  ;;  %v465_v62 = vld [vmem:[#allocation2 + $0x111] sm:$0xff] }
  0x55   : > { %7313 = vmatprep.subr.msk.mxu0 %vm578_vm0, %v8279_v24  ;;  %v2066_v22 = vld [vmem:[#allocation2 + $0xcb] sm:$0xff] }
  0x56   : > { %7010 = vmatmul.mubr.msk.f32.gmra.mrb[20].mxu1 %vm469_vm1, %v452_v25  ;;  %v400_v23 = vld [vmem:[#allocation2 + $0x30] sm:$0xff] }
  0x57   : > { %7207 = vmatmul.mubr.msk.f32.gmra.mrb[2].mxu0 %vm469_vm1, %v2046_v26  ;;  %7012 = vmatprep.mubr.msk.f32.mxu1 %vm469_vm1, %v453_v27  ;;  %v2067_v25 = vld [vmem:[#allocation2 + $0xd3] sm:$0xff]  ;;  %v2068_v27 = vld [vmem:[#allocation2 + $0xdb] sm:$0xff] }
  0x58   : > { %7209 = vmatprep.mubr.msk.f32.mxu0 %vm469_vm1, %v2047_v28  ;;  %v401_v26 = vld [vmem:[#allocation2 + $0x38] sm:$0xff]  ;;  %v402_v28 = vld [vmem:[#allocation2 + $0x40] sm:$0xff] }
  0x5a   : > { %7013 = vmatmul.mubr.msk.f32.gmra.mrb[22].mxu1 %vm469_vm1, %v454_v29  ;;  %v2069_v29 = vld [vmem:[#allocation2 + $0xe3] sm:$0xff] }
  0x5b   : > { %7210 = vmatmul.mubr.msk.f32.gmra.mrb[4].mxu0 %vm469_vm1, %v2048_v30  ;;  %7015 = vmatprep.mubr.msk.f32.mxu1 %vm469_vm1, %v455_v31  ;;  %v403_v30 = vld [vmem:[#allocation2 + $0x48] sm:$0xff] }
  0x5c   : > { %7212 = vmatprep.mubr.msk.f32.mxu0 %vm469_vm1, %v2049_v32  ;;  %v2070_v31 = vld [vmem:[#allocation2 + $0xeb] sm:$0xff] }
  0x5d   : > { %v404_v32 = vld [vmem:[#allocation2 + $0x50] sm:$0xff] }
  0x5e   : > { %7016 = vmatmul.mubr.msk.f32.gmra.mrb[24].mxu1 %vm469_vm1, %v456_v33  ;;  %v2071_v33 = vld [vmem:[#allocation2 + $0xf3] sm:$0xff] }
  0x5f   : > { %7213 = vmatmul.mubr.msk.f32.gmra.mrb[6].mxu0 %vm469_vm1, %v2050_v34  ;;  %7018 = vmatprep.mubr.msk.f32.mxu1 %vm469_vm1, %v457_v35  ;;  %v405_v34 = vld [vmem:[#allocation2 + $0x58] sm:$0xff] }
  0x60   : > { %7215 = vmatprep.mubr.msk.f32.mxu0 %vm469_vm1, %v2051_v36  ;;  %v2072_v35 = vld [vmem:[#allocation2 + $0xfb] sm:$0xff] }
  0x61   : > { %v406_v36 = vld [vmem:[#allocation2 + $0x60] sm:$0xff] }
  0x62   : > { %7019 = vmatmul.mubr.msk.f32.gmra.mrb[26].mxu1 %vm469_vm1, %v458_v38  ;;  %v407_v38 = vld [vmem:[#allocation2 + $0x68] sm:$0xff] }
  0x63   : > { %7216 = vmatmul.mubr.msk.f32.gmra.mrb[8].mxu0 %vm469_vm1, %v2052_v39  ;;  %7021 = vmatprep.mubr.msk.f32.mxu1 %vm469_vm1, %v459_v40  ;;  %v2074_v39 = vld [vmem:[#allocation2 + $0x10b] sm:$0xff] }
  0x64   : > { %7218 = vmatprep.mubr.msk.f32.mxu0 %vm469_vm1, %v2053_v41  ;;  %v408_v40 = vld [vmem:[#allocation2 + $0x70] sm:$0xff] }
  0x65   : > { %v2075_v41 = vld [vmem:[#allocation2 + $0x113] sm:$0xff] }
  0x66   : > { %7022 = vmatmul.mubr.msk.f32.gmra.mrb[28].mxu1 %vm469_vm1, %v460_v43  ;;  %v409_v43 = vld [vmem:[#allocation2 + $0x78] sm:$0xff] }
  0x67   : > { %7219 = vmatmul.mubr.msk.f32.gmra.mrb[10].mxu0 %vm469_vm1, %v2054_v45  ;;  %7024 = vmatprep.mubr.msk.f32.mxu1 %vm469_vm1, %v461_v47  ;;  %v2076_v45 = vld [vmem:[#allocation2 + $0x11b] sm:$0xff] }
  0x68   : > { %7221 = vmatprep.mubr.msk.f32.mxu0 %vm469_vm1, %v2055_v48  ;;  %v410_v47 = vld [vmem:[#allocation2 + $0x80] sm:$0xff] }
  0x69   : > { %v2077_v48 = vld [vmem:[#allocation2 + $0x123] sm:$0xff] }
  0x6a   : > { %7025 = vmatmul.mubr.msk.f32.gmra.mrb[30].mxu1 %vm469_vm1, %v462_v50  ;;  %v411_v50 = vld [vmem:[#allocation2 + $0x88] sm:$0xff] }
  0x6b   : > { %7222 = vmatmul.mubr.msk.f32.gmra.mrb[12].mxu0 %vm469_vm1, %v2056_v52  ;;  %7027 = vmatprep.mubr.msk.f32.mxu1 %vm469_vm1, %v463_v54  ;;  %v2078_v52 = vld [vmem:[#allocation2 + $0x12b] sm:$0xff] }
  0x6c   : > { %7224 = vmatprep.mubr.msk.f32.mxu0 %vm469_vm1, %v2057_v56  ;;  %v412_v54 = vld [vmem:[#allocation2 + $0x90] sm:$0xff] }
  0x6d   : > { %v2473_v56 = vld [vmem:[#allocation2 + $0x14] sm:$0xff] }
  0x6e   : > { %7028 = vmatmul.mubr.msk.f32.gmra.mrb[32].mxu1 %vm469_vm1, %v464_v58  ;;  %v413_v58 = vld [vmem:[#allocation2 + $0x98] sm:$0xff] }
  0x6f   : > { %7225 = vmatmul.mubr.msk.f32.gmra.mrb[14].mxu0 %vm469_vm1, %v2058_v60  ;;  %7030 = vmatprep.mubr.msk.f32.mxu1 %vm469_vm1, %v465_v62  ;;  %v2474_v60 = vld [vmem:[#allocation2 + $0x1c] sm:$0xff] }
  0x70   : > { %7227 = vmatprep.mubr.msk.f32.mxu0 %vm469_vm1, %v2059_v63  ;;  %v414_v62 = vld [vmem:[#allocation2 + $0xa0] sm:$0xff] }
  0x71   : > { %v8363_v63 = vld [vmem:[#allocation2 + $0x24] sm:$0xff] }
  0x72   : > { %7031 = vmatmul.mubr.msk.f32.gmra.mrb[34].mxu1 %vm469_vm1, %v466_v1  ;;  %v8368_v1 = vld [vmem:[%s10336_s1 + $0x1c] sm:$0x7] }
  0x73   : > { %7228 = vmatmul.mubr.msk.f32.gmra.mrb[16].mxu0 %vm469_vm1, %v2060_v3  ;;  %7035 = vmatprep.mubr.msk.f32.mxu1 %vm469_vm1, %v394_v5  ;;  %v415_v3 = vld [vmem:[#allocation2 + $0xa8] sm:$0xff] }
  0x74   : > { %7230 = vmatprep.mubr.msk.f32.mxu0 %vm469_vm1, %v2061_v7  ;;  %v8375_v5 = vld [vmem:[#allocation2 + $0x2c] sm:$0xff] }
  0x75   : > { %v416_v7 = vld [vmem:[#allocation2 + $0xb0] sm:$0xff] }
  0x76   : > { %7036 = vmatmul.mubr.msk.f32.vlgmr.msra.gmra.mrb[0].mxu1 %vm469_vm1, %v395_v9  ;;  %v8379_v9 = vld [vmem:[#allocation2 + $0x34] sm:$0xff] }
  0x77   : > { %7231 = vmatmul.mubr.msk.f32.gmra.mrb[18].mxu0 %vm469_vm1, %v2062_v10  ;;  %7038 = vmatprep.mubr.msk.f32.mxu1 %vm469_vm1, %v396_v12  ;;  %v8389_v10 = vld [vmem:[#allocation2 + $0x3c] sm:$0xff] }
  0x78   : > { %7233 = vmatprep.mubr.msk.f32.mxu0 %vm469_vm1, %v2063_v14  ;;  %7090 = vmatpush3.msk.msra.mxu1 %vm578_vm0, %v6296_v37  ;;  %v2073_v37 = vld [vmem:[#allocation2 + $0x103] sm:$0xff] }
  0x79   : > { %7561 = vmatprep.subr.msk.mxu1 %vm578_vm0, %v8162_v42  ;;  %v418_v12 = vld [vmem:[#allocation2 + $0xc0] sm:$0xff] }
  0x7a   : > { %7039 = vmatmul.mubr.msk.f32.gmra.mrb[2].mxu1 %vm469_vm1, %v397_v16  ;;  %v8391_v14 = vld [vmem:[#allocation2 + $0x44] sm:$0xff] }
  0x7b   : > { %7234 = vmatmul.mubr.msk.f32.gmra.mrb[20].mxu0 %vm469_vm1, %v2064_v18  ;;  %7041 = vmatprep.mubr.msk.f32.mxu1 %vm469_vm1, %v398_v19  ;;  %v419_v16 = vld [vmem:[#allocation2 + $0xc8] sm:$0xff]  ;;  %v420_v19 = vld [vmem:[#allocation2 + $0xd0] sm:$0xff] }
  0x7c   : > { %7236 = vmatprep.mubr.msk.f32.mxu0 %vm469_vm1, %v2065_v20  ;;  %v8399_v18 = vld [vmem:[#allocation2 + $0x4c] sm:$0xff]  ;;  %v8401_v20 = vld [vmem:[#allocation2 + $0x54] sm:$0xff] }
  0x7e   : > { %7042 = vmatmul.mubr.msk.f32.gmra.mrb[4].mxu1 %vm469_vm1, %v399_v21  ;;  %v421_v21 = vld [vmem:[#allocation2 + $0xd8] sm:$0xff] }
  0x7f   : > { %7237 = vmatmul.mubr.msk.f32.gmra.mrb[22].mxu0 %vm469_vm1, %v2066_v22  ;;  %7044 = vmatprep.mubr.msk.f32.mxu1 %vm469_vm1, %v400_v23  ;;  %v8409_v22 = vld [vmem:[#allocation2 + $0x5c] sm:$0xff] }
  0x80   : > { %7239 = vmatprep.mubr.msk.f32.mxu0 %vm469_vm1, %v2067_v25  ;;  %v422_v23 = vld [vmem:[#allocation2 + $0xe0] sm:$0xff] }
  0x81   : > { %v8411_v25 = vld [vmem:[#allocation2 + $0x64] sm:$0xff] }
  0x82   : > { %7045 = vmatmul.mubr.msk.f32.gmra.mrb[6].mxu1 %vm469_vm1, %v401_v26  ;;  %v423_v26 = vld [vmem:[#allocation2 + $0xe8] sm:$0xff] }
  0x83   : > { %7240 = vmatmul.mubr.msk.f32.gmra.mrb[24].mxu0 %vm469_vm1, %v2068_v27  ;;  %7047 = vmatprep.mubr.msk.f32.mxu1 %vm469_vm1, %v402_v28  ;;  %v8419_v27 = vld [vmem:[#allocation2 + $0x6c] sm:$0xff] }
  0x84   : > { %7242 = vmatprep.mubr.msk.f32.mxu0 %vm469_vm1, %v2069_v29  ;;  %v424_v28 = vld [vmem:[#allocation2 + $0xf0] sm:$0xff] }
  0x85   : > { %v8421_v29 = vld [vmem:[#allocation2 + $0x74] sm:$0xff] }
  0x86   : > { %7048 = vmatmul.mubr.msk.f32.gmra.mrb[8].mxu1 %vm469_vm1, %v403_v30  ;;  %v425_v30 = vld [vmem:[#allocation2 + $0xf8] sm:$0xff] }
  0x87   : > { %7243 = vmatmul.mubr.msk.f32.gmra.mrb[26].mxu0 %vm469_vm1, %v2070_v31  ;;  %7050 = vmatprep.mubr.msk.f32.mxu1 %vm469_vm1, %v404_v32  ;;  %v8429_v31 = vld [vmem:[#allocation2 + $0x7c] sm:$0xff] }
  0x88   : > { %7245 = vmatprep.mubr.msk.f32.mxu0 %vm469_vm1, %v2071_v33  ;;  %v426_v32 = vld [vmem:[#allocation2 + $0x100] sm:$0xff] }
  0x89   : > { %v8431_v33 = vld [vmem:[#allocation2 + $0x84] sm:$0xff] }
  0x8a   : > { %7051 = vmatmul.mubr.msk.f32.gmra.mrb[10].mxu1 %vm469_vm1, %v405_v34  ;;  %v427_v34 = vld [vmem:[#allocation2 + $0x108] sm:$0xff] }
  0x8b   : > { %7246 = vmatmul.mubr.msk.f32.gmra.mrb[28].mxu0 %vm469_vm1, %v2072_v35  ;;  %7053 = vmatprep.mubr.msk.f32.mxu1 %vm469_vm1, %v406_v36  ;;  %v8439_v35 = vld [vmem:[#allocation2 + $0x8c] sm:$0xff] }
  0x8c   : > { %7248 = vmatprep.mubr.msk.f32.mxu0 %vm469_vm1, %v2073_v37  ;;  %v428_v36 = vld [vmem:[#allocation2 + $0x110] sm:$0xff] }
  0x8d   : > { %v8441_v37 = vld [vmem:[#allocation2 + $0x94] sm:$0xff] }
  0x8e   : > { %7054 = vmatmul.mubr.msk.f32.gmra.mrb[12].mxu1 %vm469_vm1, %v407_v38  ;;  %v429_v38 = vld [vmem:[#allocation2 + $0x118] sm:$0xff] }
  0x8f   : > { %7249 = vmatmul.mubr.msk.f32.gmra.mrb[30].mxu0 %vm469_vm1, %v2074_v39  ;;  %7056 = vmatprep.mubr.msk.f32.mxu1 %vm469_vm1, %v408_v40  ;;  %v8449_v39 = vld [vmem:[#allocation2 + $0x9c] sm:$0xff] }
  0x90   : > { %7251 = vmatprep.mubr.msk.f32.mxu0 %vm469_vm1, %v2075_v41  ;;  %v1183_v40 = vld [vmem:[#allocation2 + $0x2] sm:$0xff] }
  0x91   : > { %v8451_v41 = vld [vmem:[#allocation2 + $0xa4] sm:$0xff] }
  0x92   : > { %7057 = vmatmul.mubr.msk.f32.gmra.mrb[14].mxu1 %vm469_vm1, %v409_v43  ;;  %v1184_v43 = vld [vmem:[#allocation2 + $0xa] sm:$0xff] }
  0x93   : > { %7252 = vmatmul.mubr.msk.f32.gmra.mrb[32].mxu0 %vm469_vm1, %v2076_v45  ;;  %7059 = vmatprep.mubr.msk.f32.mxu1 %vm469_vm1, %v410_v47  ;;  %v8459_v45 = vld [vmem:[#allocation2 + $0xac] sm:$0xff]  ;;  %v8461_v47 = vld [vmem:[#allocation2 + $0xb4] sm:$0xff] }
  0x94   : > { %7254 = vmatprep.mubr.msk.f32.mxu0 %vm469_vm1, %v2077_v48  ;;  %v8470_v48 = vld [vmem:[#allocation2 + $0xbc] sm:$0xff] }
  0x96   : > { %7060 = vmatmul.mubr.msk.f32.gmra.mrb[16].mxu1 %vm469_vm1, %v411_v50  ;;  %v8472_v50 = vld [vmem:[#allocation2 + $0xc4] sm:$0xff] }
  0x97   : > { %7255 = vmatmul.mubr.msk.f32.gmra.mrb[34].mxu0 %vm469_vm1, %v2078_v52  ;;  %7062 = vmatprep.mubr.msk.f32.mxu1 %vm469_vm1, %v412_v54  ;;  %v8486_v52 = vld [vmem:[#allocation2 + $0xd4] sm:$0xff] }
  0x98   : > { %7259 = vmatprep.mubr.msk.f32.mxu0 %vm469_vm1, %v2473_v56  ;;  %v1209_v54 = vld [vmem:[#allocation2 + $0xd2] sm:$0xff]  ;;  %v1210_v56 = vld [vmem:[#allocation2 + $0xda] sm:$0xff] }
  0x9a   : > { %7063 = vmatmul.mubr.msk.f32.gmra.mrb[18].mxu1 %vm469_vm1, %v413_v58  ;;  %v1211_v58 = vld [vmem:[#allocation2 + $0xe2] sm:$0xff] }
  0x9b   : > { %7260 = vmatmul.mubr.msk.f32.vlgmr.msra.gmra.mrb[0].mxu0 %vm469_vm1, %v2474_v60  ;;  %7065 = vmatprep.mubr.msk.f32.mxu1 %vm469_vm1, %v414_v62  ;;  %v1212_v60 = vld [vmem:[#allocation2 + $0xea] sm:$0xff]  ;;  %v1213_v62 = vld [vmem:[#allocation2 + $0xf2] sm:$0xff] }
  0x9c   : > { %7314 = vmatpush3.msk.msra.mxu0 %vm578_vm0, %v8279_v24  ;;  %7262 = vmatprep.mubr.msk.f32.mxu0 %vm469_vm1, %v8363_v63  ;;  %v417_v24 = vld [vmem:[#allocation2 + $0xb8] sm:$0xff] }
  0x9d   : > { %7369 = vmatprep.subr.msk.mxu0 %vm578_vm0, %v8368_v1 }
  0x9e   : > { %7066 = vmatmul.mubr.msk.f32.gmra.mrb[20].mxu1 %vm469_vm1, %v415_v3  ;;  %v1216_v3 = vld [vmem:[#allocation2 + $0x10a] sm:$0xff] }
  0x9f   : > { %7263 = vmatmul.mubr.msk.f32.gmra.mrb[2].mxu0 %vm469_vm1, %v8375_v5  ;;  %7068 = vmatprep.mubr.msk.f32.mxu1 %vm469_vm1, %v416_v7  ;;  %v1218_v7 = vld [vmem:[#allocation2 + $0x11a] sm:$0xff] }
  0xa0   : > { %7265 = vmatprep.mubr.msk.f32.mxu0 %vm469_vm1, %v8379_v9 }
  0xa2   : > { %7069 = vmatmul.mubr.msk.f32.gmra.mrb[22].mxu1 %vm469_vm1, %v417_v24  ;;  %v2937_v24 = vld [vmem:[#allocation2 + $0x134] sm:$0xff] }
  0xa3   : > { %7266 = vmatmul.mubr.msk.f32.gmra.mrb[4].mxu0 %vm469_vm1, %v8389_v10  ;;  %7071 = vmatprep.mubr.msk.f32.mxu1 %vm469_vm1, %v418_v12  ;;  %v2938_v12 = vld [vmem:[#allocation2 + $0x13c] sm:$0xff] }
  0xa4   : > { %7268 = vmatprep.mubr.msk.f32.mxu0 %vm469_vm1, %v8391_v14 }
  0xa6   : > { %7072 = vmatmul.mubr.msk.f32.gmra.mrb[24].mxu1 %vm469_vm1, %v419_v16  ;;  %v3334_v16 = vld [vmem:[#allocation2 + $0x2d] sm:$0xff] }
  0xa7   : > { %7269 = vmatmul.mubr.msk.f32.gmra.mrb[6].mxu0 %vm469_vm1, %v8399_v18  ;;  %7074 = vmatprep.mubr.msk.f32.mxu1 %vm469_vm1, %v420_v19  ;;  %v3336_v19 = vld [vmem:[#allocation2 + $0x3d] sm:$0xff] }
  0xa8   : > { %7271 = vmatprep.mubr.msk.f32.mxu0 %vm469_vm1, %v8401_v20 }
  0xaa   : > { %7075 = vmatmul.mubr.msk.f32.gmra.mrb[26].mxu1 %vm469_vm1, %v421_v21  ;;  %v3338_v21 = vld [vmem:[#allocation2 + $0x4d] sm:$0xff] }
  0xab   : > { %7272 = vmatmul.mubr.msk.f32.gmra.mrb[8].mxu0 %vm469_vm1, %v8409_v22  ;;  %7077 = vmatprep.mubr.msk.f32.mxu1 %vm469_vm1, %v422_v23  ;;  %v3340_v23 = vld [vmem:[#allocation2 + $0x5d] sm:$0xff] }
  0xac   : > { %7274 = vmatprep.mubr.msk.f32.mxu0 %vm469_vm1, %v8411_v25 }
  0xae   : > { %7078 = vmatmul.mubr.msk.f32.gmra.mrb[28].mxu1 %vm469_vm1, %v423_v26  ;;  %v3342_v26 = vld [vmem:[#allocation2 + $0x6d] sm:$0xff] }
  0xaf   : > { %7275 = vmatmul.mubr.msk.f32.gmra.mrb[10].mxu0 %vm469_vm1, %v8419_v27  ;;  %7080 = vmatprep.mubr.msk.f32.mxu1 %vm469_vm1, %v424_v28  ;;  %v3344_v28 = vld [vmem:[#allocation2 + $0x7d] sm:$0xff] }
  0xb0   : > { %7277 = vmatprep.mubr.msk.f32.mxu0 %vm469_vm1, %v8421_v29 }
  0xb2   : > { %7081 = vmatmul.mubr.msk.f32.gmra.mrb[30].mxu1 %vm469_vm1, %v425_v30  ;;  %v3346_v30 = vld [vmem:[#allocation2 + $0x8d] sm:$0xff] }
  0xb3   : > { %7278 = vmatmul.mubr.msk.f32.gmra.mrb[12].mxu0 %vm469_vm1, %v8429_v31  ;;  %7083 = vmatprep.mubr.msk.f32.mxu1 %vm469_vm1, %v426_v32  ;;  %v3348_v32 = vld [vmem:[#allocation2 + $0x9d] sm:$0xff] }
  0xb4   : > { %7280 = vmatprep.mubr.msk.f32.mxu0 %vm469_vm1, %v8431_v33 }
  0xb6   : > { %7084 = vmatmul.mubr.msk.f32.gmra.mrb[32].mxu1 %vm469_vm1, %v427_v34  ;;  %v3350_v34 = vld [vmem:[#allocation2 + $0xad] sm:$0xff] }
  0xb7   : > { %7281 = vmatmul.mubr.msk.f32.gmra.mrb[14].mxu0 %vm469_vm1, %v8439_v35  ;;  %7086 = vmatprep.mubr.msk.f32.mxu1 %vm469_vm1, %v428_v36  ;;  %v3352_v36 = vld [vmem:[#allocation2 + $0xbd] sm:$0xff] }
  0xb8   : > { %7283 = vmatprep.mubr.msk.f32.mxu0 %vm469_vm1, %v8441_v37 }
  0xba   : > { %7087 = vmatmul.mubr.msk.f32.gmra.mrb[34].mxu1 %vm469_vm1, %v429_v38  ;;  %v3354_v38 = vld [vmem:[#allocation2 + $0xcd] sm:$0xff] }
  0xbb   : > { %7284 = vmatmul.mubr.msk.f32.gmra.mrb[16].mxu0 %vm469_vm1, %v8449_v39  ;;  %7091 = vmatprep.mubr.msk.f32.mxu1 %vm469_vm1, %v1183_v40  ;;  %v3356_v40 = vld [vmem:[#allocation2 + $0xdd] sm:$0xff] }
  0xbc   : > { %7286 = vmatprep.mubr.msk.f32.mxu0 %vm469_vm1, %v8451_v41 }
  0xbe   : > { %7092 = vmatmul.mubr.msk.f32.vlgmr.msra.gmra.mrb[0].mxu1 %vm469_vm1, %v1184_v43  ;;  %v3358_v43 = vld [vmem:[#allocation2 + $0xed] sm:$0xff] }
  0xbf   : > { %7287 = vmatmul.mubr.msk.f32.gmra.mrb[18].mxu0 %vm469_vm1, %v8459_v45  ;;  %7094 = vmatprep.mubr.msk.f32.mxu1 %vm469_vm1, %v8167_v44  ;;  %v8484_v44 = vld [vmem:[#allocation2 + $0xcc] sm:$0xff] }
  0xc0   : > { %7289 = vmatprep.mubr.msk.f32.mxu0 %vm469_vm1, %v8461_v47  ;;  %7562 = vmatpush3.msk.msra.mxu1 %vm578_vm0, %v8162_v42  ;;  %v8496_v42 = vld [vmem:[#allocation2 + $0xdc] sm:$0xff] }
  0xc2   : > { %7095 = vmatmul.mubr.msk.f32.gmra.mrb[2].mxu1 %vm469_vm1, %v8169_v46  ;;  %v8498_v46 = vld [vmem:[#allocation2 + $0xe4] sm:$0xff] }
  0xc3   : > { %7290 = vmatmul.mubr.msk.f32.gmra.mrb[20].mxu0 %vm469_vm1, %v8470_v48  ;;  %7097 = vmatprep.mubr.msk.f32.mxu1 %vm469_vm1, %v8180_v49  ;;  %v8508_v49 = vld [vmem:[#allocation2 + $0xec] sm:$0xff] }
  0xc4   : > { %7292 = vmatprep.mubr.msk.f32.mxu0 %vm469_vm1, %v8472_v50 }
  0xc6   : > { %7098 = vmatmul.mubr.msk.f32.gmra.mrb[4].mxu1 %vm469_vm1, %v8187_v51  ;;  %v8510_v51 = vld [vmem:[#allocation2 + $0xf4] sm:$0xff] }
  0xc7   : > { %7293 = vmatmul.mubr.msk.f32.gmra.mrb[22].mxu0 %vm469_vm1, %v8484_v44  ;;  %7100 = vmatprep.mubr.msk.f32.mxu1 %vm469_vm1, %v8192_v53  ;;  %v8520_v53 = vld [vmem:[#allocation2 + $0xfc] sm:$0xff] }
  0xc8   : > { %7295 = vmatprep.mubr.msk.f32.mxu0 %vm469_vm1, %v8486_v52 }
  0xca   : > { %7101 = vmatmul.mubr.msk.f32.gmra.mrb[6].mxu1 %vm469_vm1, %v8200_v55  ;;  %v8522_v55 = vld [vmem:[#allocation2 + $0x104] sm:$0xff] }
  0xcb   : > { %7296 = vmatmul.mubr.msk.f32.gmra.mrb[24].mxu0 %vm469_vm1, %v8496_v42  ;;  %7103 = vmatprep.mubr.msk.f32.mxu1 %vm469_vm1, %v8202_v57  ;;  %v8532_v57 = vld [vmem:[#allocation2 + $0x10c] sm:$0xff] }
  0xcc   : > { %7298 = vmatprep.mubr.msk.f32.mxu0 %vm469_vm1, %v8498_v46 }
  0xce   : > { %7104 = vmatmul.mubr.msk.f32.gmra.mrb[8].mxu1 %vm469_vm1, %v8210_v59  ;;  %v8534_v59 = vld [vmem:[#allocation2 + $0x114] sm:$0xff] }
  0xcf   : > { %7299 = vmatmul.mubr.msk.f32.gmra.mrb[26].mxu0 %vm469_vm1, %v8508_v49  ;;  %7106 = vmatprep.mubr.msk.f32.mxu1 %vm469_vm1, %v8212_v61  ;;  %v8544_v61 = vld [vmem:[#allocation2 + $0x11c] sm:$0xff] }
  0xd0   : > { %7301 = vmatprep.mubr.msk.f32.mxu0 %vm469_vm1, %v8510_v51 }
  0xd2   : > { %7107 = vmatmul.mubr.msk.f32.gmra.mrb[10].mxu1 %vm469_vm1, %v8224_v0  ;;  %v8546_v0 = vld [vmem:[#allocation2 + $0x124] sm:$0xff] }
  0xd3   : > { %7302 = vmatmul.mubr.msk.f32.gmra.mrb[28].mxu0 %vm469_vm1, %v8520_v53  ;;  %7109 = vmatprep.mubr.msk.f32.mxu1 %vm469_vm1, %v8226_v2  ;;  %v8556_v2 = vld [vmem:[#allocation2 + $0x12c] sm:$0xff] }
  0xd4   : > { %7304 = vmatprep.mubr.msk.f32.mxu0 %vm469_vm1, %v8522_v55 }
  0xd6   : > { %7110 = vmatmul.mubr.msk.f32.gmra.mrb[12].mxu1 %vm469_vm1, %v8234_v4  ;;  %v1203_v4 = vld [vmem:[#allocation2 + $0xa2] sm:$0xff] }
  0xd7   : > { %7305 = vmatmul.mubr.msk.f32.gmra.mrb[30].mxu0 %vm469_vm1, %v8532_v57  ;;  %7112 = vmatprep.mubr.msk.f32.mxu1 %vm469_vm1, %v8236_v6  ;;  %v8569_v6 = vld [vmem:[%s10336_s1 + $0x20] sm:$0x7] }
  0xd8   : > { %7307 = vmatprep.mubr.msk.f32.mxu0 %vm469_vm1, %v8534_v59 }
  0xda   : > { %7113 = vmatmul.mubr.msk.f32.gmra.mrb[14].mxu1 %vm469_vm1, %v8244_v8  ;;  %v1204_v8 = vld [vmem:[#allocation2 + $0xaa] sm:$0xff] }
  0xdb   : > { %7308 = vmatmul.mubr.msk.f32.gmra.mrb[32].mxu0 %vm469_vm1, %v8544_v61  ;;  %7115 = vmatprep.mubr.msk.f32.mxu1 %vm469_vm1, %v8249_v11  ;;  %v1205_v11 = vld [vmem:[#allocation2 + $0xb2] sm:$0xff] }
  0xdc   : > { %7310 = vmatprep.mubr.msk.f32.mxu0 %vm469_vm1, %v8546_v0 }
  0xde   : > { %7116 = vmatmul.mubr.msk.f32.gmra.mrb[16].mxu1 %vm469_vm1, %v8259_v13  ;;  %v1206_v13 = vld [vmem:[#allocation2 + $0xba] sm:$0xff] }
  0xdf   : > { %7311 = vmatmul.mubr.msk.f32.gmra.mrb[34].mxu0 %vm469_vm1, %v8556_v2  ;;  %7118 = vmatprep.mubr.msk.f32.mxu1 %vm469_vm1, %v8261_v15  ;;  %v1207_v15 = vld [vmem:[#allocation2 + $0xc2] sm:$0xff] }
  0xe0   : > { %7315 = vmatprep.mubr.msk.f32.mxu0 %vm469_vm1, %v8363_v63  ;;  %v1214_v63 = vld [vmem:[#allocation2 + $0xfa] sm:$0xff] }
  0xe2   : > { %7119 = vmatmul.mubr.msk.f32.gmra.mrb[18].mxu1 %vm469_vm1, %v8269_v17  ;;  %v1208_v17 = vld [vmem:[#allocation2 + $0xca] sm:$0xff] }
  0xe3   : > { %7316 = vmatmul.mubr.msk.f32.vlgmr.msra.gmra.mrb[0].mxu0 %vm469_vm1, %v8375_v5  ;;  %7121 = vmatprep.mubr.msk.f32.mxu1 %vm469_vm1, %v1203_v4  ;;  %v1217_v5 = vld [vmem:[#allocation2 + $0x112] sm:$0xff] }
  0xe4   : > { %7370 = vmatpush3.msk.msra.mxu0 %vm578_vm0, %v8368_v1  ;;  %7318 = vmatprep.mubr.msk.f32.mxu0 %vm469_vm1, %v8379_v9  ;;  %v1215_v1 = vld [vmem:[#allocation2 + $0x102] sm:$0xff] }
  0xe5   : > { %7425 = vmatprep.subr.msk.mxu0 %vm578_vm0, %v8569_v6  ;;  %v1647_v9 = vld [vmem:[#allocation2 + $0x122] sm:$0xff] }
  0xe6   : > { %7122 = vmatmul.mubr.msk.f32.gmra.mrb[20].mxu1 %vm469_vm1, %v1204_v8 }
  0xe7   : > { %7319 = vmatmul.mubr.msk.f32.gmra.mrb[2].mxu0 %vm469_vm1, %v8389_v10  ;;  %7124 = vmatprep.mubr.msk.f32.mxu1 %vm469_vm1, %v1205_v11  ;;  %v1648_v10 = vld [vmem:[#allocation2 + $0x12a] sm:$0xff] }
  0xe8   : > { %7321 = vmatprep.mubr.msk.f32.mxu0 %vm469_vm1, %v8391_v14  ;;  %v3333_v14 = vld [vmem:[#allocation2 + $0x25] sm:$0xff] }
  0xea   : > { %7125 = vmatmul.mubr.msk.f32.gmra.mrb[22].mxu1 %vm469_vm1, %v1206_v13 }
  0xeb   : > { %7322 = vmatmul.mubr.msk.f32.gmra.mrb[4].mxu0 %vm469_vm1, %v8399_v18  ;;  %7127 = vmatprep.mubr.msk.f32.mxu1 %vm469_vm1, %v1207_v15  ;;  %v3335_v18 = vld [vmem:[#allocation2 + $0x35] sm:$0xff] }
  0xec   : > { %7324 = vmatprep.mubr.msk.f32.mxu0 %vm469_vm1, %v8401_v20  ;;  %v3337_v20 = vld [vmem:[#allocation2 + $0x45] sm:$0xff] }
  0xee   : > { %7128 = vmatmul.mubr.msk.f32.gmra.mrb[24].mxu1 %vm469_vm1, %v1208_v17 }
  0xef   : > { %7325 = vmatmul.mubr.msk.f32.gmra.mrb[6].mxu0 %vm469_vm1, %v8409_v22  ;;  %7130 = vmatprep.mubr.msk.f32.mxu1 %vm469_vm1, %v1209_v54  ;;  %v3339_v22 = vld [vmem:[#allocation2 + $0x55] sm:$0xff] }
  0xf0   : > { %7327 = vmatprep.mubr.msk.f32.mxu0 %vm469_vm1, %v8411_v25  ;;  %v3341_v25 = vld [vmem:[#allocation2 + $0x65] sm:$0xff] }
  0xf2   : > { %7131 = vmatmul.mubr.msk.f32.gmra.mrb[26].mxu1 %vm469_vm1, %v1210_v56 }
  0xf3   : > { %7328 = vmatmul.mubr.msk.f32.gmra.mrb[8].mxu0 %vm469_vm1, %v8419_v27  ;;  %7133 = vmatprep.mubr.msk.f32.mxu1 %vm469_vm1, %v1211_v58  ;;  %v3343_v27 = vld [vmem:[#allocation2 + $0x75] sm:$0xff] }
  0xf4   : > { %7330 = vmatprep.mubr.msk.f32.mxu0 %vm469_vm1, %v8421_v29  ;;  %v3345_v29 = vld [vmem:[#allocation2 + $0x85] sm:$0xff] }
  0xf6   : > { %7134 = vmatmul.mubr.msk.f32.gmra.mrb[28].mxu1 %vm469_vm1, %v1212_v60 }
  0xf7   : > { %7331 = vmatmul.mubr.msk.f32.gmra.mrb[10].mxu0 %vm469_vm1, %v8429_v31  ;;  %7136 = vmatprep.mubr.msk.f32.mxu1 %vm469_vm1, %v1213_v62  ;;  %v3347_v31 = vld [vmem:[#allocation2 + $0x95] sm:$0xff] }
  0xf8   : > { %7333 = vmatprep.mubr.msk.f32.mxu0 %vm469_vm1, %v8431_v33  ;;  %v3349_v33 = vld [vmem:[#allocation2 + $0xa5] sm:$0xff] }
  0xfa   : > { %7137 = vmatmul.mubr.msk.f32.gmra.mrb[30].mxu1 %vm469_vm1, %v1214_v63 }
  0xfb   : > { %7334 = vmatmul.mubr.msk.f32.gmra.mrb[12].mxu0 %vm469_vm1, %v8439_v35  ;;  %7139 = vmatprep.mubr.msk.f32.mxu1 %vm469_vm1, %v1215_v1  ;;  %v3351_v35 = vld [vmem:[#allocation2 + $0xb5] sm:$0xff] }
  0xfc   : > { %7336 = vmatprep.mubr.msk.f32.mxu0 %vm469_vm1, %v8441_v37  ;;  %v3353_v37 = vld [vmem:[#allocation2 + $0xc5] sm:$0xff] }
  0xfe   : > { %7140 = vmatmul.mubr.msk.f32.gmra.mrb[32].mxu1 %vm469_vm1, %v1216_v3 }
  0xff   : > { %7337 = vmatmul.mubr.msk.f32.gmra.mrb[14].mxu0 %vm469_vm1, %v8449_v39  ;;  %7142 = vmatprep.mubr.msk.f32.mxu1 %vm469_vm1, %v1217_v5  ;;  %v3355_v39 = vld [vmem:[#allocation2 + $0xd5] sm:$0xff] }
 0x100   : > { %7339 = vmatprep.mubr.msk.f32.mxu0 %vm469_vm1, %v8451_v41  ;;  %v3357_v41 = vld [vmem:[#allocation2 + $0xe5] sm:$0xff] }
 0x102   : > { %7143 = vmatmul.mubr.msk.f32.gmra.mrb[34].mxu1 %vm469_vm1, %v1218_v7 }
 0x103   : > { %7340 = vmatmul.mubr.msk.f32.gmra.mrb[16].mxu0 %vm469_vm1, %v8459_v45  ;;  %7174 = vmatprep.mubr.msk.f32.mxu1 %vm469_vm1, %v1203_v4  ;;  %v3359_v45 = vld [vmem:[#allocation2 + $0xf5] sm:$0xff]  ;;  %v4290_v4 = vld [vmem:[%s10338_s3] sm:$0xff] }
 0x104   : > { %7342 = vmatprep.mubr.msk.f32.mxu0 %vm469_vm1, %v8461_v47  ;;  %v3360_v47 = vld [vmem:[#allocation2 + $0xfd] sm:$0xff] }
 0x106   : > { %7175 = vmatmul.mubr.msk.f32.vlgmr.msra.gmra.mrb[18].mxu1 %vm469_vm1, %v1204_v8  ;;  %v4292_v8 = vld [vmem:[%s10338_s3 + $0x10] sm:$0xff] }
 0x107   : > { %7343 = vmatmul.mubr.msk.f32.gmra.mrb[18].mxu0 %vm469_vm1, %v8470_v48  ;;  %7177 = vmatprep.mubr.msk.f32.mxu1 %vm469_vm1, %v1205_v11  ;;  %v3361_v48 = vld [vmem:[#allocation2 + $0x105] sm:$0xff] }
 0x108   : > { %7345 = vmatprep.mubr.msk.f32.mxu0 %vm469_vm1, %v8472_v50  ;;  %v3362_v50 = vld [vmem:[#allocation2 + $0x10d] sm:$0xff]  ;;  %v3770_v11 = vld [vmem:[#allocation2 + $0x5e] sm:$0xff] }
 0x10a   : > { %7178 = vmatmul.mubr.msk.f32.gmra.mrb[20].mxu1 %vm469_vm1, %v1206_v13 }
 0x10b   : > { %7346 = vmatmul.mubr.msk.f32.gmra.mrb[20].mxu0 %vm469_vm1, %v8484_v44  ;;  %7180 = vmatprep.mubr.msk.f32.mxu1 %vm469_vm1, %v1207_v15  ;;  %v3363_v44 = vld [vmem:[#allocation2 + $0x115] sm:$0xff] }
 0x10c   : > { %7348 = vmatprep.mubr.msk.f32.mxu0 %vm469_vm1, %v8486_v52  ;;  %v3364_v52 = vld [vmem:[#allocation2 + $0x11d] sm:$0xff] }
 0x10d   : > { %v4293_v15 = vld [vmem:[%s10338_s3 + $0x18] sm:$0xff] }
 0x10e   : > { %7181 = vmatmul.mubr.msk.f32.gmra.mrb[22].mxu1 %vm469_vm1, %v1208_v17  ;;  %v3771_v17 = vld [vmem:[#allocation2 + $0x66] sm:$0xff] }
 0x10f   : > { %7349 = vmatmul.mubr.msk.f32.gmra.mrb[22].mxu0 %vm469_vm1, %v8496_v42  ;;  %7183 = vmatprep.mubr.msk.f32.mxu1 %vm469_vm1, %v1209_v54  ;;  %v3365_v42 = vld [vmem:[#allocation2 + $0x125] sm:$0xff]  ;;  %v4295_v54 = vpack.c.bf16 %v4293_v15, %v4292_v8 }
 0x110   : > { %7351 = vmatprep.mubr.msk.f32.mxu0 %vm469_vm1, %v8498_v46  ;;  %v3366_v46 = vld [vmem:[#allocation2 + $0x12d] sm:$0xff] }
 0x112   : > { %7184 = vmatmul.mubr.msk.f32.gmra.mrb[24].mxu1 %vm469_vm1, %v1210_v56  ;;  %v3772_v56 = vld [vmem:[#allocation2 + $0x6e] sm:$0xff] }
 0x113   : > { %7352 = vmatmul.mubr.msk.f32.gmra.mrb[24].mxu0 %vm469_vm1, %v8508_v49  ;;  %7186 = vmatprep.mubr.msk.f32.mxu1 %vm469_vm1, %v1211_v58  ;;  %v3367_v49 = vld [vmem:[#allocation2 + $0x135] sm:$0xff] }
 0x114   : > { %7354 = vmatprep.mubr.msk.f32.mxu0 %vm469_vm1, %v8510_v51  ;;  %v3368_v51 = vld [vmem:[#allocation2 + $0x13d] sm:$0xff] }
 0x115   : > { %v3773_v58 = vld [vmem:[#allocation2 + $0x76] sm:$0xff] }
 0x116   : > { %7187 = vmatmul.mubr.msk.f32.gmra.mrb[26].mxu1 %vm469_vm1, %v1212_v60  ;;  %v3774_v60 = vld [vmem:[#allocation2 + $0x7e] sm:$0xff] }
 0x117   : > { %7355 = vmatmul.mubr.msk.f32.gmra.mrb[26].mxu0 %vm469_vm1, %v8520_v53  ;;  %7189 = vmatprep.mubr.msk.f32.mxu1 %vm469_vm1, %v1213_v62  ;;  %v3763_v53 = vld [vmem:[#allocation2 + $0x26] sm:$0xff] }
 0x118   : > { %7357 = vmatprep.mubr.msk.f32.mxu0 %vm469_vm1, %v8522_v55  ;;  %v3764_v55 = vld [vmem:[#allocation2 + $0x2e] sm:$0xff]  ;;  %v3775_v62 = vld [vmem:[#allocation2 + $0x86] sm:$0xff] }
 0x11a   : > { %7190 = vmatmul.mubr.msk.f32.gmra.mrb[28].mxu1 %vm469_vm1, %v1214_v63  ;;  %v3776_v63 = vld [vmem:[#allocation2 + $0x8e] sm:$0xff] }
 0x11b   : > { %7358 = vmatmul.mubr.msk.f32.gmra.mrb[28].mxu0 %vm469_vm1, %v8532_v57  ;;  %7192 = vmatprep.mubr.msk.f32.mxu1 %vm469_vm1, %v1215_v1  ;;  %v3765_v57 = vld [vmem:[#allocation2 + $0x36] sm:$0xff] }
 0x11c   : > { %7360 = vmatprep.mubr.msk.f32.mxu0 %vm469_vm1, %v8534_v59  ;;  %v3766_v59 = vld [vmem:[#allocation2 + $0x3e] sm:$0xff]  ;;  %v3777_v1 = vld [vmem:[#allocation2 + $0x96] sm:$0xff] }
 0x11e   : > { %7193 = vmatmul.mubr.msk.f32.gmra.mrb[30].mxu1 %vm469_vm1, %v1216_v3  ;;  %v3778_v3 = vld [vmem:[#allocation2 + $0x9e] sm:$0xff] }
 0x11f   : > { %7361 = vmatmul.mubr.msk.f32.gmra.mrb[30].mxu0 %vm469_vm1, %v8544_v61  ;;  %7195 = vmatprep.mubr.msk.f32.mxu1 %vm469_vm1, %v1217_v5  ;;  %v3767_v61 = vld [vmem:[#allocation2 + $0x46] sm:$0xff] }
 0x120   : > { %7363 = vmatprep.mubr.msk.f32.mxu0 %vm469_vm1, %v8546_v0  ;;  %v3768_v0 = vld [vmem:[#allocation2 + $0x4e] sm:$0xff]  ;;  %v3779_v5 = vld [vmem:[#allocation2 + $0xa6] sm:$0xff] }
 0x122   : > { %7196 = vmatmul.mubr.msk.f32.gmra.mrb[32].mxu1 %vm469_vm1, %v1218_v7  ;;  %v3780_v7 = vld [vmem:[#allocation2 + $0xae] sm:$0xff] }
 0x123   : > { %7364 = vmatmul.mubr.msk.f32.gmra.mrb[32].mxu0 %vm469_vm1, %v8556_v2  ;;  %7198 = vmatprep.mubr.msk.f32.mxu1 %vm469_vm1, %v1647_v9  ;;  %v3769_v2 = vld [vmem:[#allocation2 + $0x56] sm:$0xff] }
 0x124   : > { %7366 = vmatprep.mubr.msk.f32.mxu0 %vm469_vm1, %v2937_v24  ;;  %v3781_v9 = vld [vmem:[#allocation2 + $0xb6] sm:$0xff] }
 0x126   : > { %7199 = vmatmul.mubr.msk.f32.gmra.mrb[34].mxu1 %vm469_vm1, %v1648_v10 }
 0x127   : > { %7367 = vmatmul.mubr.msk.f32.gmra.mrb[34].mxu0 %vm469_vm1, %v2938_v12  ;;  %v3782_v12 = vld [vmem:[#allocation2 + $0xbe] sm:$0xff] }
 0x128   : > { %7371 = vmatprep.mubr.msk.f32.mxu0 %vm469_vm1, %v3333_v14  ;;  %v3783_v14 = vld [vmem:[#allocation2 + $0xc6] sm:$0xff] }
 0x12b   : > { %7372 = vmatmul.mubr.msk.f32.vlgmr.msra.gmra.mrb[0].mxu0 %vm469_vm1, %v3334_v16 }
 0x12c   : > { %7426 = vmatpush3.msk.msra.mxu0 %vm578_vm0, %v8569_v6  ;;  %7374 = vmatprep.mubr.msk.f32.mxu0 %vm469_vm1, %v3335_v18  ;;  %v4291_v6 = vld [vmem:[%s10338_s3 + $0x8] sm:$0xff] }
 0x12d   : > { %v4294_v13 = vpack.c.bf16 %v4291_v6, %v4290_v4 }
 0x12f   : > { %7375 = vmatmul.mubr.msk.f32.gmra.mrb[2].mxu0 %vm469_vm1, %v3336_v19  ;;  %7481 = vmatprep.subr.bf16.mxu1 %v4294_v13  ;;  %v3784_v19 = vld [vmem:[#allocation2 + $0xce] sm:$0xff] }
 0x130   : > { %7377 = vmatprep.mubr.msk.f32.mxu0 %vm469_vm1, %v3337_v20  ;;  %7482 = vmatpush3.bf16.msra.mxu1 %v4294_v13  ;;  %v3785_v20 = vld [vmem:[#allocation2 + $0xd6] sm:$0xff] }
 0x131   : > { %7483 = vmatprep.subr.bf16.mxu1 %v4295_v54 }
 0x133   : > { %7378 = vmatmul.mubr.msk.f32.gmra.mrb[4].mxu0 %vm469_vm1, %v3338_v21 }
 0x134   : > { %7380 = vmatprep.mubr.msk.f32.mxu0 %vm469_vm1, %v3339_v22  ;;  %7484 = vmatpush3.bf16.msra.mxu1 %v4295_v54  ;;  %v4589_v54 = vld [vmem:[%s10340_s5] sm:$0xff] }
 0x137   : > { %7381 = vmatmul.mubr.msk.f32.gmra.mrb[6].mxu0 %vm469_vm1, %v3340_v23  ;;  %v3786_v23 = vld [vmem:[#allocation2 + $0xde] sm:$0xff] }
 0x138   : > { %7383 = vmatprep.mubr.msk.f32.mxu0 %vm469_vm1, %v3341_v25  ;;  %v3787_v25 = vld [vmem:[#allocation2 + $0xe6] sm:$0xff] }
 0x13b   : > { %7384 = vmatmul.mubr.msk.f32.gmra.mrb[8].mxu0 %vm469_vm1, %v3342_v26 }
 0x13c   : > { %7386 = vmatprep.mubr.msk.f32.mxu0 %vm469_vm1, %v3343_v27 }
 0x13f   : > { %7387 = vmatmul.mubr.msk.f32.gmra.mrb[10].mxu0 %vm469_vm1, %v3344_v28  ;;  %v3788_v28 = vld [vmem:[#allocation2 + $0xee] sm:$0xff] }
 0x140   : > { %7389 = vmatprep.mubr.msk.f32.mxu0 %vm469_vm1, %v3345_v29  ;;  %v3789_v29 = vld [vmem:[#allocation2 + $0xf6] sm:$0xff] }
 0x143   : > { %7390 = vmatmul.mubr.msk.f32.gmra.mrb[12].mxu0 %vm469_vm1, %v3346_v30 }
 0x144   : > { %7392 = vmatprep.mubr.msk.f32.mxu0 %vm469_vm1, %v3347_v31 }
 0x147   : > { %7393 = vmatmul.mubr.msk.f32.gmra.mrb[14].mxu0 %vm469_vm1, %v3348_v32  ;;  %v3790_v32 = vld [vmem:[#allocation2 + $0xfe] sm:$0xff] }
 0x148   : > { %7395 = vmatprep.mubr.msk.f32.mxu0 %vm469_vm1, %v3349_v33  ;;  %v3791_v33 = vld [vmem:[#allocation2 + $0x106] sm:$0xff] }
 0x14b   : > { %7396 = vmatmul.mubr.msk.f32.gmra.mrb[16].mxu0 %vm469_vm1, %v3350_v34 }
 0x14c   : > { %7398 = vmatprep.mubr.msk.f32.mxu0 %vm469_vm1, %v3351_v35 }
 0x14f   : > { %7399 = vmatmul.mubr.msk.f32.gmra.mrb[18].mxu0 %vm469_vm1, %v3352_v36  ;;  %v3792_v36 = vld [vmem:[#allocation2 + $0x10e] sm:$0xff] }
 0x150   : > { %7401 = vmatprep.mubr.msk.f32.mxu0 %vm469_vm1, %v3353_v37  ;;  %v3793_v37 = vld [vmem:[#allocation2 + $0x116] sm:$0xff] }
 0x153   : > { %7402 = vmatmul.mubr.msk.f32.gmra.mrb[20].mxu0 %vm469_vm1, %v3354_v38 }
 0x154   : > { %7404 = vmatprep.mubr.msk.f32.mxu0 %vm469_vm1, %v3355_v39 }
 0x157   : > { %7405 = vmatmul.mubr.msk.f32.gmra.mrb[22].mxu0 %vm469_vm1, %v3356_v40  ;;  %v3794_v40 = vld [vmem:[#allocation2 + $0x11e] sm:$0xff] }
 0x158   : > { %7407 = vmatprep.mubr.msk.f32.mxu0 %vm469_vm1, %v3357_v41  ;;  %v3795_v41 = vld [vmem:[#allocation2 + $0x126] sm:$0xff] }
 0x15b   : > { %7408 = vmatmul.mubr.msk.f32.gmra.mrb[24].mxu0 %vm469_vm1, %v3358_v43 }
 0x15c   : > { %7410 = vmatprep.mubr.msk.f32.mxu0 %vm469_vm1, %v3359_v45 }
 0x15f   : > { %7411 = vmatmul.mubr.msk.f32.gmra.mrb[26].mxu0 %vm469_vm1, %v3360_v47  ;;  %v3796_v47 = vld [vmem:[#allocation2 + $0x12e] sm:$0xff] }
 0x160   : > { %7413 = vmatprep.mubr.msk.f32.mxu0 %vm469_vm1, %v3361_v48  ;;  %v3797_v48 = vld [vmem:[#allocation2 + $0x136] sm:$0xff] }
 0x163   : > { %7414 = vmatmul.mubr.msk.f32.gmra.mrb[28].mxu0 %vm469_vm1, %v3362_v50 }
 0x164   : > { %7416 = vmatprep.mubr.msk.f32.mxu0 %vm469_vm1, %v3363_v44 }
 0x167   : > { %7417 = vmatmul.mubr.msk.f32.gmra.mrb[30].mxu0 %vm469_vm1, %v3364_v52  ;;  %v3798_v52 = vld [vmem:[#allocation2 + $0x13e] sm:$0xff] }
 0x168   : > { %7419 = vmatprep.mubr.msk.f32.mxu0 %vm469_vm1, %v3365_v42 }
 0x16b   : > { %7420 = vmatmul.mubr.msk.f32.gmra.mrb[32].mxu0 %vm469_vm1, %v3366_v46 }
 0x16c   : > { %7422 = vmatprep.mubr.msk.f32.mxu0 %vm469_vm1, %v3367_v49 }
 0x16f   : > { %7423 = vmatmul.mubr.msk.f32.gmra.mrb[34].mxu0 %vm469_vm1, %v3368_v51 }
 0x170   : > { %7427 = vmatprep.mubr.msk.f32.mxu0 %vm469_vm1, %v3763_v53 }
 0x173   : > { %7428 = vmatmul.mubr.msk.f32.vlgmr.msra.gmra.mrb[0].mxu0 %vm469_vm1, %v3764_v55 }
 0x174   : > { %7430 = vmatprep.mubr.msk.f32.mxu0 %vm469_vm1, %v3765_v57 }
 0x177   : > { %7431 = vmatmul.mubr.msk.f32.gmra.mrb[2].mxu0 %vm469_vm1, %v3766_v59 }
 0x178   : > { %7433 = vmatprep.mubr.msk.f32.mxu0 %vm469_vm1, %v3767_v61 }
 0x17b   : > { %7434 = vmatmul.mubr.msk.f32.gmra.mrb[4].mxu0 %vm469_vm1, %v3768_v0 }
 0x17c   : > { %7436 = vmatprep.mubr.msk.f32.mxu0 %vm469_vm1, %v3769_v2 }
 0x17f   : > { %7437 = vmatmul.mubr.msk.f32.gmra.mrb[6].mxu0 %vm469_vm1, %v3770_v11 }
 0x180   : > { %7439 = vmatprep.mubr.msk.f32.mxu0 %vm469_vm1, %v3771_v17 }
 0x183   : > { %7440 = vmatmul.mubr.msk.f32.gmra.mrb[8].mxu0 %vm469_vm1, %v3772_v56  ;;  %v4590_v56 = vld [vmem:[%s10340_s5 + $0x8] sm:$0xff] }
 0x184   : > { %7442 = vmatprep.mubr.msk.f32.mxu0 %vm469_vm1, %v3773_v58  ;;  %v4593_v58 = vpack.c.bf16 %v4590_v56, %v4589_v54 }
 0x186   : > { %7521 = vmatprep.subr.bf16.mxu1 %v4593_v58 }
 0x187   : > { %7443 = vmatmul.mubr.msk.f32.gmra.mrb[10].mxu0 %vm469_vm1, %v3774_v60 }
 0x188   : > { %7445 = vmatprep.mubr.msk.f32.mxu0 %vm469_vm1, %v3775_v62  ;;  %v8846_v62 = vld [vmem:[%s10337_s2] ss:$0 sm:$0xff] }
 0x18b   : > { %7446 = vmatmul.mubr.msk.f32.gmra.mrb[12].mxu0 %vm469_vm1, %v3776_v63 }
 0x18c   : > { %7448 = vmatprep.mubr.msk.f32.mxu0 %vm469_vm1, %v3777_v1 }
 0x18f   : > { %7449 = vmatmul.mubr.msk.f32.gmra.mrb[14].mxu0 %vm469_vm1, %v3778_v3 }
 0x190   : > { %7451 = vmatprep.mubr.msk.f32.mxu0 %vm469_vm1, %v3779_v5 }
 0x191   : > { %v8746_v24 = vpop.f32.mrb[0].mxu1 }
 0x192   : > { %v8749_v10 = vpop.f32.mrb[1].mxu1 }
 0x193   : > { %7452 = vmatmul.mubr.msk.f32.gmra.mrb[16].mxu0 %vm469_vm1, %v3780_v7 }
 0x194   : > { %7454 = vmatprep.mubr.msk.f32.mxu0 %vm469_vm1, %v3781_v9 }
 0x195   : > { %v8752_v16 = vpop.f32.mrb[2].mxu1 }
 0x196   : > { %v8755_v18 = vpop.f32.mrb[3].mxu1 }
 0x197   : > { %7455 = vmatmul.mubr.msk.f32.gmra.mrb[18].mxu0 %vm469_vm1, %v3782_v12 }
 0x198   : > { %7457 = vmatprep.mubr.msk.f32.mxu0 %vm469_vm1, %v3783_v14 }
 0x199   : > { %v8758_v21 = vpop.f32.mrb[4].mxu1 }
 0x19a   : > { %v8761_v22 = vpop.f32.mrb[5].mxu1 }
 0x19b   : > { %7458 = vmatmul.mubr.msk.f32.gmra.mrb[20].mxu0 %vm469_vm1, %v3784_v19 }
 0x19c   : > { %7460 = vmatprep.mubr.msk.f32.mxu0 %vm469_vm1, %v3785_v20 }
 0x19d   : > { %v8764_v26 = vpop.f32.mrb[6].mxu1 }
 0x19e   : > { %v8767_v27 = vpop.f32.mrb[7].mxu1 }
 0x19f   : > { %7461 = vmatmul.mubr.msk.f32.gmra.mrb[22].mxu0 %vm469_vm1, %v3786_v23 }
 0x1a0   : > { %7463 = vmatprep.mubr.msk.f32.mxu0 %vm469_vm1, %v3787_v25 }
 0x1a1   : > { %v8770_v30 = vpop.f32.mrb[8].mxu1 }
 0x1a2   : > { %v8773_v31 = vpop.f32.mrb[9].mxu1 }
 0x1a3   : > { %7464 = vmatmul.mubr.msk.f32.gmra.mrb[24].mxu0 %vm469_vm1, %v3788_v28 }
 0x1a4   : > { %7466 = vmatprep.mubr.msk.f32.mxu0 %vm469_vm1, %v3789_v29 }
 0x1a5   : > { %v8776_v34 = vpop.f32.mrb[10].mxu1 }
 0x1a6   : > { %v8779_v35 = vpop.f32.mrb[11].mxu1 }
 0x1a7   : > { %7467 = vmatmul.mubr.msk.f32.gmra.mrb[26].mxu0 %vm469_vm1, %v3790_v32 }
 0x1a8   : > { %7469 = vmatprep.mubr.msk.f32.mxu0 %vm469_vm1, %v3791_v33 }
 0x1a9   : > { %v8782_v38 = vpop.f32.mrb[12].mxu1 }
 0x1aa   : > { %v8785_v39 = vpop.f32.mrb[13].mxu1 }
 0x1ab   : > { %7470 = vmatmul.mubr.msk.f32.gmra.mrb[28].mxu0 %vm469_vm1, %v3792_v36  ;;  %v4591_v36 = vld [vmem:[%s10340_s5 + $0x10] sm:$0xff] }
 0x1ac   : > { %7472 = vmatprep.mubr.msk.f32.mxu0 %vm469_vm1, %v3793_v37 }
 0x1ad   : > { %v8788_v43 = vpop.f32.mrb[14].mxu1 }
 0x1ae   : > { %v8791_v45 = vpop.f32.mrb[15].mxu1 }
 0x1af   : > { %7473 = vmatmul.mubr.msk.f32.gmra.mrb[30].mxu0 %vm469_vm1, %v3794_v40 }
 0x1b0   : > { %7475 = vmatprep.mubr.msk.f32.mxu0 %vm469_vm1, %v3795_v41 }
 0x1b1   : > { %v8794_v50 = vpop.f32.mrb[16].mxu1 }
 0x1b2   : > { %v8797_v44 = vpop.f32.mrb[17].mxu1 }
 0x1b3   : > { %7476 = vmatmul.mubr.msk.f32.gmra.mrb[32].mxu0 %vm469_vm1, %v3796_v47 }
 0x1b4   : > { %7478 = vmatprep.mubr.msk.f32.mxu0 %vm469_vm1, %v3797_v48 }
 0x1b7   : > { %7479 = vmatmul.mubr.msk.f32.gmra.mrb[34].mxu0 %vm469_vm1, %v3798_v52 }
 0x1d9   : > { %v8801_v42 = vpop.f32.mrb[18].mxu1 }
 0x1da   : > { %v8803_v46 = vpop.f32.mrb[19].mxu1 }
 0x1dd   : > { %v8805_v49 = vpop.f32.mrb[20].mxu1 }
 0x1de   : > { %v8807_v51 = vpop.f32.mrb[21].mxu1 }
 0x1e1   : > { %v8809_v53 = vpop.f32.mrb[22].mxu1 }
 0x1e2   : > { %v8811_v55 = vpop.f32.mrb[23].mxu1 }
 0x1e5   : > { %v8813_v57 = vpop.f32.mrb[24].mxu1 }
 0x1e6   : > { %v8815_v59 = vpop.f32.mrb[25].mxu1 }
 0x1e9   : > { %v8817_v61 = vpop.f32.mrb[26].mxu1 }
 0x1ea   : > { %v8819_v0 = vpop.f32.mrb[27].mxu1 }
 0x1ed   : > { %v8821_v2 = vpop.f32.mrb[28].mxu1 }
 0x1ee   : > { %v8823_v4 = vpop.f32.mrb[29].mxu1 }
 0x1f1   : > { %v8825_v6 = vpop.f32.mrb[30].mxu1 }
 0x1f2   : > { %v8827_v8 = vpop.f32.mrb[31].mxu1 }
 0x1f5   : > { %v8829_v11 = vpop.f32.mrb[32].mxu1 }
 0x1f6   : > { %v8831_v13 = vpop.f32.mrb[33].mxu1 }
 0x1f9   : > { %v8833_v15 = vpop.f32.mrb[34].mxu1 }
 0x1fa   : > { %v8835_v17 = vpop.f32.mrb[35].mxu1 }
 0x246   : > { %v7429_v60 = vpop.f32.mrb[0].mxu0 }
 0x247   : > { %v7563_v63 = vadd.f32 %v7429_v60, %v8746_v24  ;;  %v3978_v1 = vpop.f32.mrb[1].mxu0 }
 0x248   : > { %v7564_v3 = vadd.f32 %v3978_v1, %v8749_v10 }
 0x249   : > { %v4201_v5 = vadd.f32 %v7563_v63, %v8846_v62 }
 0x24a   : > { %v4200_v7 = vadd.f32 %v7564_v3, %v8846_v62  ;;  %v7432_v9 = vpop.f32.mrb[2].mxu0 }
 0x24b   : > { %v4237_v12 = vmax.f32 %v4201_v5, 0.0  ;;  %v7565_v14 = vadd.f32 %v7432_v9, %v8752_v16  ;;  %v3988_v19 = vpop.f32.mrb[3].mxu0  ;;  %v4592_v16 = vld [vmem:[%s10340_s5 + $0x18] sm:$0xff] }
 0x24c   : > { %v4236_v20 = vmax.f32 %v4200_v7, 0.0  ;;  %v7566_v23 = vadd.f32 %v3988_v19, %v8755_v18  ;;  %v4594_v48 = vpack.c.bf16 %v4592_v16, %v4591_v36 }
 0x24d   : > { %v4203_v25 = vadd.f32 %v7565_v14, %v8846_v62 }
 0x24e   : > { %v4272_v28 = vpack.c.bf16 %v4237_v12, %v4236_v20  ;;  %v4202_v24 = vadd.f32 %v7566_v23, %v8846_v62  ;;  %v7435_v29 = vpop.f32.mrb[4].mxu0 }
 0x24f   : > { %v4239_v10 = vmax.f32 %v4203_v25, 0.0  ;;  %v7567_v32 = vadd.f32 %v7435_v29, %v8758_v21  ;;  %v3998_v33 = vpop.f32.mrb[5].mxu0 }
 0x250   : > { %v4238_v18 = vmax.f32 %v4202_v24, 0.0  ;;  %v7568_v37 = vadd.f32 %v3998_v33, %v8761_v22  ;;  %7485 = vmatprep.mubr.msk.bf16.mxu1 %vm4303_vm2, %v4272_v28 }
 0x251   : > { %v4205_v40 = vadd.f32 %v7567_v32, %v8846_v62 }
 0x252   : > { %v4273_v41 = vpack.c.bf16 %v4239_v10, %v4238_v18  ;;  %v4204_v47 = vadd.f32 %v7568_v37, %v8846_v62  ;;  %v7438_v21 = vpop.f32.mrb[6].mxu0 }
 0x253   : > { %v4241_v52 = vmax.f32 %v4205_v40, 0.0  ;;  %v7569_v54 = vadd.f32 %v7438_v21, %v8764_v26  ;;  %v4008_v56 = vpop.f32.mrb[7].mxu0 }
 0x254   : > { %v4240_v60 = vmax.f32 %v4204_v47, 0.0  ;;  %v7570_v63 = vadd.f32 %v4008_v56, %v8767_v27  ;;  %7486 = vmatmul.mubr.msk.bf16.vlgmr.msra.gmra.mrb[36].mxu1 %vm4303_vm2, %v4273_v41 }
 0x255   : > { %v4207_v22 = vadd.f32 %v7569_v54, %v8846_v62  ;;  %7522 = vmatpush3.bf16.msra.mxu1 %v4593_v58 }
 0x256   : > { %v4274_v1 = vpack.c.bf16 %v4241_v52, %v4240_v60  ;;  %v4206_v3 = vadd.f32 %v7570_v63, %v8846_v62  ;;  %v7441_v5 = vpop.f32.mrb[8].mxu0  ;;  %7523 = vmatprep.subr.bf16.mxu1 %v4594_v48 }
 0x257   : > { %v4243_v7 = vmax.f32 %v4207_v22, 0.0  ;;  %v7571_v9 = vadd.f32 %v7441_v5, %v8770_v30  ;;  %v4018_v12 = vpop.f32.mrb[9].mxu0 }
 0x258   : > { %v4242_v14 = vmax.f32 %v4206_v3, 0.0  ;;  %v7572_v26 = vadd.f32 %v4018_v12, %v8773_v31  ;;  %7489 = vmatprep.mubr.msk.bf16.mxu1 %vm4303_vm2, %v4274_v1 }
 0x259   : > { %v4209_v27 = vadd.f32 %v7571_v9, %v8846_v62  ;;  %7524 = vmatpush3.bf16.msra.mxu1 %v4594_v48 }
 0x25a   : > { %v4275_v19 = vpack.c.bf16 %v4243_v7, %v4242_v14  ;;  %v4208_v58 = vadd.f32 %v7572_v26, %v8846_v62  ;;  %v7444_v20 = vpop.f32.mrb[10].mxu0 }
 0x25b   : > { %v4245_v23 = vmax.f32 %v4209_v27, 0.0  ;;  %v7573_v25 = vadd.f32 %v7444_v20, %v8776_v34  ;;  %v4028_v28 = vpop.f32.mrb[11].mxu0 }
 0x25c   : > { %v4244_v24 = vmax.f32 %v4208_v58, 0.0  ;;  %v7574_v30 = vadd.f32 %v4028_v28, %v8779_v35  ;;  %7490 = vmatmul.mubr.msk.bf16.gmra.mrb[40].mxu1 %vm4303_vm2, %v4275_v19 }
 0x25d   : > { %v4211_v31 = vadd.f32 %v7573_v25, %v8846_v62 }
 0x25e   : > { %v4276_v29 = vpack.c.bf16 %v4245_v23, %v4244_v24  ;;  %v4210_v10 = vadd.f32 %v7574_v30, %v8846_v62  ;;  %v7447_v32 = vpop.f32.mrb[12].mxu0 }
 0x25f   : > { %v4247_v33 = vmax.f32 %v4211_v31, 0.0  ;;  %v7575_v36 = vadd.f32 %v7447_v32, %v8782_v38  ;;  %v4038_v16 = vpop.f32.mrb[13].mxu0 }
 0x260   : > { %v4246_v18 = vmax.f32 %v4210_v10, 0.0  ;;  %v7576_v37 = vadd.f32 %v4038_v16, %v8785_v39  ;;  %7493 = vmatprep.mubr.msk.bf16.mxu1 %vm4303_vm2, %v4276_v29 }
 0x261   : > { %v4213_v34 = vadd.f32 %v7575_v36, %v8846_v62 }
 0x262   : > { %v4277_v35 = vpack.c.bf16 %v4247_v33, %v4246_v18  ;;  %v4212_v40 = vadd.f32 %v7576_v37, %v8846_v62  ;;  %v7450_v41 = vpop.f32.mrb[14].mxu0 }
 0x263   : > { %v4249_v47 = vmax.f32 %v4213_v34, 0.0  ;;  %v7577_v21 = vadd.f32 %v7450_v41, %v8788_v43  ;;  %v4048_v48 = vpop.f32.mrb[15].mxu0 }
 0x264   : > { %v4248_v52 = vmax.f32 %v4212_v40, 0.0  ;;  %v7578_v54 = vadd.f32 %v4048_v48, %v8791_v45  ;;  %7494 = vmatmul.mubr.msk.bf16.gmra.mrb[44].mxu1 %vm4303_vm2, %v4277_v35 }
 0x265   : > { %v4215_v38 = vadd.f32 %v7577_v21, %v8846_v62 }
 0x266   : > { %v4278_v39 = vpack.c.bf16 %v4249_v47, %v4248_v52  ;;  %v4214_v56 = vadd.f32 %v7578_v54, %v8846_v62  ;;  %v7453_v60 = vpop.f32.mrb[16].mxu0 }
 0x267   : > { %v4251_v63 = vmax.f32 %v4215_v38, 0.0  ;;  %v7579_v22 = vadd.f32 %v7453_v60, %v8794_v50  ;;  %v4058_v1 = vpop.f32.mrb[17].mxu0 }
 0x268   : > { %v4250_v3 = vmax.f32 %v4214_v56, 0.0  ;;  %v7580_v5 = vadd.f32 %v4058_v1, %v8797_v44  ;;  %7497 = vmatprep.mubr.msk.bf16.mxu1 %vm4303_vm2, %v4278_v39 }
 0x269   : > { %v4217_v43 = vadd.f32 %v7579_v22, %v8846_v62 }
 0x26a   : > { %v4279_v45 = vpack.c.bf16 %v4251_v63, %v4250_v3  ;;  %v4216_v7 = vadd.f32 %v7580_v5, %v8846_v62  ;;  %v7456_v9 = vpop.f32.mrb[18].mxu0 }
 0x26b   : > { %v4253_v12 = vmax.f32 %v4217_v43, 0.0  ;;  %v7581_v14 = vadd.f32 %v7456_v9, %v8801_v42  ;;  %v4068_v26 = vpop.f32.mrb[19].mxu0 }
 0x26c   : > { %v4252_v27 = vmax.f32 %v4216_v7, 0.0  ;;  %v7582_v19 = vadd.f32 %v4068_v26, %v8803_v46  ;;  %7498 = vmatmul.mubr.msk.bf16.gmra.mrb[48].mxu1 %vm4303_vm2, %v4279_v45 }
 0x26d   : > { %v4219_v50 = vadd.f32 %v7581_v14, %v8846_v62 }
 0x26e   : > { %v4280_v44 = vpack.c.bf16 %v4253_v12, %v4252_v27  ;;  %v4218_v58 = vadd.f32 %v7582_v19, %v8846_v62  ;;  %v7459_v20 = vpop.f32.mrb[20].mxu0 }
 0x26f   : > { %v4255_v23 = vmax.f32 %v4219_v50, 0.0  ;;  %v7583_v25 = vadd.f32 %v7459_v20, %v8805_v49  ;;  %v4078_v28 = vpop.f32.mrb[21].mxu0 }
 0x270   : > { %v4254_v24 = vmax.f32 %v4218_v58, 0.0  ;;  %v7584_v30 = vadd.f32 %v4078_v28, %v8807_v51  ;;  %7501 = vmatprep.mubr.msk.bf16.mxu1 %vm4303_vm2, %v4280_v44 }
 0x271   : > { %v4221_v42 = vadd.f32 %v7583_v25, %v8846_v62 }
 0x272   : > { %v4281_v46 = vpack.c.bf16 %v4255_v23, %v4254_v24  ;;  %v4220_v31 = vadd.f32 %v7584_v30, %v8846_v62  ;;  %v7462_v29 = vpop.f32.mrb[22].mxu0 }
 0x273   : > { %v4257_v10 = vmax.f32 %v4221_v42, 0.0  ;;  %v7585_v32 = vadd.f32 %v7462_v29, %v8809_v53  ;;  %v4088_v33 = vpop.f32.mrb[23].mxu0 }
 0x274   : > { %v4256_v36 = vmax.f32 %v4220_v31, 0.0  ;;  %v7586_v16 = vadd.f32 %v4088_v33, %v8811_v55  ;;  %7502 = vmatmul.mubr.msk.bf16.gmra.mrb[52].mxu1 %vm4303_vm2, %v4281_v46 }
 0x275   : > { %v4223_v49 = vadd.f32 %v7585_v32, %v8846_v62 }
 0x276   : > { %v4282_v51 = vpack.c.bf16 %v4257_v10, %v4256_v36  ;;  %v4222_v18 = vadd.f32 %v7586_v16, %v8846_v62  ;;  %v7465_v37 = vpop.f32.mrb[24].mxu0 }
 0x277   : > { %v4259_v34 = vmax.f32 %v4223_v49, 0.0  ;;  %v7587_v35 = vadd.f32 %v7465_v37, %v8813_v57  ;;  %v4098_v40 = vpop.f32.mrb[25].mxu0 }
 0x278   : > { %v4258_v41 = vmax.f32 %v4222_v18, 0.0  ;;  %v7588_v47 = vadd.f32 %v4098_v40, %v8815_v59  ;;  %7505 = vmatprep.mubr.msk.bf16.mxu1 %vm4303_vm2, %v4282_v51 }
 0x279   : > { %v4225_v53 = vadd.f32 %v7587_v35, %v8846_v62 }
 0x27a   : > { %v4283_v55 = vpack.c.bf16 %v4259_v34, %v4258_v41  ;;  %v4224_v21 = vadd.f32 %v7588_v47, %v8846_v62  ;;  %v7468_v48 = vpop.f32.mrb[26].mxu0 }
 0x27b   : > { %v4261_v52 = vmax.f32 %v4225_v53, 0.0  ;;  %v7589_v54 = vadd.f32 %v7468_v48, %v8817_v61  ;;  %v4108_v38 = vpop.f32.mrb[27].mxu0 }
 0x27c   : > { %v4260_v39 = vmax.f32 %v4224_v21, 0.0  ;;  %v7590_v56 = vadd.f32 %v4108_v38, %v8819_v0  ;;  %7506 = vmatmul.mubr.msk.bf16.gmra.mrb[56].mxu1 %vm4303_vm2, %v4283_v55 }
 0x27d   : > { %v4227_v57 = vadd.f32 %v7589_v54, %v8846_v62 }
 0x27e   : > { %v4284_v59 = vpack.c.bf16 %v4261_v52, %v4260_v39  ;;  %v4226_v60 = vadd.f32 %v7590_v56, %v8846_v62  ;;  %v7471_v63 = vpop.f32.mrb[28].mxu0 }
 0x27f   : > { %v4263_v22 = vmax.f32 %v4227_v57, 0.0  ;;  %v7591_v1 = vadd.f32 %v7471_v63, %v8821_v2  ;;  %v4118_v3 = vpop.f32.mrb[29].mxu0 }
 0x280   : > { %v4262_v5 = vmax.f32 %v4226_v60, 0.0  ;;  %v7592_v43 = vadd.f32 %v4118_v3, %v8823_v4  ;;  %7509 = vmatprep.mubr.msk.bf16.mxu1 %vm4303_vm2, %v4284_v59 }
 0x281   : > { %v4229_v61 = vadd.f32 %v7591_v1, %v8846_v62 }
 0x282   : > { %v4285_v0 = vpack.c.bf16 %v4263_v22, %v4262_v5  ;;  %v4228_v45 = vadd.f32 %v7592_v43, %v8846_v62  ;;  %v7474_v7 = vpop.f32.mrb[30].mxu0 }
 0x283   : > { %v4265_v9 = vmax.f32 %v4229_v61, 0.0  ;;  %v7593_v12 = vadd.f32 %v7474_v7, %v8825_v6  ;;  %v4128_v14 = vpop.f32.mrb[31].mxu0 }
 0x284   : > { %v4264_v26 = vmax.f32 %v4228_v45, 0.0  ;;  %v7594_v27 = vadd.f32 %v4128_v14, %v8827_v8  ;;  %7510 = vmatmul.mubr.msk.bf16.gmra.mrb[60].mxu1 %vm4303_vm2, %v4285_v0 }
 0x285   : > { %v4231_v2 = vadd.f32 %v7593_v12, %v8846_v62 }
 0x286   : > { %v4286_v4 = vpack.c.bf16 %v4265_v9, %v4264_v26  ;;  %v4230_v19 = vadd.f32 %v7594_v27, %v8846_v62  ;;  %v7477_v50 = vpop.f32.mrb[32].mxu0 }
 0x287   : > { %v4267_v44 = vmax.f32 %v4231_v2, 0.0  ;;  %v7595_v58 = vadd.f32 %v7477_v50, %v8829_v11  ;;  %v4138_v20 = vpop.f32.mrb[33].mxu0 }
 0x288   : > { %v4266_v23 = vmax.f32 %v4230_v19, 0.0  ;;  %v7596_v25 = vadd.f32 %v4138_v20, %v8831_v13  ;;  %7513 = vmatprep.mubr.msk.bf16.mxu1 %vm4303_vm2, %v4286_v4 }
 0x289   : > { %v4233_v6 = vadd.f32 %v7595_v58, %v8846_v62 }
 0x28a   : > { %v4287_v8 = vpack.c.bf16 %v4267_v44, %v4266_v23  ;;  %v4232_v28 = vadd.f32 %v7596_v25, %v8846_v62  ;;  %v7480_v24 = vpop.f32.mrb[34].mxu0 }
 0x28b   : > { %v4269_v30 = vmax.f32 %v4233_v6, 0.0  ;;  %v7597_v42 = vadd.f32 %v7480_v24, %v8833_v15  ;;  %v4148_v46 = vpop.f32.mrb[35].mxu0  ;;  %v8947_v15 = vld [vmem:[%s10339_s4] ss:$0 sm:$0xff] }
 0x28c   : > { %v4268_v31 = vmax.f32 %v4232_v28, 0.0  ;;  %v7598_v29 = vadd.f32 %v4148_v46, %v8835_v17  ;;  %7514 = vmatmul.mubr.msk.bf16.gmra.mrb[64].mxu1 %vm4303_vm2, %v4287_v8 }
 0x28d   : > { %v4235_v11 = vadd.f32 %v7597_v42, %v8846_v62 }
 0x28e   : > { %v4288_v13 = vpack.c.bf16 %v4269_v30, %v4268_v31  ;;  %v4234_v10 = vadd.f32 %v7598_v29, %v8846_v62 }
 0x28f   : > { %v4271_v32 = vmax.f32 %v4235_v11, 0.0 }
 0x290   : > { %v4270_v33 = vmax.f32 %v4234_v10, 0.0  ;;  %7517 = vmatprep.mubr.msk.bf16.mxu1 %vm4303_vm2, %v4288_v13 }
 0x292   : > { %v4289_v36 = vpack.c.bf16 %v4271_v32, %v4270_v33 }
 0x294   : > { %7518 = vmatmul.mubr.msk.bf16.gmra.mrb[68].mxu1 %vm4303_vm2, %v4289_v36 }
 0x327   : > { %v7487_v17 = vpop.f32.mrb[36].mxu1 }
 0x328   : > { %v4401_v16 = vadd.f32 %v7487_v17, %v8947_v15  ;;  %v4392_v49 = vpop.f32.mrb[37].mxu1 }
 0x329   : > { %v4393_v51 = vadd.f32 %v8947_v15, %v4392_v49  ;;  %v7488_v18 = vpop.f32.mrb[38].mxu1 }
 0x32a   : > { %v4404_v62 = vadd.f32 %v7488_v18, %v8947_v15  ;;  %v4395_v37 = vpop.f32.mrb[39].mxu1  ;;  %v4537_v35 = vmax.f32 %v4401_v16, 0.0 }
 0x32b   : > { %v4396_v34 = vadd.f32 %v8947_v15, %v4395_v37  ;;  %v4535_v41 = vmax.f32 %v4393_v51, 0.0 }
 0x32c   : > { %v4538_v40 = vmax.f32 %v4404_v62, 0.0 }
 0x32d   : > { %v4536_v47 = vmax.f32 %v4396_v34, 0.0 }
 0x32e   : > { %v4572_v53 = vpack.c.bf16 %v4538_v40, %v4537_v35 }
 0x32f   : > { %v4571_v55 = vpack.c.bf16 %v4536_v47, %v4535_v41  ;;  %v7491_v21 = vpop.f32.mrb[40].mxu1 }
 0x330   : > { %v4417_v48 = vadd.f32 %v7491_v21, %v8947_v15  ;;  %v4408_v52 = vpop.f32.mrb[41].mxu1 }
 0x331   : > { %v4409_v54 = vadd.f32 %v8947_v15, %v4408_v52  ;;  %v7492_v38 = vpop.f32.mrb[42].mxu1  ;;  %7525 = vmatprep.mubr.msk.bf16.mxu1 %vm4303_vm2, %v4571_v55 }
 0x332   : > { %v4420_v39 = vadd.f32 %v7492_v38, %v8947_v15  ;;  %v4411_v56 = vpop.f32.mrb[43].mxu1  ;;  %7526 = vmatmul.mubr.msk.bf16.vlgmr.msra.gmra.mrb[72].mxu1 %vm4303_vm2, %v4572_v53  ;;  %v4541_v59 = vmax.f32 %v4417_v48, 0.0 }
 0x333   : > { %v4412_v57 = vadd.f32 %v8947_v15, %v4411_v56  ;;  %v4539_v63 = vmax.f32 %v4409_v54, 0.0 }
 0x334   : > { %v4542_v60 = vmax.f32 %v4420_v39, 0.0 }
 0x335   : > { %v4540_v22 = vmax.f32 %v4412_v57, 0.0 }
 0x336   : > { %v4574_v1 = vpack.c.bf16 %v4542_v60, %v4541_v59 }
 0x337   : > { %v4573_v3 = vpack.c.bf16 %v4540_v22, %v4539_v63  ;;  %v7495_v5 = vpop.f32.mrb[44].mxu1 }
 0x338   : > { %v4433_v43 = vadd.f32 %v7495_v5, %v8947_v15  ;;  %v4424_v61 = vpop.f32.mrb[45].mxu1 }
 0x339   : > { %v4425_v0 = vadd.f32 %v8947_v15, %v4424_v61  ;;  %v7496_v45 = vpop.f32.mrb[46].mxu1  ;;  %7529 = vmatprep.mubr.msk.bf16.mxu1 %vm4303_vm2, %v4573_v3 }
 0x33a   : > { %v4436_v7 = vadd.f32 %v7496_v45, %v8947_v15  ;;  %v4427_v9 = vpop.f32.mrb[47].mxu1  ;;  %7530 = vmatmul.mubr.msk.bf16.gmra.mrb[76].mxu1 %vm4303_vm2, %v4574_v1  ;;  %v4545_v14 = vmax.f32 %v4433_v43, 0.0 }
 0x33b   : > { %v4428_v12 = vadd.f32 %v8947_v15, %v4427_v9  ;;  %v4543_v27 = vmax.f32 %v4425_v0, 0.0 }
 0x33c   : > { %v4546_v26 = vmax.f32 %v4436_v7, 0.0 }
 0x33d   : > { %v4544_v2 = vmax.f32 %v4428_v12, 0.0 }
 0x33e   : > { %v4576_v4 = vpack.c.bf16 %v4546_v26, %v4545_v14 }
 0x33f   : > { %v4575_v19 = vpack.c.bf16 %v4544_v2, %v4543_v27  ;;  %v7499_v50 = vpop.f32.mrb[48].mxu1 }
 0x340   : > { %v4449_v44 = vadd.f32 %v7499_v50, %v8947_v15  ;;  %v4440_v58 = vpop.f32.mrb[49].mxu1 }
 0x341   : > { %v4441_v20 = vadd.f32 %v8947_v15, %v4440_v58  ;;  %v7500_v23 = vpop.f32.mrb[50].mxu1  ;;  %7533 = vmatprep.mubr.msk.bf16.mxu1 %vm4303_vm2, %v4575_v19 }
 0x342   : > { %v4452_v25 = vadd.f32 %v7500_v23, %v8947_v15  ;;  %v4443_v6 = vpop.f32.mrb[51].mxu1  ;;  %7534 = vmatmul.mubr.msk.bf16.gmra.mrb[80].mxu1 %vm4303_vm2, %v4576_v4  ;;  %v4549_v28 = vmax.f32 %v4449_v44, 0.0 }
 0x343   : > { %v4444_v8 = vadd.f32 %v8947_v15, %v4443_v6  ;;  %v4547_v30 = vmax.f32 %v4441_v20, 0.0 }
 0x344   : > { %v4550_v24 = vmax.f32 %v4452_v25, 0.0 }
 0x345   : > { %v4548_v42 = vmax.f32 %v4444_v8, 0.0 }
 0x346   : > { %v4578_v46 = vpack.c.bf16 %v4550_v24, %v4549_v28 }
 0x347   : > { %v4577_v31 = vpack.c.bf16 %v4548_v42, %v4547_v30  ;;  %v7503_v29 = vpop.f32.mrb[52].mxu1 }
 0x348   : > { %v4465_v11 = vadd.f32 %v7503_v29, %v8947_v15  ;;  %v4456_v13 = vpop.f32.mrb[53].mxu1 }
 0x349   : > { %v4457_v10 = vadd.f32 %v8947_v15, %v4456_v13  ;;  %v7504_v32 = vpop.f32.mrb[54].mxu1  ;;  %7537 = vmatprep.mubr.msk.bf16.mxu1 %vm4303_vm2, %v4577_v31 }
 0x34a   : > { %v4468_v33 = vadd.f32 %v7504_v32, %v8947_v15  ;;  %v4459_v36 = vpop.f32.mrb[55].mxu1  ;;  %7538 = vmatmul.mubr.msk.bf16.gmra.mrb[84].mxu1 %vm4303_vm2, %v4578_v46  ;;  %v4553_v16 = vmax.f32 %v4465_v11, 0.0 }
 0x34b   : > { %v4460_v17 = vadd.f32 %v8947_v15, %v4459_v36  ;;  %v4551_v51 = vmax.f32 %v4457_v10, 0.0 }
 0x34c   : > { %v4554_v49 = vmax.f32 %v4468_v33, 0.0 }
 0x34d   : > { %v4552_v18 = vmax.f32 %v4460_v17, 0.0  ;;  %v9006_v17 = vld [vmem:[%s10341_s6] ss:$0 sm:$0xff] }
 0x34e   : > { %v4580_v62 = vpack.c.bf16 %v4554_v49, %v4553_v16 }
 0x34f   : > { %v4579_v37 = vpack.c.bf16 %v4552_v18, %v4551_v51  ;;  %v7507_v34 = vpop.f32.mrb[56].mxu1 }
 0x350   : > { %v4481_v35 = vadd.f32 %v7507_v34, %v8947_v15  ;;  %v4472_v40 = vpop.f32.mrb[57].mxu1 }
 0x351   : > { %v4473_v41 = vadd.f32 %v8947_v15, %v4472_v40  ;;  %v7508_v47 = vpop.f32.mrb[58].mxu1  ;;  %7541 = vmatprep.mubr.msk.bf16.mxu1 %vm4303_vm2, %v4579_v37 }
 0x352   : > { %v4484_v53 = vadd.f32 %v7508_v47, %v8947_v15  ;;  %v4475_v55 = vpop.f32.mrb[59].mxu1  ;;  %7542 = vmatmul.mubr.msk.bf16.gmra.mrb[88].mxu1 %vm4303_vm2, %v4580_v62  ;;  %v4557_v48 = vmax.f32 %v4481_v35, 0.0 }
 0x353   : > { %v4476_v21 = vadd.f32 %v8947_v15, %v4475_v55  ;;  %v4555_v54 = vmax.f32 %v4473_v41, 0.0 }
 0x354   : > { %v4558_v52 = vmax.f32 %v4484_v53, 0.0 }
 0x355   : > { %v4556_v38 = vmax.f32 %v4476_v21, 0.0 }
 0x356   : > { %v4582_v39 = vpack.c.bf16 %v4558_v52, %v4557_v48 }
 0x357   : > { %v4581_v56 = vpack.c.bf16 %v4556_v38, %v4555_v54  ;;  %v7511_v57 = vpop.f32.mrb[60].mxu1 }
 0x358   : > { %v4497_v59 = vadd.f32 %v7511_v57, %v8947_v15  ;;  %v4488_v60 = vpop.f32.mrb[61].mxu1 }
 0x359   : > { %v4489_v63 = vadd.f32 %v8947_v15, %v4488_v60  ;;  %v7512_v22 = vpop.f32.mrb[62].mxu1  ;;  %7545 = vmatprep.mubr.msk.bf16.mxu1 %vm4303_vm2, %v4581_v56 }
 0x35a   : > { %v4500_v1 = vadd.f32 %v7512_v22, %v8947_v15  ;;  %v4491_v3 = vpop.f32.mrb[63].mxu1  ;;  %7546 = vmatmul.mubr.msk.bf16.gmra.mrb[92].mxu1 %vm4303_vm2, %v4582_v39  ;;  %v4561_v43 = vmax.f32 %v4497_v59, 0.0 }
 0x35b   : > { %v4492_v5 = vadd.f32 %v8947_v15, %v4491_v3  ;;  %v4559_v0 = vmax.f32 %v4489_v63, 0.0 }
 0x35c   : > { %v4562_v61 = vmax.f32 %v4500_v1, 0.0 }
 0x35d   : > { %v4560_v45 = vmax.f32 %v4492_v5, 0.0 }
 0x35e   : > { %v4584_v7 = vpack.c.bf16 %v4562_v61, %v4561_v43 }
 0x35f   : > { %v4583_v9 = vpack.c.bf16 %v4560_v45, %v4559_v0  ;;  %v7515_v12 = vpop.f32.mrb[64].mxu1 }
 0x360   : > { %v4513_v14 = vadd.f32 %v7515_v12, %v8947_v15  ;;  %v4504_v26 = vpop.f32.mrb[65].mxu1 }
 0x361   : > { %v4505_v27 = vadd.f32 %v8947_v15, %v4504_v26  ;;  %v7516_v2 = vpop.f32.mrb[66].mxu1  ;;  %7549 = vmatprep.mubr.msk.bf16.mxu1 %vm4303_vm2, %v4583_v9 }
 0x362   : > { %v4516_v4 = vadd.f32 %v7516_v2, %v8947_v15  ;;  %v4507_v19 = vpop.f32.mrb[67].mxu1  ;;  %7550 = vmatmul.mubr.msk.bf16.gmra.mrb[96].mxu1 %vm4303_vm2, %v4584_v7  ;;  %v4565_v44 = vmax.f32 %v4513_v14, 0.0 }
 0x363   : > { %v4508_v50 = vadd.f32 %v8947_v15, %v4507_v19  ;;  %v4563_v20 = vmax.f32 %v4505_v27, 0.0 }
 0x364   : > { %v4566_v58 = vmax.f32 %v4516_v4, 0.0 }
 0x365   : > { %v4564_v23 = vmax.f32 %v4508_v50, 0.0 }
 0x366   : > { %v4586_v25 = vpack.c.bf16 %v4566_v58, %v4565_v44 }
 0x367   : > { %v4585_v6 = vpack.c.bf16 %v4564_v23, %v4563_v20  ;;  %v7519_v8 = vpop.f32.mrb[68].mxu1 }
 0x368   : > { %v4529_v28 = vadd.f32 %v7519_v8, %v8947_v15  ;;  %v4520_v24 = vpop.f32.mrb[69].mxu1 }
 0x369   : > { %v4521_v30 = vadd.f32 %v8947_v15, %v4520_v24  ;;  %v7520_v42 = vpop.f32.mrb[70].mxu1  ;;  %7553 = vmatprep.mubr.msk.bf16.mxu1 %vm4303_vm2, %v4585_v6 }
 0x36a   : > { %v4532_v46 = vadd.f32 %v7520_v42, %v8947_v15  ;;  %v4523_v31 = vpop.f32.mrb[71].mxu1  ;;  %7554 = vmatmul.mubr.msk.bf16.gmra.mrb[100].mxu1 %vm4303_vm2, %v4586_v25  ;;  %v4569_v11 = vmax.f32 %v4529_v28, 0.0 }
 0x36b   : > { %v4524_v29 = vadd.f32 %v8947_v15, %v4523_v31  ;;  %v4567_v10 = vmax.f32 %v4521_v30, 0.0 }
 0x36c   : > { %v4570_v13 = vmax.f32 %v4532_v46, 0.0 }
 0x36d   : > { %v4568_v32 = vmax.f32 %v4524_v29, 0.0 }
 0x36e   : > { %v4588_v33 = vpack.c.bf16 %v4570_v13, %v4569_v11 }
 0x36f   : > { %v4587_v36 = vpack.c.bf16 %v4568_v32, %v4567_v10 }
 0x371   : > { %7557 = vmatprep.mubr.msk.bf16.mxu1 %vm4303_vm2, %v4587_v36 }
 0x372   : > { %7558 = vmatmul.mubr.msk.bf16.gmra.mrb[104].mxu1 %vm4303_vm2, %v4588_v33 }
 0x405   : > { %v7527_v16 = vpop.f32.mrb[72].mxu1 }
 0x406   : > { %v9009_v15 = vadd.f32 %v7527_v16, %v9006_v17  ;;  %v4690_v49 = vpop.f32.mrb[73].mxu1 }
 0x407   : > { %v9012_v51 = vadd.f32 %v9006_v17, %v4690_v49  ;;  %v7528_v18 = vpop.f32.mrb[74].mxu1 }
 0x408   : > { %4835 = vst [vmem:[%s8122_s13 + $0x10] sm:$0xff] %v9009_v15  ;;  %v9017_v62 = vadd.f32 %v7528_v18, %v9006_v17  ;;  %v4693_v37 = vpop.f32.mrb[75].mxu1  ;;  %v4876_v34 = vsel %vm4869_vm3, %v9009_v15, -inf }
 0x409   : > { %4833 = vst [vmem:[%s8122_s13] sm:$0xff] %v9012_v51  ;;  %v9024_v35 = vadd.f32 %v9006_v17, %v4693_v37  ;;  %4877 = vmax.xlane.f32.xlu1 %v4876_v34  ;;  %v4870_v40 = vsel %vm4869_vm3, %v9012_v51, -inf }
 0x40a   : > { %4836 = vst [vmem:[%s8122_s13 + $0x18] sm:$0xff] %v9017_v62  ;;  %4871 = vmax.xlane.f32.xlu0 %v4870_v40  ;;  %v4879_v41 = vsel %vm4869_vm3, %v9017_v62, -inf }
 0x40b   : > { %4834 = vst [vmem:[%s8122_s13 + $0x8] sm:$0xff] %v9024_v35  ;;  %v4873_v53 = vsel %vm4869_vm3, %v9024_v35, -inf }
 0x40d   : > { %4880 = vmax.xlane.f32.xlu1 %v4879_v41  ;;  %v7531_v47 = vpop.f32.mrb[76].mxu1 }
 0x40e   : > { %v9037_v55 = vadd.f32 %v7531_v47, %v9006_v17  ;;  %v4706_v21 = vpop.f32.mrb[77].mxu1  ;;  %4874 = vmax.xlane.f32.xlu0 %v4873_v53 }
 0x40f   : > { %v9040_v48 = vadd.f32 %v9006_v17, %v4706_v21  ;;  %v7532_v52 = vpop.f32.mrb[78].mxu1 }
 0x410   : > { %4839 = vst [vmem:[%s8122_s13 + $0x30] sm:$0xff] %v9037_v55  ;;  %v9045_v54 = vadd.f32 %v7532_v52, %v9006_v17  ;;  %v4709_v38 = vpop.f32.mrb[79].mxu1  ;;  %v4888_v39 = vsel %vm4869_vm3, %v9037_v55, -inf }
 0x411   : > { %4837 = vst [vmem:[%s8122_s13 + $0x20] sm:$0xff] %v9040_v48  ;;  %v9052_v56 = vadd.f32 %v9006_v17, %v4709_v38  ;;  %v4882_v60 = vsel %vm4869_vm3, %v9040_v48, -inf }
 0x412   : > { %4840 = vst [vmem:[%s8122_s13 + $0x38] sm:$0xff] %v9045_v54  ;;  %4889 = vmax.xlane.f32.xlu0 %v4888_v39  ;;  %v4891_v57 = vsel %vm4869_vm3, %v9045_v54, -inf }
 0x413   : > { %4838 = vst [vmem:[%s8122_s13 + $0x28] sm:$0xff] %v9052_v56  ;;  %4892 = vmax.xlane.f32.xlu1 %v4891_v57  ;;  %v4885_v1 = vsel %vm4869_vm3, %v9052_v56, -inf }
 0x415   : > { %v7535_v59 = vpop.f32.mrb[80].mxu1 }
 0x416   : > { %v9063_v63 = vadd.f32 %v7535_v59, %v9006_v17  ;;  %v4722_v22 = vpop.f32.mrb[81].mxu1  ;;  %4883 = vmax.xlane.f32.xlu0 %v4882_v60 }
 0x417   : > { %v9068_v3 = vadd.f32 %v9006_v17, %v4722_v22  ;;  %v7536_v5 = vpop.f32.mrb[82].mxu1  ;;  %4886 = vmax.xlane.f32.xlu1 %v4885_v1 }
 0x418   : > { %4843 = vst [vmem:[%s8122_s13 + $0x50] sm:$0xff] %v9063_v63  ;;  %v9073_v43 = vadd.f32 %v7536_v5, %v9006_v17  ;;  %v4725_v61 = vpop.f32.mrb[83].mxu1  ;;  %v4900_v0 = vsel %vm4869_vm3, %v9063_v63, -inf }
 0x419   : > { %4841 = vst [vmem:[%s8122_s13 + $0x40] sm:$0xff] %v9068_v3  ;;  %v9080_v45 = vadd.f32 %v9006_v17, %v4725_v61  ;;  %v4894_v12 = vsel %vm4869_vm3, %v9068_v3, -inf }
 0x41a   : > { %4844 = vst [vmem:[%s8122_s13 + $0x58] sm:$0xff] %v9073_v43  ;;  %4901 = vmax.xlane.f32.xlu0 %v4900_v0  ;;  %v4903_v7 = vsel %vm4869_vm3, %v9073_v43, -inf }
 0x41b   : > { %4842 = vst [vmem:[%s8122_s13 + $0x48] sm:$0xff] %v9080_v45  ;;  %4904 = vmax.xlane.f32.xlu1 %v4903_v7  ;;  %v4897_v27 = vsel %vm4869_vm3, %v9080_v45, -inf }
 0x41d   : > { %v7539_v9 = vpop.f32.mrb[84].mxu1 }
 0x41e   : > { %v9091_v14 = vadd.f32 %v7539_v9, %v9006_v17  ;;  %v4738_v26 = vpop.f32.mrb[85].mxu1  ;;  %4895 = vmax.xlane.f32.xlu0 %v4894_v12 }
 0x41f   : > { %v9096_v2 = vadd.f32 %v9006_v17, %v4738_v26  ;;  %v7540_v4 = vpop.f32.mrb[86].mxu1  ;;  %4898 = vmax.xlane.f32.xlu1 %v4897_v27 }
 0x420   : > { %4847 = vst [vmem:[%s8122_s13 + $0x70] sm:$0xff] %v9091_v14  ;;  %v9101_v19 = vadd.f32 %v7540_v4, %v9006_v17  ;;  %v4741_v50 = vpop.f32.mrb[87].mxu1  ;;  %v4912_v44 = vsel %vm4869_vm3, %v9091_v14, -inf }
 0x421   : > { %4845 = vst [vmem:[%s8122_s13 + $0x60] sm:$0xff] %v9096_v2  ;;  %v9108_v58 = vadd.f32 %v9006_v17, %v4741_v50  ;;  %v4906_v25 = vsel %vm4869_vm3, %v9096_v2, -inf }
 0x422   : > { %4848 = vst [vmem:[%s8122_s13 + $0x78] sm:$0xff] %v9101_v19  ;;  %4913 = vmax.xlane.f32.xlu0 %v4912_v44  ;;  %v4915_v20 = vsel %vm4869_vm3, %v9101_v19, -inf }
 0x423   : > { %4846 = vst [vmem:[%s8122_s13 + $0x68] sm:$0xff] %v9108_v58  ;;  %4916 = vmax.xlane.f32.xlu1 %v4915_v20  ;;  %v4909_v28 = vsel %vm4869_vm3, %v9108_v58, -inf }
 0x425   : > { %v7543_v23 = vpop.f32.mrb[88].mxu1 }
 0x426   : > { %v9119_v6 = vadd.f32 %v7543_v23, %v9006_v17  ;;  %v4754_v8 = vpop.f32.mrb[89].mxu1  ;;  %4907 = vmax.xlane.f32.xlu0 %v4906_v25 }
 0x427   : > { %v9124_v24 = vadd.f32 %v9006_v17, %v4754_v8  ;;  %v7544_v30 = vpop.f32.mrb[90].mxu1  ;;  %4910 = vmax.xlane.f32.xlu1 %v4909_v28 }
 0x428   : > { %4851 = vst [vmem:[%s8122_s13 + $0x90] sm:$0xff] %v9119_v6  ;;  %v9129_v42 = vadd.f32 %v7544_v30, %v9006_v17  ;;  %v4757_v46 = vpop.f32.mrb[91].mxu1  ;;  %v4924_v31 = vsel %vm4869_vm3, %v9119_v6, -inf }
 0x429   : > { %4849 = vst [vmem:[%s8122_s13 + $0x80] sm:$0xff] %v9124_v24  ;;  %v9136_v29 = vadd.f32 %v9006_v17, %v4757_v46  ;;  %v4918_v10 = vsel %vm4869_vm3, %v9124_v24, -inf }
 0x42a   : > { %4852 = vst [vmem:[%s8122_s13 + $0x98] sm:$0xff] %v9129_v42  ;;  %4925 = vmax.xlane.f32.xlu0 %v4924_v31  ;;  %v4927_v11 = vsel %vm4869_vm3, %v9129_v42, -inf }
 0x42b   : > { %4850 = vst [vmem:[%s8122_s13 + $0x88] sm:$0xff] %v9136_v29  ;;  %4928 = vmax.xlane.f32.xlu1 %v4927_v11  ;;  %v4921_v36 = vsel %vm4869_vm3, %v9136_v29, -inf }
 0x42d   : > { %v7547_v13 = vpop.f32.mrb[92].mxu1 }
 0x42e   : > { %v9147_v32 = vadd.f32 %v7547_v13, %v9006_v17  ;;  %v4770_v33 = vpop.f32.mrb[93].mxu1  ;;  %4919 = vmax.xlane.f32.xlu0 %v4918_v10 }
 0x42f   : > { %v9152_v16 = vadd.f32 %v9006_v17, %v4770_v33  ;;  %v7548_v49 = vpop.f32.mrb[94].mxu1  ;;  %4922 = vmax.xlane.f32.xlu1 %v4921_v36 }
 0x430   : > { %4855 = vst [vmem:[%s8122_s13 + $0xb0] sm:$0xff] %v9147_v32  ;;  %v9157_v18 = vadd.f32 %v7548_v49, %v9006_v17  ;;  %v4773_v37 = vpop.f32.mrb[95].mxu1  ;;  %v4936_v34 = vsel %vm4869_vm3, %v9147_v32, -inf }
 0x431   : > { %4853 = vst [vmem:[%s8122_s13 + $0xa0] sm:$0xff] %v9152_v16  ;;  %v9164_v40 = vadd.f32 %v9006_v17, %v4773_v37  ;;  %v4930_v53 = vsel %vm4869_vm3, %v9152_v16, -inf }
 0x432   : > { %4856 = vst [vmem:[%s8122_s13 + $0xb8] sm:$0xff] %v9157_v18  ;;  %4937 = vmax.xlane.f32.xlu0 %v4936_v34  ;;  %v4939_v41 = vsel %vm4869_vm3, %v9157_v18, -inf }
 0x433   : > { %4854 = vst [vmem:[%s8122_s13 + $0xa8] sm:$0xff] %v9164_v40  ;;  %4940 = vmax.xlane.f32.xlu1 %v4939_v41  ;;  %v4933_v38 = vsel %vm4869_vm3, %v9164_v40, -inf  ;;  %v5266_v41 = vlaneseq }
 0x435   : > { %v7551_v47 = vpop.f32.mrb[96].mxu1 }
 0x436   : > { %v9175_v21 = vadd.f32 %v7551_v47, %v9006_v17  ;;  %v4786_v52 = vpop.f32.mrb[97].mxu1  ;;  %4931 = vmax.xlane.f32.xlu0 %v4930_v53 }
 0x437   : > { %v9180_v39 = vadd.f32 %v9006_v17, %v4786_v52  ;;  %v7552_v57 = vpop.f32.mrb[98].mxu1  ;;  %4934 = vmax.xlane.f32.xlu1 %v4933_v38 }
 0x438   : > { %4859 = vst [vmem:[%s8122_s13 + $0xd0] sm:$0xff] %v9175_v21  ;;  %v9185_v59 = vadd.f32 %v7552_v57, %v9006_v17  ;;  %v4789_v60 = vpop.f32.mrb[99].mxu1  ;;  %v4948_v22 = vsel %vm4869_vm3, %v9175_v21, -inf }
 0x439   : > { %4857 = vst [vmem:[%s8122_s13 + $0xc0] sm:$0xff] %v9180_v39  ;;  %v9192_v1 = vadd.f32 %v9006_v17, %v4789_v60  ;;  %v4942_v0 = vsel %vm4869_vm3, %v9180_v39, -inf }
 0x43a   : > { %4860 = vst [vmem:[%s8122_s13 + $0xd8] sm:$0xff] %v9185_v59  ;;  %4949 = vmax.xlane.f32.xlu0 %v4948_v22  ;;  %v4951_v5 = vsel %vm4869_vm3, %v9185_v59, -inf }
 0x43b   : > { %4858 = vst [vmem:[%s8122_s13 + $0xc8] sm:$0xff] %v9192_v1  ;;  %4952 = vmax.xlane.f32.xlu1 %v4951_v5  ;;  %v4945_v12 = vsel %vm4869_vm3, %v9192_v1, -inf }
 0x43d   : > { %v7555_v61 = vpop.f32.mrb[100].mxu1 }
 0x43e   : > { %v9203_v7 = vadd.f32 %v7555_v61, %v9006_v17  ;;  %v4802_v9 = vpop.f32.mrb[101].mxu1  ;;  %4943 = vmax.xlane.f32.xlu0 %v4942_v0 }
 0x43f   : > { %v9208_v26 = vadd.f32 %v9006_v17, %v4802_v9  ;;  %v7556_v27 = vpop.f32.mrb[102].mxu1  ;;  %4946 = vmax.xlane.f32.xlu1 %v4945_v12 }
 0x440   : > { %4863 = vst [vmem:[%s8122_s13 + $0xf0] sm:$0xff] %v9203_v7  ;;  %v9213_v4 = vadd.f32 %v7556_v27, %v9006_v17  ;;  %v4805_v50 = vpop.f32.mrb[103].mxu1  ;;  %v4960_v44 = vsel %vm4869_vm3, %v9203_v7, -inf }
 0x441   : > { %4861 = vst [vmem:[%s8122_s13 + $0xe0] sm:$0xff] %v9208_v26  ;;  %v9220_v20 = vadd.f32 %v9006_v17, %v4805_v50  ;;  %v4954_v8 = vsel %vm4869_vm3, %v9208_v26, -inf }
 0x442   : > { %4864 = vst [vmem:[%s8122_s13 + $0xf8] sm:$0xff] %v9213_v4  ;;  %4961 = vmax.xlane.f32.xlu0 %v4960_v44  ;;  %v4963_v23 = vsel %vm4869_vm3, %v9213_v4, -inf }
 0x443   : > { %4862 = vst [vmem:[%s8122_s13 + $0xe8] sm:$0xff] %v9220_v20  ;;  %4964 = vmax.xlane.f32.xlu1 %v4963_v23  ;;  %v4957_v46 = vsel %vm4869_vm3, %v9220_v20, -inf }
 0x445   : > { %v7559_v25 = vpop.f32.mrb[104].mxu1 }
 0x446   : > { %v9231_v28 = vadd.f32 %v7559_v25, %v9006_v17  ;;  %4955 = vmax.xlane.f32.xlu0 %v4954_v8  ;;  %v4818_v30 = vpop.f32.mrb[105].mxu1 }
 0x447   : > { %v9236_v31 = vadd.f32 %v9006_v17, %v4818_v30  ;;  %4958 = vmax.xlane.f32.xlu1 %v4957_v46  ;;  %v7560_v11 = vpop.f32.mrb[106].mxu1 }
 0x448   : > { %4867 = vst [vmem:[%s8122_s13 + $0x110] sm:$0xff] %v9231_v28  ;;  %v9241_v13 = vadd.f32 %v7560_v11, %v9006_v17  ;;  %v4821_v10 = vpop.f32.mrb[107].mxu1  ;;  %v4972_v33 = vsel %vm4869_vm3, %v9231_v28, -inf }
 0x449   : > { %4865 = vst [vmem:[%s8122_s13 + $0x100] sm:$0xff] %v9236_v31  ;;  %v9248_v36 = vadd.f32 %v9006_v17, %v4821_v10  ;;  %v4966_v37 = vsel %vm4869_vm3, %v9236_v31, -inf  ;;  %v9260_v17 = vand.u32 127, %v5266_v41 }
 0x44a   : > { %4868 = vst [vmem:[%s8122_s13 + $0x118] sm:$0xff] %v9241_v13  ;;  %4973 = vmax.xlane.f32.xlu0 %v4972_v33  ;;  %v4975_v49 = vsel %vm4869_vm3, %v9241_v13, -inf }
 0x44b   : > { %4866 = vst [vmem:[%s8122_s13 + $0x108] sm:$0xff] %v9248_v36  ;;  %4976 = vmax.xlane.f32.xlu1 %v4975_v49  ;;  %v4969_v34 = vsel %vm4869_vm3, %v9248_v36, -inf }
 0x44e   : > { %4967 = vmax.xlane.f32.xlu0 %v4966_v37 }
 0x44f   : > { %4970 = vmax.xlane.f32.xlu1 %v4969_v34 }
 0x496   : > { %v4878_v47 = vpop.xlane.xlu1 %4877 }
 0x497   : > { %vm5270_vm4 = vcmp.eq.f32.partialorder %v9009_v15, %v4878_v47  ;;  %v4872_v53 = vpop.xlane.xlu0 %4871  ;;  %v4980_v52 = vsub.f32 %v9009_v15, %v4878_v47 }
 0x498   : > { %vm5268_vm5 = vcmp.eq.f32.partialorder %v9012_v51, %v4872_v53  ;;  %v5306_v38 = vsel %vm5270_vm4, %v9260_v17, 1073741824  ;;  %v4978_v0 = vsub.f32 %v9012_v51, %v4872_v53 }
 0x499   : > { %v9267_v57 = vsel %vm4869_vm3, %v5306_v38, 2147483647  ;;  %v5304_v60 = vsel %vm5268_vm5, %v9260_v17, 1073741824  ;;  %v5018_v12 = vmul.f32 1.442695, %v4980_v52 }
 0x49a   : > { %v4881_v22 = vpop.xlane.xlu1 %4880  ;;  %v5372_v5 = vshra.s32 %v9267_v57, 16  ;;  %v9272_v61 = vsel %vm4869_vm3, %v5304_v60, 2147483647  ;;  %v5014_v25 = vmul.f32 1.442695, %v4978_v0 }
 0x49b   : > { %v4981_v9 = vsub.f32 %v9017_v62, %v4881_v22  ;;  %vm5271_vm6 = vcmp.eq.f32.partialorder %v9017_v62, %v4881_v22  ;;  %v4875_v15 = vpop.xlane.xlu0 %4874  ;;  %v5342_v50 = vshra.s32 %v9272_v61, 16  ;;  %7876 = vpow2.f32 %v5018_v12 }
 0x49c   : > { %vm5269_vm7 = vcmp.eq.f32.partialorder %v9024_v35, %v4875_v15  ;;  %v9278_v27 = vcvt.s32.f32 %v5372_v5  ;;  %v5307_v44 = vsel %vm5271_vm6, %v9260_v17, 1073741824  ;;  %v4979_v62 = vsub.f32 %v9024_v35, %v4875_v15 }
 0x49d   : > { %v9284_v23 = vsel %vm4869_vm3, %v5307_v44, 2147483647  ;;  %v5305_v51 = vsel %vm5269_vm7, %v9260_v17, 1073741824  ;;  %v5020_v8 = vmul.f32 1.442695, %v4981_v9  ;;  %v9289_v46 = vcvt.s32.f32 %v5342_v50 }
 0x49e   : > { %5375 = vmin.xlane.f32.xlu0 %v9278_v27  ;;  %v5387_v11 = vshra.s32 %v9284_v23, 16  ;;  %v9294_v33 = vsel %vm4869_vm3, %v5305_v51, 2147483647  ;;  %v5016_v35 = vmul.f32 1.442695, %v4979_v62 }
 0x49f   : > { %v4890_v30 = vpop.xlane.xlu0 %4889  ;;  %7878 = vpow2.f32 %v5020_v8  ;;  %v5357_v53 = vshra.s32 %v9294_v33, 16 }
 0x4a0   : > { %vm5274_vm8 = vcmp.eq.f32.partialorder %v9037_v55, %v4890_v30  ;;  %v4893_v49 = vpop.xlane.xlu1 %4892  ;;  %7880 = vpow2.f32 %v5014_v25  ;;  %v9302_v47 = vcvt.s32.f32 %v5387_v11  ;;  %v4984_v5 = vsub.f32 %v9037_v55, %v4890_v30 }
 0x4a1   : > { %v5310_v10 = vsel %vm5274_vm8, %v9260_v17, 1073741824  ;;  %7882 = vpow2.f32 %v5016_v35  ;;  %vm5275_vm10 = vcmp.eq.f32.partialorder %v9045_v54, %v4893_v49  ;;  %v9317_v9 = vcvt.s32.f32 %v5357_v53 }
 0x4a2   : > { %5345 = vmin.xlane.f32.xlu0 %v9289_v46  ;;  %v9298_v37 = vsel %vm4869_vm3, %v5310_v10, 2147483647  ;;  %v4985_v50 = vsub.f32 %v9045_v54, %v4893_v49  ;;  %v5311_v44 = vsel %vm5275_vm10, %v9260_v17, 1073741824  ;;  %v5026_v8 = vmul.f32 1.442695, %v4984_v5 }
 0x4a3   : > { %v4884_v34 = vpop.xlane.xlu0 %4883  ;;  %v5432_v41 = vshra.s32 %v9298_v37, 16  ;;  %v9339_v30 = vsel %vm4869_vm3, %v5311_v44, 2147483647 }
 0x4a4   : > { %vm5272_vm9 = vcmp.eq.f32.partialorder %v9040_v48, %v4884_v34  ;;  %v4887_v0 = vpop.xlane.xlu1 %4886  ;;  %v4982_v51 = vsub.f32 %v9040_v48, %v4884_v34  ;;  %v5028_v10 = vmul.f32 1.442695, %v4985_v50  ;;  %7884 = vpow2.f32 %v5026_v8 }
 0x4a5   : > { %v9305_v52 = vcvt.s32.f32 %v5432_v41  ;;  %v5308_v38 = vsel %vm5272_vm9, %v9260_v17, 1073741824  ;;  %v9320_v12 = vpop.eup %7876  ;;  %vm5273_vm12 = vcmp.eq.f32.partialorder %v9052_v56, %v4887_v0  ;;  %v4983_v34 = vsub.f32 %v9052_v56, %v4887_v0 }
 0x4a6   : > { %5390 = vmin.xlane.f32.xlu0 %v9302_v47  ;;  %v9314_v22 = vsel %vm4869_vm3, %v5308_v38, 2147483647  ;;  %10422 = vst [vmem:[#allocation6_spill] sm:$0xff] %v9320_v12  ;;  %v5092_v54 = vsel %vm4869_vm3, %v9320_v12, 0.0  ;;  %v5309_v49 = vsel %vm5273_vm12, %v9260_v17, 1073741824  ;;  %v5447_v53 = vshra.s32 %v9339_v30, 16 }
 0x4a7   : > { %v9310_v60 = vpop.xlane.xlu0 %4901  ;;  %5435 = vmin.xlane.f32.xlu1 %v9305_v52  ;;  %v5402_v15 = vshra.s32 %v9314_v22, 16  ;;  %v5022_v35 = vmul.f32 1.442695, %v4982_v51  ;;  %v9359_v50 = vsel %vm4869_vm3, %v5309_v49, 2147483647  ;;  %7886 = vpow2.f32 %v5028_v10 }
 0x4a8   : > { %vm5278_vm11 = vcmp.eq.f32.partialorder %v9063_v63, %v9310_v60  ;;  %v4905_v0 = vpop.xlane.xlu1 %4904  ;;  %v5024_v44 = vmul.f32 1.442695, %v4983_v34  ;;  %v4988_v34 = vsub.f32 %v9063_v63, %v9310_v60 }
 0x4a9   : > { %v9331_v25 = vcvt.s32.f32 %v5402_v15  ;;  %v9333_v62 = vpop.eup %7878  ;;  %v5314_v11 = vsel %vm5278_vm11, %v9260_v17, 1073741824  ;;  %7888 = vpow2.f32 %v5022_v35  ;;  %vm5279_vm14 = vcmp.eq.f32.partialorder %v9073_v43, %v4905_v0 }
 0x4aa   : > { %5360 = vmin.xlane.f32.xlu0 %v9317_v9  ;;  %10423 = vst [vmem:[#allocation7_spill] sm:$0xff] %v9333_v62  ;;  %v9342_v48 = vpop.eup %7880  ;;  %v5095_v41 = vsel %vm4869_vm3, %v9333_v62, 0.0  ;;  %v9352_v38 = vsel %vm4869_vm3, %v5314_v11, 2147483647  ;;  %v5417_v11 = vshra.s32 %v9359_v50, 16  ;;  %7890 = vpow2.f32 %v5024_v44 }
 0x4ab   : > { %v9329_v55 = vpop.xlane.xlu0 %4895  ;;  %5405 = vmin.xlane.f32.xlu1 %v9331_v25  ;;  %10424 = vst [vmem:[#allocation8_spill] sm:$0xff] %v9342_v48  ;;  %v9354_v5 = vpop.eup %7882  ;;  %v5086_v15 = vsel %vm4869_vm3, %v9342_v48, 0.0  ;;  %v5492_v51 = vshra.s32 %v9352_v38, 16  ;;  %v5315_v44 = vsel %vm5279_vm14, %v9260_v17, 1073741824 }
 0x4ac   : > { %vm5276_vm13 = vcmp.eq.f32.partialorder %v9068_v3, %v9329_v55  ;;  %10425 = vst [vmem:[#allocation9_spill] sm:$0xff] %v9354_v5  ;;  %v5089_v8 = vsel %vm4869_vm3, %v9354_v5, 0.0  ;;  %v5034_v5 = vmul.f32 1.442695, %v4988_v34  ;;  %v9405_v62 = vsel %vm4869_vm3, %v5315_v44, 2147483647 }
 0x4ad   : > { %v5312_v56 = vsel %vm5276_vm13, %v9260_v17, 1073741824  ;;  %v9375_v10 = vcvt.s32.f32 %v5492_v51  ;;  %v4986_v51 = vsub.f32 %v9068_v3, %v9329_v55 }
 0x4ae   : > { %5093 = vadd.xlane.f32.xlu0 %v5092_v54  ;;  %v9365_v54 = vcvt.s32.f32 %v5447_v53  ;;  %v4899_v53 = vpop.xlane.xlu1 %4898  ;;  %7892 = vpow2.f32 %v5034_v5 }
 0x4af   : > { %5096 = vadd.xlane.f32.xlu1 %v5095_v41  ;;  %v9369_v41 = vsel %vm4869_vm3, %v5312_v56, 2147483647  ;;  %v9371_v49 = vpop.xlane.xlu0 %4913  ;;  %v9383_v56 = vpop.eup %7884  ;;  %vm5277_vm0 = vcmp.eq.f32.partialorder %v9080_v45, %v4899_v53  ;;  %v5030_v34 = vmul.f32 1.442695, %v4986_v51  ;;  %v4987_v12 = vsub.f32 %v9080_v45, %v4899_v53 }
 0x4b0   : > { %v5462_v35 = vshra.s32 %v9369_v41, 16  ;;  %10426 = vst [vmem:[#allocation10_spill] sm:$0xff] %v9383_v56  ;;  %vm5282_vm15 = vcmp.eq.f32.partialorder %v9091_v14, %v9371_v49 }
 0x4b1   : > { %v5318_v3 = vsel %vm5282_vm15, %v9260_v17, 1073741824  ;;  %v5032_v53 = vmul.f32 1.442695, %v4987_v12 }
 0x4b2   : > { %5087 = vadd.xlane.f32.xlu0 %v5086_v15  ;;  %v9380_v15 = vcvt.s32.f32 %v5417_v11  ;;  %v9395_v60 = vcvt.s32.f32 %v5462_v35  ;;  %v9397_v11 = vpop.eup %7886  ;;  %v5313_v35 = vsel %vm5277_vm0, %v9260_v17, 1073741824  ;;  %v9416_v44 = vsel %vm4869_vm3, %v5318_v3, 2147483647  ;;  %v4917_v5 = vpop.xlane.xlu1 %4916 }
 0x4b3   : > { %5090 = vadd.xlane.f32.xlu1 %v5089_v8  ;;  %v4989_v8 = vsub.f32 %v9073_v43, %v4905_v0  ;;  %v9393_v63 = vpop.xlane.xlu0 %4907  ;;  %10428 = vst [vmem:[#allocation12_spill] sm:$0xff] %v9397_v11  ;;  %v9399_v43 = vpop.eup %7888  ;;  %v5104_v0 = vsel %vm4869_vm3, %v9383_v56, 0.0  ;;  %v5107_v48 = vsel %vm4869_vm3, %v9397_v11, 0.0  ;;  %v5507_v56 = vshra.s32 %v9405_v62, 16 }
 0x4b4   : > { %10427 = vst [vmem:[#allocation11_spill] sm:$0xff] %v9395_v60  ;;  %10429 = vst [vmem:[#allocation13_spill] sm:$0xff] %v9399_v43  ;;  %vm5280_vm1 = vcmp.eq.f32.partialorder %v9096_v2, %v9393_v63  ;;  %v5552_v51 = vshra.s32 %v9416_v44, 16  ;;  %vm5283_vm2 = vcmp.eq.f32.partialorder %v9101_v19, %v4917_v5 }
 0x4b5   : > { %v5036_v55 = vmul.f32 1.442695, %v4989_v8  ;;  %v5098_v8 = vsel %vm4869_vm3, %v9399_v43, 0.0  ;;  %v5316_v45 = vsel %vm5280_vm1, %v9260_v17, 1073741824  ;;  %v9429_v11 = vcvt.s32.f32 %v5507_v56 }
 0x4b6   : > { %5450 = vmin.xlane.f32.xlu0 %v9365_v54  ;;  %v9433_v43 = vsel %vm4869_vm3, %v5316_v45, 2147483647  ;;  %v9439_v12 = vcvt.s32.f32 %v5552_v51  ;;  %v4992_v56 = vsub.f32 %v9091_v14, %v9371_v49  ;;  %v4990_v51 = vsub.f32 %v9096_v2, %v9393_v63 }
 0x4b7   : > { %5495 = vmin.xlane.f32.xlu1 %v9375_v10  ;;  %7894 = vpow2.f32 %v5036_v55  ;;  %10431 = vst [vmem:[#allocation15_spill] sm:$0xff] %v9433_v43  ;;  %v5522_v55 = vshra.s32 %v9433_v43, 16 }
 0x4b8   : > { %7896 = vpow2.f32 %v5030_v34  ;;  %10432 = vst [vmem:[#allocation16_spill] sm:$0xff] %v9439_v12  ;;  %v4911_v34 = vpop.xlane.xlu1 %4910 }
 0x4b9   : > { %7898 = vpow2.f32 %v5032_v53  ;;  %v5319_v53 = vsel %vm5283_vm2, %v9260_v17, 1073741824  ;;  %vm5281_vm5 = vcmp.eq.f32.partialorder %v9108_v58, %v4911_v34  ;;  %v9459_v49 = vcvt.s32.f32 %v5522_v55 }
 0x4ba   : > { %5420 = vmin.xlane.f32.xlu0 %v9380_v15  ;;  %v5317_v55 = vsel %vm5281_vm5, %v9260_v17, 1073741824 }
 0x4bb   : > { %5465 = vmin.xlane.f32.xlu1 %v9395_v60  ;;  %v9418_v60 = vpop.eup %7890  ;;  %10435 = vst [vmem:[#allocation19_spill] sm:$0xff] %v9459_v49 }
 0x4bc   : > { %10430 = vst [vmem:[#allocation14_spill] sm:$0xff] %v9418_v60  ;;  %v5101_v3 = vsel %vm4869_vm3, %v9418_v60, 0.0  ;;  %v9447_v45 = vpop.eup %7892  ;;  %v5042_v60 = vmul.f32 1.442695, %v4992_v56  ;;  %v5038_v56 = vmul.f32 1.442695, %v4990_v51 }
 0x4bd   : > { %10434 = vst [vmem:[#allocation18_spill] sm:$0xff] %v9447_v45 }
 0x4be   : > { %5105 = vadd.xlane.f32.xlu0 %v5104_v0  ;;  %v9423_v0 = vsel %vm4869_vm3, %v5313_v35, 2147483647  ;;  %v9435_v35 = vpop.xlane.xlu0 %4925  ;;  %7900 = vpow2.f32 %v5042_v60  ;;  %v4929_v60 = vpop.xlane.xlu1 %4928 }
 0x4bf   : > { %5108 = vadd.xlane.f32.xlu1 %v5107_v48  ;;  %v5477_v48 = vshra.s32 %v9423_v0, 16  ;;  %vm5286_vm4 = vcmp.eq.f32.partialorder %v9119_v6, %v9435_v35  ;;  %vm5287_vm7 = vcmp.eq.f32.partialorder %v9129_v42, %v4929_v60 }
 0x4c0   : > { %v5322_v2 = vsel %vm5286_vm4, %v9260_v17, 1073741824 }
 0x4c2   : > { %5099 = vadd.xlane.f32.xlu0 %v5098_v8  ;;  %v9444_v8 = vcvt.s32.f32 %v5477_v48  ;;  %v9457_v14 = vpop.xlane.xlu0 %4919  ;;  %v9461_v48 = vpop.eup %7894 }
 0x4c3   : > { %5102 = vadd.xlane.f32.xlu1 %v5101_v3  ;;  %v4993_v3 = vsub.f32 %v9101_v19, %v4917_v5  ;;  %10436 = vst [vmem:[#allocation20_spill] sm:$0xff] %v9461_v48  ;;  %v9463_v19 = vpop.eup %7896  ;;  %v5116_v5 = vsel %vm4869_vm3, %v9447_v45, 0.0  ;;  %vm5284_vm6 = vcmp.eq.f32.partialorder %v9124_v24, %v9457_v14 }
 0x4c4   : > { %10433 = vst [vmem:[#allocation17_spill] sm:$0xff] %v9444_v8  ;;  %10437 = vst [vmem:[#allocation21_spill] sm:$0xff] %v9463_v19  ;;  %v9482_v43 = vpop.eup %7898 }
 0x4c5   : > { %v5044_v63 = vmul.f32 1.442695, %v4993_v3  ;;  %10438 = vst [vmem:[#allocation22_spill] sm:$0xff] %v9482_v43  ;;  %v5110_v3 = vsel %vm4869_vm3, %v9463_v19, 0.0 }
 0x4c6   : > { %5510 = vmin.xlane.f32.xlu0 %v9429_v11 }
 0x4c7   : > { %5555 = vmin.xlane.f32.xlu1 %v9439_v12  ;;  %v4991_v12 = vsub.f32 %v9108_v58, %v4911_v34  ;;  %v5320_v58 = vsel %vm5284_vm6, %v9260_v17, 1073741824  ;;  %7902 = vpow2.f32 %v5044_v63 }
 0x4c8   : > { %7904 = vpow2.f32 %v5038_v56  ;;  %v9497_v19 = vsel %vm4869_vm3, %v5320_v58, 2147483647  ;;  %v4923_v56 = vpop.xlane.xlu1 %4922  ;;  %v9511_v58 = vpop.eup %7900 }
 0x4c9   : > { %v5040_v34 = vmul.f32 1.442695, %v4991_v12  ;;  %10439 = vst [vmem:[#allocation23_spill] sm:$0xff] %v9497_v19  ;;  %v5582_v63 = vshra.s32 %v9497_v19, 16  ;;  %10442 = vst [vmem:[#allocation26_spill] sm:$0xff] %v9511_v58  ;;  %vm5285_vm9 = vcmp.eq.f32.partialorder %v9136_v29, %v4923_v56 }
 0x4ca   : > { %5480 = vmin.xlane.f32.xlu0 %v9444_v8  ;;  %v9469_v8 = vsel %vm4869_vm3, %v5319_v53, 2147483647  ;;  %v9480_v53 = vsel %vm4869_vm3, %v5322_v2, 2147483647  ;;  %v5113_v2 = vsel %vm4869_vm3, %v9482_v43, 0.0 }
 0x4cb   : > { %5525 = vmin.xlane.f32.xlu1 %v9459_v49  ;;  %v5119_v49 = vsel %vm4869_vm3, %v9461_v48, 0.0  ;;  %v5567_v45 = vshra.s32 %v9469_v8, 16  ;;  %v5612_v51 = vshra.s32 %v9480_v53, 16  ;;  %7906 = vpow2.f32 %v5040_v34 }
 0x4cc   : > { %v5323_v34 = vsel %vm5287_vm7, %v9260_v17, 1073741824 }
 0x4cd   : > { %v9493_v48 = vcvt.s32.f32 %v5567_v45  ;;  %v9503_v12 = vcvt.s32.f32 %v5612_v51  ;;  %v4996_v45 = vsub.f32 %v9119_v6, %v9435_v35  ;;  %v4994_v51 = vsub.f32 %v9124_v24, %v9457_v14 }
 0x4ce   : > { %5117 = vadd.xlane.f32.xlu0 %v5116_v5  ;;  %v9487_v5 = vsel %vm4869_vm3, %v5317_v55, 2147483647  ;;  %v9499_v55 = vpop.xlane.xlu0 %4937  ;;  %v9523_v35 = vcvt.s32.f32 %v5582_v63  ;;  %v5321_v63 = vsel %vm5285_vm9, %v9260_v17, 1073741824 }
 0x4cf   : > { %5120 = vadd.xlane.f32.xlu1 %v5119_v49  ;;  %v5537_v49 = vshra.s32 %v9487_v5, 16  ;;  %10440 = vst [vmem:[#allocation24_spill] sm:$0xff] %v9503_v12  ;;  %vm5290_vm8 = vcmp.eq.f32.partialorder %v9147_v32, %v9499_v55  ;;  %v5050_v43 = vmul.f32 1.442695, %v4996_v45  ;;  %v5046_v45 = vmul.f32 1.442695, %v4994_v51 }
 0x4d0   : > { %10443 = vst [vmem:[#allocation27_spill] sm:$0xff] %v9523_v35  ;;  %v5326_v24 = vsel %vm5290_vm8, %v9260_v17, 1073741824 }
 0x4d1   : > { %7908 = vpow2.f32 %v5050_v43  ;;  %v4941_v43 = vpop.xlane.xlu1 %4940 }
 0x4d2   : > { %5111 = vadd.xlane.f32.xlu0 %v5110_v3  ;;  %v9508_v3 = vcvt.s32.f32 %v5537_v49  ;;  %v9521_v6 = vpop.xlane.xlu0 %4931  ;;  %v9525_v49 = vpop.eup %7902  ;;  %vm5291_vm11 = vcmp.eq.f32.partialorder %v9157_v18, %v4941_v43 }
 0x4d3   : > { %5114 = vadd.xlane.f32.xlu1 %v5113_v2  ;;  %v4997_v2 = vsub.f32 %v9129_v42, %v4929_v60  ;;  %10444 = vst [vmem:[#allocation28_spill] sm:$0xff] %v9525_v49  ;;  %v9527_v42 = vpop.eup %7904  ;;  %v5128_v60 = vsel %vm4869_vm3, %v9511_v58, 0.0  ;;  %vm5288_vm10 = vcmp.eq.f32.partialorder %v9152_v16, %v9521_v6 }
 0x4d4   : > { %10441 = vst [vmem:[#allocation25_spill] sm:$0xff] %v9508_v3  ;;  %10445 = vst [vmem:[#allocation29_spill] sm:$0xff] %v9527_v42 }
 0x4d5   : > { %v5052_v14 = vmul.f32 1.442695, %v4997_v2  ;;  %v9546_v19 = vpop.eup %7906  ;;  %v5122_v2 = vsel %vm4869_vm3, %v9527_v42, 0.0 }
 0x4d6   : > { %5570 = vmin.xlane.f32.xlu0 %v9493_v48  ;;  %10446 = vst [vmem:[#allocation30_spill] sm:$0xff] %v9546_v19 }
 0x4d7   : > { %5615 = vmin.xlane.f32.xlu1 %v9503_v12  ;;  %v4995_v12 = vsub.f32 %v9136_v29, %v4923_v56  ;;  %v5324_v29 = vsel %vm5288_vm10, %v9260_v17, 1073741824  ;;  %7910 = vpow2.f32 %v5052_v14 }
 0x4d8   : > { %7912 = vpow2.f32 %v5046_v45  ;;  %v9561_v42 = vsel %vm4869_vm3, %v5324_v29, 2147483647  ;;  %v4935_v45 = vpop.xlane.xlu1 %4934 }
 0x4d9   : > { %v5048_v56 = vmul.f32 1.442695, %v4995_v12  ;;  %10447 = vst [vmem:[#allocation31_spill] sm:$0xff] %v9561_v42  ;;  %v5642_v14 = vshra.s32 %v9561_v42, 16  ;;  %vm5289_vm13 = vcmp.eq.f32.partialorder %v9164_v40, %v4935_v45 }
 0x4da   : > { %5540 = vmin.xlane.f32.xlu0 %v9508_v3  ;;  %v9533_v3 = vsel %vm4869_vm3, %v5323_v34, 2147483647  ;;  %v9544_v34 = vsel %vm4869_vm3, %v5326_v24, 2147483647  ;;  %v5125_v24 = vsel %vm4869_vm3, %v9546_v19, 0.0 }
 0x4db   : > { %5585 = vmin.xlane.f32.xlu1 %v9523_v35  ;;  %v5131_v35 = vsel %vm4869_vm3, %v9525_v49, 0.0  ;;  %v5627_v58 = vshra.s32 %v9533_v3, 16  ;;  %v5672_v51 = vshra.s32 %v9544_v34, 16  ;;  %7914 = vpow2.f32 %v5048_v56  ;;  %v9575_v29 = vpop.eup %7908 }
 0x4dc   : > { %10450 = vst [vmem:[#allocation34_spill] sm:$0xff] %v9575_v29  ;;  %v5327_v56 = vsel %vm5291_vm11, %v9260_v17, 1073741824 }
 0x4dd   : > { %v9557_v49 = vcvt.s32.f32 %v5627_v58  ;;  %v9567_v12 = vcvt.s32.f32 %v5672_v51  ;;  %v5000_v58 = vsub.f32 %v9147_v32, %v9499_v55  ;;  %v4998_v51 = vsub.f32 %v9152_v16, %v9521_v6 }
 0x4de   : > { %5129 = vadd.xlane.f32.xlu0 %v5128_v60  ;;  %v9551_v60 = vsel %vm4869_vm3, %v5321_v63, 2147483647  ;;  %v9563_v63 = vpop.xlane.xlu0 %4949  ;;  %v9587_v55 = vcvt.s32.f32 %v5642_v14  ;;  %v5325_v14 = vsel %vm5289_vm13, %v9260_v17, 1073741824 }
 0x4df   : > { %5132 = vadd.xlane.f32.xlu1 %v5131_v35  ;;  %v5597_v35 = vshra.s32 %v9551_v60, 16  ;;  %10448 = vst [vmem:[#allocation32_spill] sm:$0xff] %v9567_v12  ;;  %vm5294_vm12 = vcmp.eq.f32.partialorder %v9175_v21, %v9563_v63  ;;  %v5058_v19 = vmul.f32 1.442695, %v5000_v58  ;;  %v5054_v58 = vmul.f32 1.442695, %v4998_v51 }
 0x4e0   : > { %10451 = vst [vmem:[#allocation35_spill] sm:$0xff] %v9587_v55  ;;  %v5330_v16 = vsel %vm5294_vm12, %v9260_v17, 1073741824 }
 0x4e1   : > { %7916 = vpow2.f32 %v5058_v19  ;;  %v4953_v19 = vpop.xlane.xlu1 %4952 }
 0x4e2   : > { %5123 = vadd.xlane.f32.xlu0 %v5122_v2  ;;  %v9572_v2 = vcvt.s32.f32 %v5597_v35  ;;  %v9585_v32 = vpop.xlane.xlu0 %4943  ;;  %v9589_v35 = vpop.eup %7910  ;;  %vm5295_vm15 = vcmp.eq.f32.partialorder %v9185_v59, %v4953_v19 }
 0x4e3   : > { %5126 = vadd.xlane.f32.xlu1 %v5125_v24  ;;  %v5001_v24 = vsub.f32 %v9157_v18, %v4941_v43  ;;  %10452 = vst [vmem:[#allocation36_spill] sm:$0xff] %v9589_v35  ;;  %v9591_v18 = vpop.eup %7912  ;;  %v5140_v43 = vsel %vm4869_vm3, %v9575_v29, 0.0  ;;  %vm5292_vm14 = vcmp.eq.f32.partialorder %v9180_v39, %v9585_v32 }
 0x4e4   : > { %10449 = vst [vmem:[#allocation33_spill] sm:$0xff] %v9572_v2  ;;  %10453 = vst [vmem:[#allocation37_spill] sm:$0xff] %v9591_v18 }
 0x4e5   : > { %v5060_v6 = vmul.f32 1.442695, %v5001_v24  ;;  %v9610_v42 = vpop.eup %7914  ;;  %v5134_v24 = vsel %vm4869_vm3, %v9591_v18, 0.0 }
 0x4e6   : > { %5630 = vmin.xlane.f32.xlu0 %v9557_v49  ;;  %10454 = vst [vmem:[#allocation38_spill] sm:$0xff] %v9610_v42 }
 0x4e7   : > { %5675 = vmin.xlane.f32.xlu1 %v9567_v12  ;;  %v4999_v12 = vsub.f32 %v9164_v40, %v4935_v45  ;;  %v5328_v40 = vsel %vm5292_vm14, %v9260_v17, 1073741824  ;;  %7918 = vpow2.f32 %v5060_v6 }
 0x4e8   : > { %7920 = vpow2.f32 %v5054_v58  ;;  %v9625_v18 = vsel %vm4869_vm3, %v5328_v40, 2147483647  ;;  %v4947_v58 = vpop.xlane.xlu1 %4946 }
 0x4e9   : > { %v5056_v45 = vmul.f32 1.442695, %v4999_v12  ;;  %10455 = vst [vmem:[#allocation39_spill] sm:$0xff] %v9625_v18  ;;  %v5702_v6 = vshra.s32 %v9625_v18, 16  ;;  %vm5293_vm1 = vcmp.eq.f32.partialorder %v9192_v1, %v4947_v58 }
 0x4ea   : > { %5600 = vmin.xlane.f32.xlu0 %v9572_v2  ;;  %v9597_v2 = vsel %vm4869_vm3, %v5327_v56, 2147483647  ;;  %v9608_v56 = vsel %vm4869_vm3, %v5330_v16, 2147483647  ;;  %v5137_v16 = vsel %vm4869_vm3, %v9610_v42, 0.0 }
 0x4eb   : > { %5645 = vmin.xlane.f32.xlu1 %v9587_v55  ;;  %v5143_v55 = vsel %vm4869_vm3, %v9589_v35, 0.0  ;;  %v5687_v29 = vshra.s32 %v9597_v2, 16  ;;  %v5732_v51 = vshra.s32 %v9608_v56, 16  ;;  %7922 = vpow2.f32 %v5056_v45  ;;  %v9639_v40 = vpop.eup %7916 }
 0x4ec   : > { %10458 = vst [vmem:[#allocation42_spill] sm:$0xff] %v9639_v40  ;;  %v5331_v45 = vsel %vm5295_vm15, %v9260_v17, 1073741824 }
 0x4ed   : > { %v9621_v35 = vcvt.s32.f32 %v5687_v29  ;;  %v9631_v12 = vcvt.s32.f32 %v5732_v51  ;;  %v5004_v29 = vsub.f32 %v9175_v21, %v9563_v63  ;;  %v5002_v51 = vsub.f32 %v9180_v39, %v9585_v32 }
 0x4ee   : > { %5141 = vadd.xlane.f32.xlu0 %v5140_v43  ;;  %v9615_v43 = vsel %vm4869_vm3, %v5325_v14, 2147483647  ;;  %v9627_v14 = vpop.xlane.xlu0 %4961  ;;  %v9651_v63 = vcvt.s32.f32 %v5702_v6  ;;  %v5329_v6 = vsel %vm5293_vm1, %v9260_v17, 1073741824 }
 0x4ef   : > { %5144 = vadd.xlane.f32.xlu1 %v5143_v55  ;;  %v5657_v55 = vshra.s32 %v9615_v43, 16  ;;  %10456 = vst [vmem:[#allocation40_spill] sm:$0xff] %v9631_v12  ;;  %vm5298_vm0 = vcmp.eq.f32.partialorder %v9203_v7, %v9627_v14  ;;  %v5066_v42 = vmul.f32 1.442695, %v5004_v29  ;;  %v5062_v29 = vmul.f32 1.442695, %v5002_v51 }
 0x4f0   : > { %10459 = vst [vmem:[#allocation43_spill] sm:$0xff] %v9651_v63  ;;  %v5334_v39 = vsel %vm5298_vm0, %v9260_v17, 1073741824 }
 0x4f1   : > { %7924 = vpow2.f32 %v5066_v42  ;;  %v4965_v42 = vpop.xlane.xlu1 %4964 }
 0x4f2   : > { %5135 = vadd.xlane.f32.xlu0 %v5134_v24  ;;  %v9636_v24 = vcvt.s32.f32 %v5657_v55  ;;  %v9649_v21 = vpop.xlane.xlu0 %4955  ;;  %v9653_v55 = vpop.eup %7918  ;;  %vm5299_vm4 = vcmp.eq.f32.partialorder %v9213_v4, %v4965_v42 }
 0x4f3   : > { %5138 = vadd.xlane.f32.xlu1 %v5137_v16  ;;  %v5005_v16 = vsub.f32 %v9185_v59, %v4953_v19  ;;  %10460 = vst [vmem:[#allocation44_spill] sm:$0xff] %v9653_v55  ;;  %v9655_v59 = vpop.eup %7920  ;;  %v5152_v19 = vsel %vm4869_vm3, %v9639_v40, 0.0  ;;  %vm5296_vm2 = vcmp.eq.f32.partialorder %v9208_v26, %v9649_v21 }
 0x4f4   : > { %10457 = vst [vmem:[#allocation41_spill] sm:$0xff] %v9636_v24  ;;  %10461 = vst [vmem:[#allocation45_spill] sm:$0xff] %v9655_v59 }
 0x4f5   : > { %v5068_v32 = vmul.f32 1.442695, %v5005_v16  ;;  %v9674_v18 = vpop.eup %7922  ;;  %v5146_v16 = vsel %vm4869_vm3, %v9655_v59, 0.0 }
 0x4f6   : > { %5690 = vmin.xlane.f32.xlu0 %v9621_v35  ;;  %10462 = vst [vmem:[#allocation46_spill] sm:$0xff] %v9674_v18 }
 0x4f7   : > { %5735 = vmin.xlane.f32.xlu1 %v9631_v12  ;;  %v5003_v12 = vsub.f32 %v9192_v1, %v4947_v58  ;;  %v5332_v1 = vsel %vm5296_vm2, %v9260_v17, 1073741824  ;;  %7926 = vpow2.f32 %v5068_v32 }
 0x4f8   : > { %7928 = vpow2.f32 %v5062_v29  ;;  %v9689_v59 = vsel %vm4869_vm3, %v5332_v1, 2147483647  ;;  %v4959_v29 = vpop.xlane.xlu1 %4958 }
 0x4f9   : > { %v5064_v58 = vmul.f32 1.442695, %v5003_v12  ;;  %10463 = vst [vmem:[#allocation47_spill] sm:$0xff] %v9689_v59  ;;  %v5762_v32 = vshra.s32 %v9689_v59, 16  ;;  %vm5297_vm6 = vcmp.eq.f32.partialorder %v9220_v20, %v4959_v29 }
 0x4fa   : > { %5660 = vmin.xlane.f32.xlu0 %v9636_v24  ;;  %v9661_v24 = vsel %vm4869_vm3, %v5331_v45, 2147483647  ;;  %v9672_v45 = vsel %vm4869_vm3, %v5334_v39, 2147483647  ;;  %v5149_v39 = vsel %vm4869_vm3, %v9674_v18, 0.0 }
 0x4fb   : > { %5705 = vmin.xlane.f32.xlu1 %v9651_v63  ;;  %v5155_v63 = vsel %vm4869_vm3, %v9653_v55, 0.0  ;;  %v5747_v40 = vshra.s32 %v9661_v24, 16  ;;  %v5792_v51 = vshra.s32 %v9672_v45, 16  ;;  %7930 = vpow2.f32 %v5064_v58  ;;  %v9703_v1 = vpop.eup %7924 }
 0x4fc   : > { %10466 = vst [vmem:[#allocation50_spill] sm:$0xff] %v9703_v1  ;;  %v5335_v58 = vsel %vm5299_vm4, %v9260_v17, 1073741824  ;;  %v4977_v59 = vpop.xlane.xlu1 %4976 }
 0x4fd   : > { %v9685_v55 = vcvt.s32.f32 %v5747_v40  ;;  %v9695_v12 = vcvt.s32.f32 %v5792_v51  ;;  %v5008_v40 = vsub.f32 %v9203_v7, %v9627_v14  ;;  %v5006_v51 = vsub.f32 %v9208_v26, %v9649_v21 }
 0x4fe   : > { %5153 = vadd.xlane.f32.xlu0 %v5152_v19  ;;  %v9679_v19 = vsel %vm4869_vm3, %v5329_v6, 2147483647  ;;  %v9691_v6 = vpop.xlane.xlu0 %4973  ;;  %v9715_v14 = vcvt.s32.f32 %v5762_v32  ;;  %v5333_v32 = vsel %vm5297_vm6, %v9260_v17, 1073741824  ;;  %vm5303_vm8 = vcmp.eq.f32.partialorder %v9241_v13, %v4977_v59 }
 0x4ff   : > { %5156 = vadd.xlane.f32.xlu1 %v5155_v63  ;;  %v5717_v63 = vshra.s32 %v9679_v19, 16  ;;  %10464 = vst [vmem:[#allocation48_spill] sm:$0xff] %v9695_v12  ;;  %vm5302_vm5 = vcmp.eq.f32.partialorder %v9231_v28, %v9691_v6  ;;  %v5074_v18 = vmul.f32 1.442695, %v5008_v40  ;;  %v5070_v40 = vmul.f32 1.442695, %v5006_v51 }
 0x500   : > { %10467 = vst [vmem:[#allocation51_spill] sm:$0xff] %v9715_v14  ;;  %v5338_v26 = vsel %vm5302_vm5, %v9260_v17, 1073741824 }
 0x501   : > { %7932 = vpow2.f32 %v5074_v18 }
 0x502   : > { %5147 = vadd.xlane.f32.xlu0 %v5146_v16  ;;  %v9700_v16 = vcvt.s32.f32 %v5717_v63  ;;  %v9713_v7 = vpop.xlane.xlu0 %4967  ;;  %v9717_v63 = vpop.eup %7926 }
 0x503   : > { %5150 = vadd.xlane.f32.xlu1 %v5149_v39  ;;  %v5009_v39 = vsub.f32 %v9213_v4, %v4965_v42  ;;  %10468 = vst [vmem:[#allocation52_spill] sm:$0xff] %v9717_v63  ;;  %v9719_v4 = vpop.eup %7928  ;;  %v5164_v42 = vsel %vm4869_vm3, %v9703_v1, 0.0  ;;  %vm5300_vm7 = vcmp.eq.f32.partialorder %v9236_v31, %v9713_v7  ;;  %v5167_v1 = vsel %vm4869_vm3, %v9717_v63, 0.0  ;;  %v4971_v63 = vpop.xlane.xlu1 %4970 }
 0x504   : > { %10465 = vst [vmem:[#allocation49_spill] sm:$0xff] %v9700_v16  ;;  %10469 = vst [vmem:[#allocation53_spill] sm:$0xff] %v9719_v4  ;;  %v5336_v51 = vsel %vm5300_vm7, %v9260_v17, 1073741824  ;;  %vm5301_vm9 = vcmp.eq.f32.partialorder %v9248_v36, %v4971_v63 }
 0x505   : > { %v5076_v21 = vmul.f32 1.442695, %v5009_v39  ;;  %v9738_v39 = vpop.eup %7930 }
 0x506   : > { %5750 = vmin.xlane.f32.xlu0 %v9685_v55  ;;  %10471 = vst [vmem:[#allocation55_spill] sm:$0xff] %v9738_v39 }
 0x507   : > { %5795 = vmin.xlane.f32.xlu1 %v9695_v12  ;;  %v5007_v12 = vsub.f32 %v9220_v20, %v4959_v29  ;;  %v5158_v20 = vsel %vm4869_vm3, %v9719_v4, 0.0  ;;  %v9743_v29 = vsel %vm4869_vm3, %v5333_v32, 2147483647  ;;  %7934 = vpow2.f32 %v5076_v21 }
 0x508   : > { %7936 = vpow2.f32 %v5070_v40  ;;  %v5777_v4 = vshra.s32 %v9743_v29, 16  ;;  %v9754_v32 = vsel %vm4869_vm3, %v5336_v51, 2147483647  ;;  %v5011_v21 = vsub.f32 %v9248_v36, %v4971_v63 }
 0x509   : > { %v5072_v18 = vmul.f32 1.442695, %v5007_v12  ;;  %v5337_v36 = vsel %vm5301_vm9, %v9260_v17, 1073741824 }
 0x50a   : > { %5720 = vmin.xlane.f32.xlu0 %v9700_v16  ;;  %v9725_v16 = vsel %vm4869_vm3, %v5335_v58, 2147483647 }
 0x50b   : > { %5765 = vmin.xlane.f32.xlu1 %v9715_v14  ;;  %10470 = vst [vmem:[#allocation54_spill] sm:$0xff] %v9725_v16  ;;  %v5807_v58 = vshra.s32 %v9725_v16, 16  ;;  %v9736_v14 = vsel %vm4869_vm3, %v5338_v26, 2147483647  ;;  %7938 = vpow2.f32 %v5072_v18  ;;  %v9767_v51 = vpop.eup %7932 }
 0x50c   : > { %v5852_v26 = vshra.s32 %v9736_v14, 16  ;;  %10472 = vst [vmem:[#allocation56_spill] sm:$0xff] %v9767_v51 }
 0x50d   : > { %v9750_v16 = vcvt.s32.f32 %v5807_v58  ;;  %v5012_v58 = vsub.f32 %v9231_v28, %v9691_v6  ;;  %v5010_v28 = vsub.f32 %v9236_v31, %v9713_v7 }
 0x50e   : > { %5165 = vadd.xlane.f32.xlu0 %v5164_v42  ;;  %v5013_v42 = vsub.f32 %v9241_v13, %v4977_v59  ;;  %v9759_v40 = vcvt.s32.f32 %v5852_v26  ;;  %v5339_v13 = vsel %vm5303_vm8, %v9260_v17, 1073741824  ;;  %v5080_v59 = vmul.f32 1.442695, %v5011_v21 }
 0x50f   : > { %5168 = vadd.xlane.f32.xlu1 %v5167_v1  ;;  %v5161_v1 = vsel %vm4869_vm3, %v9738_v39, 0.0  ;;  %v9764_v39 = vcvt.s32.f32 %v5777_v4  ;;  %v5082_v26 = vmul.f32 1.442695, %v5012_v58  ;;  %v5176_v4 = vsel %vm4869_vm3, %v9767_v51, 0.0 }
 0x510   : > { %v5084_v12 = vmul.f32 1.442695, %v5013_v42 }
 0x511   : > { %v9774_v42 = vpop.eup %7934 }
 0x512   : > { %5159 = vadd.xlane.f32.xlu0 %v5158_v20  ;;  %v5822_v20 = vshra.s32 %v9754_v32, 16  ;;  %7940 = vpow2.f32 %v5084_v12  ;;  %10473 = vst [vmem:[#allocation57_spill] sm:$0xff] %v9774_v42  ;;  %v9778_v6 = vpop.eup %7936  ;;  %v5078_v12 = vmul.f32 1.442695, %v5010_v28  ;;  %v5179_v31 = vsel %vm4869_vm3, %v9774_v42, 0.0 }
 0x513   : > { %5162 = vadd.xlane.f32.xlu1 %v5161_v1  ;;  %10474 = vst [vmem:[#allocation58_spill] sm:$0xff] %v9778_v6  ;;  %v9784_v1 = vsel %vm4869_vm3, %v5339_v13, 2147483647  ;;  %7942 = vpow2.f32 %v5080_v59  ;;  %v5170_v21 = vsel %vm4869_vm3, %v9778_v6, 0.0  ;;  %v10489_v6 = vld [vmem:[#allocation24_spill] sm:$0xff] }
 0x514   : > { %v9772_v18 = vcvt.s32.f32 %v5822_v20  ;;  %7944 = vpow2.f32 %v5082_v26  ;;  %v5867_v7 = vshra.s32 %v9784_v1, 16  ;;  %v9795_v20 = vsel %vm4869_vm3, %v5337_v36, 2147483647 }
 0x515   : > { %v9787_v63 = vpop.eup %7938  ;;  %7946 = vpow2.f32 %v5078_v12  ;;  %v5837_v13 = vshra.s32 %v9795_v20, 16  ;;  %v5371_v26 = vand.u32 65535, %v9267_v57 }
 0x516   : > { %5810 = vmin.xlane.f32.xlu0 %v9750_v16  ;;  %10475 = vst [vmem:[#allocation59_spill] sm:$0xff] %v9787_v63  ;;  %v5173_v17 = vsel %vm4869_vm3, %v9787_v63, 0.0  ;;  %v9799_v58 = vcvt.s32.f32 %v5867_v7  ;;  %v5341_v7 = vand.u32 65535, %v9272_v61  ;;  %v5386_v63 = vand.u32 65535, %v9284_v23 }
 0x517   : > { %5855 = vmin.xlane.f32.xlu1 %v9759_v40  ;;  %v5373_v57 = vcvt.s32.f32 %v5371_v26  ;;  %v5431_v61 = vand.u32 65535, %v9298_v37 }
 0x518   : > { %v5343_v42 = vcvt.s32.f32 %v5341_v7  ;;  %v5388_v23 = vcvt.s32.f32 %v5386_v63 }
 0x51a   : > { %5780 = vmin.xlane.f32.xlu0 %v9764_v39 }
 0x51b   : > { %5825 = vmin.xlane.f32.xlu1 %v9772_v18 }
 0x51c   : > { %v9802_v59 = vpop.eup %7940 }
 0x51d   : > { %10476 = vst [vmem:[#allocation60_spill] sm:$0xff] %v9802_v59  ;;  %v5191_v28 = vsel %vm4869_vm3, %v9802_v59, 0.0  ;;  %v9810_v36 = vpop.eup %7942 }
 0x51e   : > { %5177 = vadd.xlane.f32.xlu0 %v5176_v4  ;;  %v9808_v4 = vcvt.s32.f32 %v5837_v13  ;;  %10477 = vst [vmem:[#allocation61_spill] sm:$0xff] %v9810_v36  ;;  %v9812_v12 = vpop.eup %7944 }
 0x51f   : > { %5180 = vadd.xlane.f32.xlu1 %v5179_v31  ;;  %10478 = vst [vmem:[#allocation62_spill] sm:$0xff] %v9812_v12  ;;  %v9824_v13 = vpop.eup %7946 }
 0x520   : > { %10479 = vst [vmem:[#allocation63_spill] sm:$0xff] %v9824_v13 }
 0x522   : > { %5171 = vadd.xlane.f32.xlu0 %v5170_v21  ;;  %v5185_v21 = vsel %vm4869_vm3, %v9810_v36, 0.0  ;;  %v5433_v36 = vcvt.s32.f32 %v5431_v61  ;;  %v5446_v61 = vand.u32 65535, %v9339_v30 }
 0x523   : > { %5174 = vadd.xlane.f32.xlu1 %v5173_v17  ;;  %v5188_v17 = vsel %vm4869_vm3, %v9812_v12, 0.0 }
 0x526   : > { %5870 = vmin.xlane.f32.xlu0 %v9799_v58 }
 0x527   : > { %5192 = vadd.xlane.f32.xlu1 %v5191_v28 }
 0x52a   : > { %5840 = vmin.xlane.f32.xlu0 %v9808_v4 }
 0x52b   : > { %v9815_v31 = vpop.xlane.xlu0 %5375  ;;  %5186 = vadd.xlane.f32.xlu1 %v5185_v21 }
 0x52c   : > { %vm5377_vm10 = vcmp.eq.f32.partialorder %v9278_v27, %v9815_v31  ;;  %v5182_v27 = vsel %vm4869_vm3, %v9824_v13, 0.0  ;;  %v10483_v13 = vld [vmem:[#allocation17_spill] sm:$0xff] }
 0x52d   : > { %v5378_v28 = vsel %vm5377_vm10, %v5373_v57, inf  ;;  %v5356_v57 = vand.u32 65535, %v9294_v33 }
 0x52e   : > { %5189 = vadd.xlane.f32.xlu0 %v5188_v17 }
 0x52f   : > { %v9826_v59 = vpop.xlane.xlu0 %5345  ;;  %5379 = vmin.xlane.f32.xlu1 %v5378_v28  ;;  %v5358_v28 = vcvt.s32.f32 %v5356_v57  ;;  %v5416_v57 = vand.u32 65535, %v9359_v50 }
 0x530   : > { %vm5347_vm11 = vcmp.eq.f32.partialorder %v9289_v46, %v9826_v59  ;;  %v5401_v46 = vand.u32 65535, %v9314_v22 }
 0x531   : > { %v5348_v26 = vsel %vm5347_vm11, %v5343_v42, inf }
 0x532   : > { %5183 = vadd.xlane.f32.xlu0 %v5182_v27  ;;  %v5403_v63 = vcvt.s32.f32 %v5401_v46 }
 0x533   : > { %v9834_v21 = vpop.xlane.xlu0 %5390  ;;  %5349 = vmin.xlane.f32.xlu1 %v5348_v26 }
 0x534   : > { %v9837_v17 = vpop.xlane.xlu1 %5435  ;;  %vm5392_vm12 = vcmp.eq.f32.partialorder %v9302_v47, %v9834_v21 }
 0x535   : > { %vm5437_vm13 = vcmp.eq.f32.partialorder %v9305_v52, %v9837_v17  ;;  %v5393_v7 = vsel %vm5392_vm12, %v5388_v23, inf }
 0x536   : > { %v5438_v37 = vsel %vm5437_vm13, %v5433_v36, inf }
 0x537   : > { %5439 = vmin.xlane.f32.xlu0 %v5438_v37  ;;  %v9844_v42 = vpop.xlane.xlu0 %5360  ;;  %5394 = vmin.xlane.f32.xlu1 %v5393_v7  ;;  %v5461_v37 = vand.u32 65535, %v9369_v41 }
 0x538   : > { %vm5362_vm14 = vcmp.eq.f32.partialorder %v9317_v9, %v9844_v42  ;;  %v9848_v33 = vpop.xlane.xlu1 %5405  ;;  %v5491_v9 = vand.u32 65535, %v9352_v38 }
 0x539   : > { %v5363_v47 = vsel %vm5362_vm14, %v5358_v28, inf  ;;  %vm5407_vm15 = vcmp.eq.f32.partialorder %v9331_v25, %v9848_v33  ;;  %v5448_v25 = vcvt.s32.f32 %v5446_v61  ;;  %v5418_v28 = vcvt.s32.f32 %v5416_v57 }
 0x53a   : > { %v5408_v22 = vsel %vm5407_vm15, %v5403_v63, inf  ;;  %v5493_v30 = vcvt.s32.f32 %v5491_v9  ;;  %v5463_v41 = vcvt.s32.f32 %v5461_v37  ;;  %v5506_v9 = vand.u32 65535, %v9405_v62 }
 0x53b   : > { %v9852_v52 = vpop.xlane.xlu0 %5093  ;;  %5409 = vmin.xlane.f32.xlu0 %v5408_v22  ;;  %5364 = vmin.xlane.f32.xlu1 %v5363_v47  ;;  %v10480_v47 = vld [vmem:[#allocation11_spill] sm:$0xff] }
 0x53c   : > { %v9854_v36 = vpop.xlane.xlu1 %5096 }
 0x53f   : > { %v9857_v27 = vpop.xlane.xlu0 %5087 }
 0x540   : > { %v9860_v26 = vpop.xlane.xlu1 %5090  ;;  %7948 = vrcp.f32 %v9857_v27 }
 0x541   : > { %7950 = vrcp.f32 %v9852_v52 }
 0x543   : > { %v9863_v23 = vpop.xlane.xlu0 %5450 }
 0x544   : > { %vm5452_vm0 = vcmp.eq.f32.partialorder %v9365_v54, %v9863_v23  ;;  %v9868_v7 = vpop.xlane.xlu1 %5495 }
 0x545   : > { %v5453_v46 = vsel %vm5452_vm0, %v5448_v25, inf  ;;  %vm5497_vm1 = vcmp.eq.f32.partialorder %v9375_v10, %v9868_v7 }
 0x546   : > { %5454 = vmin.xlane.f32.xlu1 %v5453_v46  ;;  %v5498_v50 = vsel %vm5497_vm1, %v5493_v30, inf  ;;  %v5476_v46 = vand.u32 65535, %v9423_v0  ;;  %v5508_v30 = vcvt.s32.f32 %v5506_v9 }
 0x547   : > { %v9872_v38 = vpop.xlane.xlu0 %5420  ;;  %5499 = vmin.xlane.f32.xlu0 %v5498_v50  ;;  %v10481_v50 = vld [vmem:[#allocation15_spill] sm:$0xff] }
 0x548   : > { %vm5422_vm2 = vcmp.eq.f32.partialorder %v9380_v15, %v9872_v38  ;;  %v9876_v54 = vpop.xlane.xlu1 %5465  ;;  %v5551_v15 = vand.u32 65535, %v9416_v44 }
 0x549   : > { %v5423_v63 = vsel %vm5422_vm2, %v5418_v28, inf  ;;  %vm5467_vm4 = vcmp.eq.f32.partialorder %v10480_v47, %v9876_v54  ;;  %v10482_v47 = vld [vmem:[#allocation16_spill] sm:$0xff] }
 0x54a   : > { %5424 = vmin.xlane.f32.xlu1 %v5423_v63  ;;  %v5468_v61 = vsel %vm5467_vm4, %v5463_v41, inf  ;;  %v5521_v63 = vand.u32 65535, %v10481_v50  ;;  %v5553_v62 = vcvt.s32.f32 %v5551_v15  ;;  %v10485_v50 = vld [vmem:[#allocation19_spill] sm:$0xff] }
 0x54b   : > { %v9880_v22 = vpop.xlane.xlu0 %5105  ;;  %5469 = vmin.xlane.f32.xlu0 %v5468_v61  ;;  %v5478_v61 = vcvt.s32.f32 %v5476_v46  ;;  %v5566_v46 = vand.u32 65535, %v9469_v8 }
 0x54c   : > { %v9882_v10 = vpop.xlane.xlu1 %5108  ;;  %7952 = vrcp.f32 %v9880_v22 }
 0x54d   : > { %7954 = vrcp.f32 %v9854_v36 }
 0x54f   : > { %v9885_v57 = vpop.xlane.xlu0 %5099 }
 0x550   : > { %v9888_v25 = vpop.xlane.xlu1 %5102  ;;  %7956 = vrcp.f32 %v9885_v57 }
 0x551   : > { %7958 = vrcp.f32 %v9860_v26 }
 0x552   : > { %7960 = vrcp.f32 %v9882_v10 }
 0x553   : > { %v9891_v37 = vpop.xlane.xlu0 %5510 }
 0x554   : > { %vm5512_vm5 = vcmp.eq.f32.partialorder %v9429_v11, %v9891_v37  ;;  %v9896_v41 = vpop.xlane.xlu1 %5555 }
 0x555   : > { %v5513_v28 = vsel %vm5512_vm5, %v5508_v30, inf  ;;  %vm5557_vm6 = vcmp.eq.f32.partialorder %v10482_v47, %v9896_v41  ;;  %v5523_v30 = vcvt.s32.f32 %v5521_v63 }
 0x556   : > { %5514 = vmin.xlane.f32.xlu1 %v5513_v28  ;;  %v5558_v0 = vsel %vm5557_vm6, %v5553_v62, inf }
 0x557   : > { %v9900_v44 = vpop.xlane.xlu0 %5480  ;;  %5559 = vmin.xlane.f32.xlu0 %v5558_v0  ;;  %v5536_v0 = vand.u32 65535, %v9487_v5 }
 0x558   : > { %vm5482_vm7 = vcmp.eq.f32.partialorder %v10483_v13, %v9900_v44  ;;  %v9904_v11 = vpop.xlane.xlu1 %5525  ;;  %v5611_v13 = vand.u32 65535, %v9480_v53 }
 0x559   : > { %v5483_v9 = vsel %vm5482_vm7, %v5478_v61, inf  ;;  %10484 = vst [vmem:[#allocation11_spill] sm:$0xff] %v9904_v11  ;;  %vm5527_vm8 = vcmp.eq.f32.partialorder %v10485_v50, %v9904_v11  ;;  %v10487_v50 = vld [vmem:[#allocation23_spill] sm:$0xff]  ;;  %v5538_v51 = vcvt.s32.f32 %v5536_v0  ;;  %v10491_v11 = vld [vmem:[#allocation25_spill] sm:$0xff]  ;;  %v5626_v0 = vand.u32 65535, %v9533_v3 }
 0x55a   : > { %5484 = vmin.xlane.f32.xlu1 %v5483_v9  ;;  %v5528_v28 = vsel %vm5527_vm8, %v5523_v30, inf  ;;  %v5568_v9 = vcvt.s32.f32 %v5566_v46  ;;  %v5613_v8 = vcvt.s32.f32 %v5611_v13 }
 0x55b   : > { %v9908_v15 = vpop.xlane.xlu0 %5117  ;;  %5529 = vmin.xlane.f32.xlu0 %v5528_v28  ;;  %v5581_v28 = vand.u32 65535, %v10487_v50  ;;  %v10493_v50 = vld [vmem:[#allocation27_spill] sm:$0xff] }
 0x55c   : > { %v9910_v47 = vpop.xlane.xlu1 %5120  ;;  %7962 = vrcp.f32 %v9908_v15 }
 0x55d   : > { %7964 = vrcp.f32 %v9888_v25  ;;  %v5502_v25 = vcvt.f32.s32 %v9868_v7  ;;  %v10532_v7 = vld [vmem:[#allocation12_spill] sm:$0xff] }
 0x55f   : > { %v9913_v62 = vpop.xlane.xlu0 %5111 }
 0x560   : > { %v9916_v61 = vpop.xlane.xlu1 %5114  ;;  %7966 = vrcp.f32 %v9913_v62 }
 0x561   : > { %7968 = vrcp.f32 %v9910_v47 }
 0x563   : > { %v9919_v63 = vpop.xlane.xlu0 %5570 }
 0x564   : > { %10486 = vst [vmem:[#allocation15_spill] sm:$0xff] %v9919_v63  ;;  %vm5572_vm9 = vcmp.eq.f32.partialorder %v9493_v48, %v9919_v63  ;;  %v9924_v12 = vpop.xlane.xlu1 %5615  ;;  %v10499_v63 = vld [vmem:[#allocation33_spill] sm:$0xff] }
 0x565   : > { %v5573_v30 = vsel %vm5572_vm9, %v5568_v9, inf  ;;  %10488 = vst [vmem:[#allocation16_spill] sm:$0xff] %v9924_v12  ;;  %vm5617_vm10 = vcmp.eq.f32.partialorder %v10489_v6, %v9924_v12  ;;  %v5583_v9 = vcvt.s32.f32 %v5581_v28 }
 0x566   : > { %5574 = vmin.xlane.f32.xlu1 %v5573_v30  ;;  %v5618_v5 = vsel %vm5617_vm10, %v5613_v8, inf }
 0x567   : > { %v9928_v53 = vpop.xlane.xlu0 %5540  ;;  %5619 = vmin.xlane.f32.xlu0 %v5618_v5  ;;  %v5596_v5 = vand.u32 65535, %v9551_v60 }
 0x568   : > { %10490 = vst [vmem:[#allocation17_spill] sm:$0xff] %v9928_v53  ;;  %vm5542_vm11 = vcmp.eq.f32.partialorder %v10491_v11, %v9928_v53  ;;  %v9932_v48 = vpop.xlane.xlu1 %5585  ;;  %v5671_v11 = vand.u32 65535, %v9544_v34  ;;  %v10497_v53 = vld [vmem:[#allocation32_spill] sm:$0xff] }
 0x569   : > { %v5543_v46 = vsel %vm5542_vm11, %v5538_v51, inf  ;;  %10492 = vst [vmem:[#allocation19_spill] sm:$0xff] %v9932_v48  ;;  %vm5587_vm12 = vcmp.eq.f32.partialorder %v10493_v50, %v9932_v48  ;;  %v10495_v50 = vld [vmem:[#allocation31_spill] sm:$0xff]  ;;  %v5598_v12 = vcvt.s32.f32 %v5596_v5  ;;  %v5686_v5 = vand.u32 65535, %v9597_v2 }
 0x56a   : > { %5544 = vmin.xlane.f32.xlu1 %v5543_v46  ;;  %v5588_v30 = vsel %vm5587_vm12, %v5583_v9, inf  ;;  %v5628_v46 = vcvt.s32.f32 %v5626_v0  ;;  %v5673_v3 = vcvt.s32.f32 %v5671_v11 }
 0x56b   : > { %v9936_v13 = vpop.xlane.xlu0 %5129  ;;  %5589 = vmin.xlane.f32.xlu0 %v5588_v30  ;;  %v5641_v30 = vand.u32 65535, %v10495_v50  ;;  %v10501_v50 = vld [vmem:[#allocation35_spill] sm:$0xff] }
 0x56c   : > { %v9938_v6 = vpop.xlane.xlu1 %5132  ;;  %7970 = vrcp.f32 %v9936_v13  ;;  %v5562_v13 = vcvt.f32.s32 %v9896_v41 }
 0x56d   : > { %7972 = vrcp.f32 %v9916_v61 }
 0x56f   : > { %v9941_v8 = vpop.xlane.xlu0 %5123 }
 0x570   : > { %v9944_v51 = vpop.xlane.xlu1 %5126  ;;  %7974 = vrcp.f32 %v9941_v8 }
 0x571   : > { %7976 = vrcp.f32 %v9938_v6 }
 0x573   : > { %v9947_v28 = vpop.xlane.xlu0 %5630 }
 0x574   : > { %10494 = vst [vmem:[#allocation23_spill] sm:$0xff] %v9947_v28  ;;  %vm5632_vm13 = vcmp.eq.f32.partialorder %v9557_v49, %v9947_v28  ;;  %v9952_v48 = vpop.xlane.xlu1 %5675  ;;  %v10507_v28 = vld [vmem:[#allocation41_spill] sm:$0xff] }
 0x575   : > { %v5633_v9 = vsel %vm5632_vm13, %v5628_v46, inf  ;;  %10496 = vst [vmem:[#allocation24_spill] sm:$0xff] %v9952_v48  ;;  %vm5677_vm14 = vcmp.eq.f32.partialorder %v10497_v53, %v9952_v48  ;;  %v5643_v46 = vcvt.s32.f32 %v5641_v30 }
 0x576   : > { %5634 = vmin.xlane.f32.xlu1 %v5633_v9  ;;  %v5678_v60 = vsel %vm5677_vm14, %v5673_v3, inf }
 0x577   : > { %v9956_v34 = vpop.xlane.xlu0 %5600  ;;  %5679 = vmin.xlane.f32.xlu0 %v5678_v60  ;;  %v5656_v60 = vand.u32 65535, %v9615_v43 }
 0x578   : > { %10498 = vst [vmem:[#allocation25_spill] sm:$0xff] %v9956_v34  ;;  %vm5602_vm15 = vcmp.eq.f32.partialorder %v10499_v63, %v9956_v34  ;;  %v9960_v49 = vpop.xlane.xlu1 %5645  ;;  %v5731_v63 = vand.u32 65535, %v9608_v56  ;;  %v10505_v34 = vld [vmem:[#allocation40_spill] sm:$0xff] }
 0x579   : > { %v5603_v0 = vsel %vm5602_vm15, %v5598_v12, inf  ;;  %10500 = vst [vmem:[#allocation27_spill] sm:$0xff] %v9960_v49  ;;  %vm5647_vm0 = vcmp.eq.f32.partialorder %v10501_v50, %v9960_v49  ;;  %v10503_v50 = vld [vmem:[#allocation39_spill] sm:$0xff]  ;;  %v5658_v48 = vcvt.s32.f32 %v5656_v60  ;;  %v5746_v60 = vand.u32 65535, %v9661_v24 }
 0x57a   : > { %5604 = vmin.xlane.f32.xlu1 %v5603_v0  ;;  %v5648_v9 = vsel %vm5647_vm0, %v5643_v46, inf  ;;  %v5688_v0 = vcvt.s32.f32 %v5686_v5  ;;  %v5733_v2 = vcvt.s32.f32 %v5731_v63  ;;  %vm6096_vm0 = vcmask 162904  }
 0x57b   : > { %v9964_v11 = vpop.xlane.xlu0 %5141  ;;  %5649 = vmin.xlane.f32.xlu0 %v5648_v9  ;;  %v5701_v9 = vand.u32 65535, %v10503_v50  ;;  %v10509_v50 = vld [vmem:[#allocation43_spill] sm:$0xff] }
 0x57c   : > { %v9966_v53 = vpop.xlane.xlu1 %5144  ;;  %7978 = vrcp.f32 %v9964_v11  ;;  %v10542_v11 = vld [vmem:[#allocation16_spill] sm:$0xff] }
 0x57f   : > { %v9969_v3 = vpop.xlane.xlu0 %5135 }
 0x580   : > { %v9972_v12 = vpop.xlane.xlu1 %5138 }
 0x583   : > { %v9975_v30 = vpop.xlane.xlu0 %5690 }
 0x584   : > { %10502 = vst [vmem:[#allocation31_spill] sm:$0xff] %v9975_v30  ;;  %vm5692_vm1 = vcmp.eq.f32.partialorder %v9621_v35, %v9975_v30  ;;  %v9980_v49 = vpop.xlane.xlu1 %5735  ;;  %v10514_v30 = vld [vmem:[#allocation49_spill] sm:$0xff] }
 0x585   : > { %v5693_v46 = vsel %vm5692_vm1, %v5688_v0, inf  ;;  %10504 = vst [vmem:[#allocation32_spill] sm:$0xff] %v9980_v49  ;;  %vm5737_vm2 = vcmp.eq.f32.partialorder %v10505_v34, %v9980_v49  ;;  %v5703_v0 = vcvt.s32.f32 %v5701_v9 }
 0x586   : > { %5694 = vmin.xlane.f32.xlu1 %v5693_v46  ;;  %v5738_v43 = vsel %vm5737_vm2, %v5733_v2, inf }
 0x587   : > { %v9984_v56 = vpop.xlane.xlu0 %5660  ;;  %5739 = vmin.xlane.f32.xlu0 %v5738_v43  ;;  %v5716_v43 = vand.u32 65535, %v9679_v19 }
 0x588   : > { %10506 = vst [vmem:[#allocation33_spill] sm:$0xff] %v9984_v56  ;;  %vm5662_vm4 = vcmp.eq.f32.partialorder %v10507_v28, %v9984_v56  ;;  %v9988_v35 = vpop.xlane.xlu1 %5705  ;;  %v5791_v28 = vand.u32 65535, %v9672_v45  ;;  %v10512_v56 = vld [vmem:[#allocation48_spill] sm:$0xff] }
 0x589   : > { %v5663_v5 = vsel %vm5662_vm4, %v5658_v48, inf  ;;  %10508 = vst [vmem:[#allocation35_spill] sm:$0xff] %v9988_v35  ;;  %vm5707_vm5 = vcmp.eq.f32.partialorder %v10509_v50, %v9988_v35  ;;  %v10510_v50 = vld [vmem:[#allocation47_spill] sm:$0xff]  ;;  %v5718_v49 = vcvt.s32.f32 %v5716_v43  ;;  %v10517_v43 = vld [vmem:[#allocation54_spill] sm:$0xff] }
 0x58a   : > { %5664 = vmin.xlane.f32.xlu1 %v5663_v5  ;;  %v5708_v46 = vsel %vm5707_vm5, %v5703_v0, inf  ;;  %v5748_v5 = vcvt.s32.f32 %v5746_v60  ;;  %v5793_v24 = vcvt.s32.f32 %v5791_v28 }
 0x58b   : > { %v9992_v63 = vpop.xlane.xlu0 %5153  ;;  %5709 = vmin.xlane.f32.xlu0 %v5708_v46  ;;  %v5761_v46 = vand.u32 65535, %v10510_v50  ;;  %v10516_v50 = vld [vmem:[#allocation51_spill] sm:$0xff] }
 0x58c   : > { %v9994_v34 = vpop.xlane.xlu1 %5156 }
 0x58f   : > { %v9997_v2 = vpop.xlane.xlu0 %5147 }
 0x590   : > { %v10000_v48 = vpop.xlane.xlu1 %5150 }
 0x593   : > { %v10003_v9 = vpop.xlane.xlu0 %5750 }
 0x594   : > { %vm5752_vm6 = vcmp.eq.f32.partialorder %v9685_v55, %v10003_v9  ;;  %v10008_v35 = vpop.xlane.xlu1 %5795 }
 0x595   : > { %v5753_v0 = vsel %vm5752_vm6, %v5748_v5, inf  ;;  %10511 = vst [vmem:[#allocation39_spill] sm:$0xff] %v10008_v35  ;;  %vm5797_vm7 = vcmp.eq.f32.partialorder %v10512_v56, %v10008_v35  ;;  %v5763_v5 = vcvt.s32.f32 %v5761_v46 }
 0x596   : > { %5754 = vmin.xlane.f32.xlu1 %v5753_v0  ;;  %v5798_v19 = vsel %vm5797_vm7, %v5793_v24, inf  ;;  %v5806_v24 = vand.u32 65535, %v10517_v43 }
 0x597   : > { %v10012_v45 = vpop.xlane.xlu0 %5720  ;;  %5799 = vmin.xlane.f32.xlu0 %v5798_v19 }
 0x598   : > { %10513 = vst [vmem:[#allocation40_spill] sm:$0xff] %v10012_v45  ;;  %vm5722_vm8 = vcmp.eq.f32.partialorder %v10514_v30, %v10012_v45  ;;  %v10016_v55 = vpop.xlane.xlu1 %5765  ;;  %v5851_v30 = vand.u32 65535, %v9736_v14  ;;  %v5808_v46 = vcvt.s32.f32 %v5806_v24 }
 0x599   : > { %v5723_v60 = vsel %vm5722_vm8, %v5718_v49, inf  ;;  %10515 = vst [vmem:[#allocation41_spill] sm:$0xff] %v10016_v55  ;;  %vm5767_vm9 = vcmp.eq.f32.partialorder %v10516_v50, %v10016_v55  ;;  %v5821_v50 = vand.u32 65535, %v9754_v32 }
 0x59a   : > { %5724 = vmin.xlane.f32.xlu1 %v5723_v60  ;;  %v5768_v0 = vsel %vm5767_vm9, %v5763_v5, inf  ;;  %v5776_v60 = vand.u32 65535, %v9743_v29  ;;  %v5853_v43 = vcvt.s32.f32 %v5851_v30 }
 0x59b   : > { %v10020_v28 = vpop.xlane.xlu0 %5165  ;;  %5769 = vmin.xlane.f32.xlu0 %v5768_v0  ;;  %v5823_v32 = vcvt.s32.f32 %v5821_v50 }
 0x59c   : > { %v10022_v56 = vpop.xlane.xlu1 %5168  ;;  %v5778_v55 = vcvt.s32.f32 %v5776_v60  ;;  %v5866_v60 = vand.u32 65535, %v9784_v1 }
 0x59f   : > { %v10025_v35 = vpop.xlane.xlu0 %5159 }
 0x5a0   : > { %v10028_v49 = vpop.xlane.xlu1 %5162 }
 0x5a3   : > { %v10030_v19 = vpop.xlane.xlu0 %5810 }
 0x5a4   : > { %vm5812_vm10 = vcmp.eq.f32.partialorder %v9750_v16, %v10030_v19  ;;  %v10036_v0 = vpop.xlane.xlu1 %5855 }
 0x5a5   : > { %v5813_v5 = vsel %vm5812_vm10, %v5808_v46, inf  ;;  %10518 = vst [vmem:[#allocation43_spill] sm:$0xff] %v10036_v0  ;;  %vm5857_vm11 = vcmp.eq.f32.partialorder %v9759_v40, %v10036_v0 }
 0x5a6   : > { %5814 = vmin.xlane.f32.xlu1 %v5813_v5  ;;  %v5858_v45 = vsel %vm5857_vm11, %v5853_v43, inf  ;;  %v5836_v5 = vand.u32 65535, %v9795_v20 }
 0x5a7   : > { %v10040_v14 = vpop.xlane.xlu0 %5780  ;;  %5859 = vmin.xlane.f32.xlu0 %v5858_v45 }
 0x5a8   : > { %10519 = vst [vmem:[#allocation47_spill] sm:$0xff] %v10040_v14  ;;  %vm5782_vm12 = vcmp.eq.f32.partialorder %v9764_v39, %v10040_v14  ;;  %v10044_v16 = vpop.xlane.xlu1 %5825 }
 0x5a9   : > { %v5783_v29 = vsel %vm5782_vm12, %v5778_v55, inf  ;;  %10520 = vst [vmem:[#allocation48_spill] sm:$0xff] %v10044_v16  ;;  %vm5827_vm13 = vcmp.eq.f32.partialorder %v9772_v18, %v10044_v16  ;;  %v5868_v55 = vcvt.s32.f32 %v5866_v60  ;;  %v5352_v60 = vcvt.f32.s32 %v9826_v59  ;;  %v10526_v16 = vld [vmem:[#allocation8_spill] sm:$0xff] }
 0x5aa   : > { %5784 = vmin.xlane.f32.xlu1 %v5783_v29  ;;  %v5828_v30 = vsel %vm5827_vm13, %v5823_v32, inf  ;;  %v5838_v29 = vcvt.s32.f32 %v5836_v5  ;;  %v5442_v5 = vcvt.f32.s32 %v9837_v17  ;;  %v5367_v17 = vcvt.f32.s32 %v9844_v42 }
 0x5ab   : > { %v10048_v24 = vpop.xlane.xlu0 %5177  ;;  %5829 = vmin.xlane.f32.xlu0 %v5828_v30 }
 0x5ac   : > { %v10050_v40 = vpop.xlane.xlu1 %5180  ;;  %v5443_v36 = vshll.u32 %v5442_v5, 16 }
 0x5af   : > { %v10052_v46 = vpop.xlane.xlu0 %5171 }
 0x5b0   : > { %v10055_v39 = vpop.xlane.xlu1 %5174 }
 0x5b3   : > { %v10057_v45 = vpop.xlane.xlu0 %5870 }
 0x5b4   : > { %10521 = vst [vmem:[#allocation49_spill] sm:$0xff] %v10057_v45  ;;  %vm5872_vm14 = vcmp.eq.f32.partialorder %v9799_v58, %v10057_v45  ;;  %v10062_v50 = vpop.xlane.xlu1 %5192  ;;  %v5382_v58 = vcvt.f32.s32 %v9815_v31  ;;  %v5353_v31 = vshll.u32 %v5352_v60, 16 }
 0x5b5   : > { %v5873_v18 = vsel %vm5872_vm14, %v5868_v55, inf  ;;  %10522 = vst [vmem:[#allocation51_spill] sm:$0xff] %v10062_v50 }
 0x5b6   : > { %5874 = vmin.xlane.f32.xlu1 %v5873_v18  ;;  %v5383_v27 = vshll.u32 %v5382_v58, 16  ;;  %v5397_v18 = vcvt.f32.s32 %v9834_v21  ;;  %v5412_v21 = vcvt.f32.s32 %v9848_v33 }
 0x5b7   : > { %v10064_v43 = vpop.xlane.xlu0 %5840 }
 0x5b8   : > { %10523 = vst [vmem:[#allocation54_spill] sm:$0xff] %v10064_v43  ;;  %vm5842_vm15 = vcmp.eq.f32.partialorder %v9808_v4, %v10064_v43  ;;  %v10069_v32 = vpop.xlane.xlu1 %5186  ;;  %v5398_v58 = vshll.u32 %v5397_v18, 16  ;;  %v5413_v42 = vshll.u32 %v5412_v21, 16 }
 0x5b9   : > { %v5843_v1 = vsel %vm5842_vm15, %v5838_v29, inf  ;;  %10524 = vst [vmem:[#allocation64_spill] sm:$0xff] %v10069_v32 }
 0x5ba   : > { %5844 = vmin.xlane.f32.xlu1 %v5843_v1  ;;  %v7949_v1 = vpop.eup %7948  ;;  %7980 = vrcp.f32 %v9944_v51 }
 0x5bb   : > { %v10072_v20 = vpop.xlane.xlu0 %5189  ;;  %v7951_v43 = vpop.eup %7950  ;;  %v5230_v26 = vmul.f32 %v7949_v1, %v10526_v16  ;;  %7982 = vrcp.f32 %v9969_v3 }
 0x5bc   : > { %v5380_v30 = vpop.xlane.xlu1 %5379  ;;  %v7953_v32 = vpop.eup %7952  ;;  %7984 = vrcp.f32 %v9966_v53 }
 0x5bd   : > { %v5381_v4 = vcvt.f32.s32 %v5380_v30  ;;  %v7955_v0 = vpop.eup %7954  ;;  %7986 = vrcp.f32 %v9992_v63  ;;  %v10550_v63 = vld [vmem:[#allocation24_spill] sm:$0xff] }
 0x5bf   : > { %v10078_v55 = vpop.xlane.xlu0 %5183  ;;  %v5384_v52 = vadd.s32 %v5383_v27, %v5381_v4 }
 0x5c0   : > { %10525 = vst [vmem:[#allocation65_spill] sm:$0xff] %v10078_v55  ;;  %v5350_v29 = vpop.xlane.xlu1 %5349 }
 0x5c1   : > { %v5351_v22 = vcvt.f32.s32 %v5350_v29  ;;  %v5882_v50 = vcvt.s32.f32 %v5384_v52  ;;  %v10527_v29 = vld [vmem:[#allocation6_spill] sm:$0xff] }
 0x5c2   : > { %v5232_v14 = vmul.f32 %v7951_v43, %v10527_v29 }
 0x5c3   : > { %v5354_v30 = vadd.s32 %v5353_v31, %v5351_v22  ;;  %v10528_v22 = vld [vmem:[#allocation10_spill] sm:$0xff] }
 0x5c4   : > { %v5440_v59 = vpop.xlane.xlu0 %5439  ;;  %v5395_v57 = vpop.xlane.xlu1 %5394  ;;  %v5236_v18 = vmul.f32 %v7953_v32, %v10528_v22  ;;  %v5918_v16 = vsel %vm4869_vm3, %v5232_v14, %v5882_v50  ;;  %v10529_v32 = vld [vmem:[#allocation7_spill] sm:$0xff]  ;;  %v5427_v22 = vcvt.f32.s32 %v9872_v38 }
 0x5c5   : > { %v5441_v45 = vcvt.f32.s32 %v5440_v59  ;;  %v5880_v4 = vcvt.s32.f32 %v5354_v30  ;;  %v5396_v27 = vcvt.f32.s32 %v5395_v57  ;;  %v5368_v59 = vshll.u32 %v5367_v17, 16  ;;  %v7957_v30 = vpop.eup %7956 }
 0x5c6   : > { %v7959_v17 = vpop.eup %7958  ;;  %7988 = vrcp.f32 %v9972_v12 }
 0x5c7   : > { %v5444_v60 = vadd.s32 %v5443_v36, %v5441_v45  ;;  %v5399_v55 = vadd.s32 %v5398_v58, %v5396_v27  ;;  %v5916_v31 = vsel %vm4869_vm3, %v5230_v26, %v5880_v4  ;;  %v5233_v58 = vmul.f32 %v7955_v0, %v10529_v32  ;;  %v10531_v0 = vld [vmem:[#allocation9_spill] sm:$0xff] }
 0x5c8   : > { %v5365_v33 = vpop.xlane.xlu1 %5364  ;;  %5988 = vrot.lane.b32.xlu0 %v5916_v31, %s8046_s16  ;;  %v5410_v45 = vpop.xlane.xlu0 %5409  ;;  %v5457_v27 = vcvt.f32.s32 %v9863_v23  ;;  %7990 = vrcp.f32 %v9997_v2 }
 0x5c9   : > { %v5886_v5 = vcvt.s32.f32 %v5444_v60  ;;  %v5883_v52 = vcvt.s32.f32 %v5399_v55  ;;  %v5366_v43 = vcvt.f32.s32 %v5365_v33  ;;  %v5411_v1 = vcvt.f32.s32 %v5410_v45  ;;  %v10530_v55 = vld [vmem:[#allocation13_spill] sm:$0xff] }
 0x5ca   : > { %v5234_v4 = vmul.f32 %v7957_v30, %v10530_v55  ;;  %v5231_v60 = vmul.f32 %v7959_v17, %v10531_v0  ;;  %v5458_v31 = vshll.u32 %v5457_v27, 16  ;;  %v5503_v33 = vshll.u32 %v5502_v25, 16 }
 0x5cb   : > { %5992 = vrot.lane.b32.xlu1 %v5918_v16, %s8046_s16  ;;  %v5922_v36 = vsel %vm4869_vm3, %v5236_v18, %v5886_v5  ;;  %v5369_v21 = vadd.s32 %v5368_v59, %v5366_v43  ;;  %v5414_v10 = vadd.s32 %v5413_v42, %v5411_v1  ;;  %v5919_v57 = vsel %vm4869_vm3, %v5233_v58, %v5883_v52  ;;  %v7961_v5 = vpop.eup %7960 }
 0x5cc   : > { %6000 = vrot.lane.b32.xlu0 %v5922_v36, %s8046_s16  ;;  %v5472_v18 = vcvt.f32.s32 %v9876_v54  ;;  %v7963_v16 = vpop.eup %7962  ;;  %v5428_v52 = vshll.u32 %v5427_v22, 16  ;;  %v5237_v36 = vmul.f32 %v7961_v5, %v10532_v7  ;;  %v10537_v7 = vld [vmem:[#allocation20_spill] sm:$0xff]  ;;  %7992 = vrcp.f32 %v9994_v34 }
 0x5cd   : > { %v5881_v14 = vcvt.s32.f32 %v5369_v21  ;;  %v5884_v50 = vcvt.s32.f32 %v5414_v10  ;;  %v7965_v30 = vpop.eup %7964  ;;  %7994 = vrcp.f32 %v10020_v28  ;;  %v10558_v28 = vld [vmem:[#allocation32_spill] sm:$0xff] }
 0x5ce   : > { %v5473_v58 = vshll.u32 %v5472_v18, 16  ;;  %7996 = vrcp.f32 %v10000_v48 }
 0x5cf   : > { %5994 = vrot.lane.b32.xlu1 %v5919_v57, %s8046_s16  ;;  %v5920_v26 = vsel %vm4869_vm3, %v5234_v4, %v5884_v50  ;;  %v5917_v15 = vsel %vm4869_vm3, %v5231_v60, %v5881_v14  ;;  %v10533_v57 = vld [vmem:[#allocation18_spill] sm:$0xff]  ;;  %v7967_v50 = vpop.eup %7966  ;;  %7998 = vrcp.f32 %v10025_v35 }
 0x5d0   : > { %5996 = vrot.lane.b32.xlu0 %v5920_v26, %s8046_s16  ;;  %v5240_v14 = vmul.f32 %v7963_v16, %v10533_v57  ;;  %v10534_v4 = vld [vmem:[#allocation14_spill] sm:$0xff]  ;;  %v7969_v18 = vpop.eup %7968  ;;  %8000 = vrcp.f32 %v10022_v56 }
 0x5d1   : > { %v5235_v27 = vmul.f32 %v7965_v30, %v10534_v4 }
 0x5d3   : > { %v5455_v29 = vpop.xlane.xlu1 %5454  ;;  %5990 = vrot.lane.b32.xlu1 %v5917_v15, %s8046_s16  ;;  %v10535_v15 = vld [vmem:[#allocation21_spill] sm:$0xff] }
 0x5d4   : > { %v5456_v23 = vcvt.f32.s32 %v5455_v29  ;;  %v5500_v42 = vpop.xlane.xlu0 %5499  ;;  %v5238_v25 = vmul.f32 %v7967_v50, %v10535_v15  ;;  %v5517_v29 = vcvt.f32.s32 %v9891_v37  ;;  %v10539_v50 = vld [vmem:[#allocation22_spill] sm:$0xff] }
 0x5d5   : > { %v5501_v62 = vcvt.f32.s32 %v5500_v42 }
 0x5d6   : > { %v5459_v59 = vadd.s32 %v5458_v31, %v5456_v23  ;;  %v5518_v22 = vshll.u32 %v5517_v29, 16  ;;  %v5487_v23 = vcvt.f32.s32 %v9900_v44  ;;  %v5622_v29 = vcvt.f32.s32 %v10542_v11 }
 0x5d7   : > { %v5425_v45 = vpop.xlane.xlu1 %5424  ;;  %v5504_v32 = vadd.s32 %v5503_v33, %v5501_v62 }
 0x5d8   : > { %v5887_v43 = vcvt.s32.f32 %v5459_v59  ;;  %v5426_v1 = vcvt.f32.s32 %v5425_v45  ;;  %v5470_v21 = vpop.xlane.xlu0 %5469  ;;  %v10536_v59 = vld [vmem:[#allocation11_spill] sm:$0xff]  ;;  %v5563_v45 = vshll.u32 %v5562_v13, 16 }
 0x5d9   : > { %v5890_v54 = vcvt.s32.f32 %v5504_v32  ;;  %v5471_v10 = vcvt.f32.s32 %v5470_v21  ;;  %v5532_v42 = vcvt.f32.s32 %v10536_v59 }
 0x5da   : > { %v5429_v17 = vadd.s32 %v5428_v52, %v5426_v1  ;;  %v5923_v38 = vsel %vm4869_vm3, %v5237_v36, %v5887_v43  ;;  %v7971_v52 = vpop.eup %7970  ;;  %v5488_v43 = vshll.u32 %v5487_v23, 16  ;;  %v5241_v36 = vmul.f32 %v7969_v18, %v10537_v7 }
 0x5db   : > { %6002 = vrot.lane.b32.xlu1 %v5923_v38, %s8046_s16  ;;  %v5474_v0 = vadd.s32 %v5473_v58, %v5471_v10  ;;  %v5926_v60 = vsel %vm4869_vm3, %v5240_v14, %v5890_v54  ;;  %v7973_v41 = vpop.eup %7972  ;;  %v5533_v32 = vshll.u32 %v5532_v42, 16  ;;  %v10538_v54 = vld [vmem:[#allocation26_spill] sm:$0xff]  ;;  %8002 = vrcp.f32 %v10048_v24  ;;  %v10565_v24 = vld [vmem:[#allocation39_spill] sm:$0xff] }
 0x5dc   : > { %v5885_v55 = vcvt.s32.f32 %v5429_v17  ;;  %6008 = vrot.lane.b32.xlu0 %v5926_v60, %s8046_s16  ;;  %v5244_v10 = vmul.f32 %v7971_v52, %v10538_v54  ;;  %v7975_v57 = vpop.eup %7974  ;;  %v10540_v60 = vld [vmem:[#allocation29_spill] sm:$0xff]  ;;  %8004 = vrcp.f32 %v10028_v49 }
 0x5dd   : > { %v5888_v47 = vcvt.s32.f32 %v5474_v0  ;;  %v7977_v23 = vpop.eup %7976  ;;  %8006 = vrcp.f32 %v10052_v46 }
 0x5de   : > { %v5921_v26 = vsel %vm4869_vm3, %v5235_v27, %v5885_v55  ;;  %v5239_v55 = vmul.f32 %v7973_v41, %v10539_v50  ;;  %8008 = vrcp.f32 %v10050_v40 }
 0x5df   : > { %5998 = vrot.lane.b32.xlu1 %v5921_v26, %s8046_s16  ;;  %v5924_v5 = vsel %vm4869_vm3, %v5238_v25, %v5888_v47  ;;  %v5242_v26 = vmul.f32 %v7975_v57, %v10540_v60  ;;  %v10541_v47 = vld [vmem:[#allocation15_spill] sm:$0xff] }
 0x5e0   : > { %6004 = vrot.lane.b32.xlu0 %v5924_v5, %s8046_s16  ;;  %v5577_v15 = vcvt.f32.s32 %v10541_v47 }
 0x5e2   : > { %v5578_v13 = vshll.u32 %v5577_v15, 16 }
 0x5e3   : > { %v5515_v31 = vpop.xlane.xlu1 %5514 }
 0x5e4   : > { %v5516_v61 = vcvt.f32.s32 %v5515_v31  ;;  %v5560_v62 = vpop.xlane.xlu0 %5559  ;;  %v10543_v31 = vld [vmem:[#allocation17_spill] sm:$0xff] }
 0x5e5   : > { %v5561_v37 = vcvt.f32.s32 %v5560_v62 }
 0x5e6   : > { %v5519_v33 = vadd.s32 %v5518_v22, %v5516_v61  ;;  %v5547_v22 = vcvt.f32.s32 %v10543_v31  ;;  %v10544_v61 = vld [vmem:[#allocation19_spill] sm:$0xff] }
 0x5e7   : > { %v5485_v16 = vpop.xlane.xlu1 %5484  ;;  %v5564_v30 = vadd.s32 %v5563_v45, %v5561_v37  ;;  %v5592_v18 = vcvt.f32.s32 %v10544_v61  ;;  %v7979_v37 = vpop.eup %7978  ;;  %8010 = vrcp.f32 %v10072_v20  ;;  %v10573_v20 = vld [vmem:[#allocation43_spill] sm:$0xff] }
 0x5e8   : > { %v5891_v8 = vcvt.s32.f32 %v5519_v33  ;;  %v5486_v1 = vcvt.f32.s32 %v5485_v16  ;;  %v5530_v44 = vpop.xlane.xlu0 %5529  ;;  %v5623_v33 = vshll.u32 %v5622_v29, 16  ;;  %v5548_v16 = vshll.u32 %v5547_v22, 16 }
 0x5e9   : > { %v5894_v21 = vcvt.s32.f32 %v5564_v30  ;;  %v5531_v38 = vcvt.f32.s32 %v5530_v44 }
 0x5ea   : > { %v5489_v58 = vadd.s32 %v5488_v43, %v5486_v1  ;;  %v5927_v17 = vsel %vm4869_vm3, %v5241_v36, %v5891_v8  ;;  %v10545_v43 = vld [vmem:[#allocation28_spill] sm:$0xff]  ;;  %v7981_v1 = vpop.eup %7980  ;;  %v5593_v36 = vshll.u32 %v5592_v18, 16  ;;  %8012 = vrcp.f32 %v10055_v39 }
 0x5eb   : > { %6010 = vrot.lane.b32.xlu1 %v5927_v17, %s8046_s16  ;;  %v5534_v4 = vadd.s32 %v5533_v32, %v5531_v38  ;;  %v5930_v27 = vsel %vm4869_vm3, %v5244_v10, %v5894_v21  ;;  %v5245_v8 = vmul.f32 %v7977_v23, %v10545_v43  ;;  %v10546_v17 = vld [vmem:[#allocation34_spill] sm:$0xff]  ;;  %v7983_v38 = vpop.eup %7982 }
 0x5ec   : > { %v5889_v14 = vcvt.s32.f32 %v5489_v58  ;;  %6016 = vrot.lane.b32.xlu0 %v5930_v27, %s8046_s16  ;;  %v5248_v21 = vmul.f32 %v7979_v37, %v10546_v17  ;;  %v10547_v10 = vld [vmem:[#allocation30_spill] sm:$0xff]  ;;  %v7985_v29 = vpop.eup %7984 }
 0x5ed   : > { %v5892_v6 = vcvt.s32.f32 %v5534_v4  ;;  %v5243_v57 = vmul.f32 %v7981_v1, %v10547_v10  ;;  %v10548_v4 = vld [vmem:[#allocation37_spill] sm:$0xff]  ;;  %v7987_v18 = vpop.eup %7986  ;;  %v10557_v10 = vld [vmem:[#allocation31_spill] sm:$0xff] }
 0x5ee   : > { %v5925_v0 = vsel %vm4869_vm3, %v5239_v55, %v5889_v14  ;;  %v5246_v27 = vmul.f32 %v7983_v38, %v10548_v4  ;;  %v10556_v38 = vld [vmem:[#allocation45_spill] sm:$0xff] }
 0x5ef   : > { %6006 = vrot.lane.b32.xlu1 %v5925_v0, %s8046_s16  ;;  %v5928_v25 = vsel %vm4869_vm3, %v5242_v26, %v5892_v6  ;;  %v10549_v0 = vld [vmem:[#allocation23_spill] sm:$0xff]  ;;  %v5682_v26 = vcvt.f32.s32 %v10550_v63  ;;  %v10559_v4 = vld [vmem:[#allocation33_spill] sm:$0xff] }
 0x5f0   : > { %6012 = vrot.lane.b32.xlu0 %v5928_v25, %s8046_s16  ;;  %v5637_v6 = vcvt.f32.s32 %v10549_v0  ;;  %v10551_v25 = vld [vmem:[#allocation25_spill] sm:$0xff] }
 0x5f1   : > { %v5607_v11 = vcvt.f32.s32 %v10551_v25 }
 0x5f2   : > { %v5638_v15 = vshll.u32 %v5637_v6, 16  ;;  %v10560_v6 = vld [vmem:[#allocation35_spill] sm:$0xff] }
 0x5f3   : > { %v5575_v5 = vpop.xlane.xlu1 %5574 }
 0x5f4   : > { %v5576_v51 = vcvt.f32.s32 %v5575_v5  ;;  %v5620_v42 = vpop.xlane.xlu0 %5619  ;;  %v10552_v5 = vld [vmem:[#allocation27_spill] sm:$0xff] }
 0x5f5   : > { %v5621_v62 = vcvt.f32.s32 %v5620_v42 }
 0x5f6   : > { %v5579_v59 = vadd.s32 %v5578_v13, %v5576_v51  ;;  %v5652_v13 = vcvt.f32.s32 %v10552_v5  ;;  %v5683_v51 = vshll.u32 %v5682_v26, 16  ;;  %v10561_v5 = vld [vmem:[#allocation44_spill] sm:$0xff] }
 0x5f7   : > { %v5545_v45 = vpop.xlane.xlu1 %5544  ;;  %v5624_v7 = vadd.s32 %v5623_v33, %v5621_v62  ;;  %v10553_v33 = vld [vmem:[#allocation36_spill] sm:$0xff] }
 0x5f8   : > { %v5895_v3 = vcvt.s32.f32 %v5579_v59  ;;  %v5546_v52 = vcvt.f32.s32 %v5545_v45  ;;  %v5590_v30 = vpop.xlane.xlu0 %5589  ;;  %v5608_v59 = vshll.u32 %v5607_v11, 16  ;;  %v5249_v62 = vmul.f32 %v7985_v29, %v10553_v33  ;;  %v7989_v45 = vpop.eup %7988 }
 0x5f9   : > { %v5898_v58 = vcvt.s32.f32 %v5624_v7  ;;  %v5591_v44 = vcvt.f32.s32 %v5590_v30  ;;  %v10554_v7 = vld [vmem:[#allocation42_spill] sm:$0xff] }
 0x5fa   : > { %v5549_v41 = vadd.s32 %v5548_v16, %v5546_v52  ;;  %v5931_v32 = vsel %vm4869_vm3, %v5245_v8, %v5895_v3  ;;  %v5653_v16 = vshll.u32 %v5652_v13, 16 }
 0x5fb   : > { %6018 = vrot.lane.b32.xlu1 %v5931_v32, %s8046_s16  ;;  %v5594_v14 = vadd.s32 %v5593_v36, %v5591_v44  ;;  %v5934_v50 = vsel %vm4869_vm3, %v5248_v21, %v5898_v58  ;;  %v5252_v36 = vmul.f32 %v7987_v18, %v10554_v7  ;;  %v10555_v32 = vld [vmem:[#allocation38_spill] sm:$0xff]  ;;  %v5757_v7 = vcvt.f32.s32 %v10003_v9 }
 0x5fc   : > { %v5893_v54 = vcvt.s32.f32 %v5549_v41  ;;  %6024 = vrot.lane.b32.xlu0 %v5934_v50, %s8046_s16  ;;  %v7991_v41 = vpop.eup %7990  ;;  %v5247_v58 = vmul.f32 %v7989_v45, %v10555_v32  ;;  %v5742_v50 = vcvt.f32.s32 %v10558_v28 }
 0x5fd   : > { %v5896_v53 = vcvt.s32.f32 %v5594_v14  ;;  %v7993_v0 = vpop.eup %7992  ;;  %v5758_v32 = vshll.u32 %v5757_v7, 16 }
 0x5fe   : > { %v5929_v55 = vsel %vm4869_vm3, %v5243_v57, %v5893_v54  ;;  %v5250_v54 = vmul.f32 %v7991_v41, %v10556_v38  ;;  %v5697_v57 = vcvt.f32.s32 %v10557_v10  ;;  %v7995_v11 = vpop.eup %7994  ;;  %v5253_v13 = vmul.f32 %v7993_v0, %v10561_v5 }
 0x5ff   : > { %6014 = vrot.lane.b32.xlu1 %v5929_v55, %s8046_s16  ;;  %v5932_v60 = vsel %vm4869_vm3, %v5246_v27, %v5896_v53  ;;  %v5667_v27 = vcvt.f32.s32 %v10559_v4  ;;  %v5802_v41 = vcvt.f32.s32 %v10565_v24 }
 0x600   : > { %6020 = vrot.lane.b32.xlu0 %v5932_v60, %s8046_s16  ;;  %v5698_v53 = vshll.u32 %v5697_v57, 16  ;;  %v5712_v60 = vcvt.f32.s32 %v10560_v6 }
 0x601   : > { %v5803_v10 = vshll.u32 %v5802_v41, 16 }
 0x603   : > { %v5635_v47 = vpop.xlane.xlu1 %5634 }
 0x604   : > { %v5636_v12 = vcvt.f32.s32 %v5635_v47  ;;  %v5680_v22 = vpop.xlane.xlu0 %5679  ;;  %v5743_v47 = vshll.u32 %v5742_v50, 16 }
 0x605   : > { %v5681_v23 = vcvt.f32.s32 %v5680_v22 }
 0x606   : > { %v5639_v31 = vadd.s32 %v5638_v15, %v5636_v12  ;;  %v5668_v12 = vshll.u32 %v5667_v27, 16 }
 0x607   : > { %v5605_v61 = vpop.xlane.xlu1 %5604  ;;  %v5684_v37 = vadd.s32 %v5683_v51, %v5681_v23  ;;  %v5713_v51 = vshll.u32 %v5712_v60, 16 }
 0x608   : > { %v5899_v2 = vcvt.s32.f32 %v5639_v31  ;;  %v5606_v42 = vcvt.f32.s32 %v5605_v61  ;;  %v5650_v52 = vpop.xlane.xlu0 %5649  ;;  %v7997_v31 = vpop.eup %7996 }
 0x609   : > { %v5902_v8 = vcvt.s32.f32 %v5684_v37  ;;  %v5651_v1 = vcvt.f32.s32 %v5650_v52  ;;  %v10563_v37 = vld [vmem:[#allocation46_spill] sm:$0xff] }
 0x60a   : > { %v5609_v3 = vadd.s32 %v5608_v59, %v5606_v42  ;;  %v5935_v43 = vsel %vm4869_vm3, %v5249_v62, %v5899_v2  ;;  %v10562_v42 = vld [vmem:[#allocation50_spill] sm:$0xff]  ;;  %v7999_v62 = vpop.eup %7998 }
 0x60b   : > { %6026 = vrot.lane.b32.xlu1 %v5935_v43, %s8046_s16  ;;  %v5654_v44 = vadd.s32 %v5653_v16, %v5651_v1  ;;  %v5938_v17 = vsel %vm4869_vm3, %v5252_v36, %v5902_v8  ;;  %v5256_v33 = vmul.f32 %v7995_v11, %v10562_v42  ;;  %v5251_v16 = vmul.f32 %v7997_v31, %v10563_v37  ;;  %v10564_v8 = vld [vmem:[#allocation53_spill] sm:$0xff]  ;;  %v10571_v31 = vld [vmem:[#allocation58_spill] sm:$0xff]  ;;  %v10574_v42 = vld [vmem:[#allocation47_spill] sm:$0xff] }
 0x60c   : > { %v5897_v30 = vcvt.s32.f32 %v5609_v3  ;;  %6032 = vrot.lane.b32.xlu0 %v5938_v17, %s8046_s16  ;;  %v5254_v1 = vmul.f32 %v7999_v62, %v10564_v8  ;;  %v8001_v17 = vpop.eup %8000 }
 0x60d   : > { %v5900_v34 = vcvt.s32.f32 %v5654_v44 }
 0x60e   : > { %v5933_v21 = vsel %vm4869_vm3, %v5247_v58, %v5897_v30  ;;  %v10566_v58 = vld [vmem:[#allocation40_spill] sm:$0xff] }
 0x60f   : > { %6022 = vrot.lane.b32.xlu1 %v5933_v21, %s8046_s16  ;;  %v5936_v14 = vsel %vm4869_vm3, %v5250_v54, %v5900_v34  ;;  %v5727_v44 = vcvt.f32.s32 %v10566_v58  ;;  %v10567_v21 = vld [vmem:[#allocation41_spill] sm:$0xff] }
 0x610   : > { %6028 = vrot.lane.b32.xlu0 %v5936_v14, %s8046_s16  ;;  %v5772_v34 = vcvt.f32.s32 %v10567_v21  ;;  %v8003_v14 = vpop.eup %8002 }
 0x611   : > { %v5728_v28 = vshll.u32 %v5727_v44, 16  ;;  %v8005_v4 = vpop.eup %8004 }
 0x613   : > { %v5695_v55 = vpop.xlane.xlu1 %5694 }
 0x614   : > { %v5696_v48 = vcvt.f32.s32 %v5695_v55  ;;  %v5740_v26 = vpop.xlane.xlu0 %5739  ;;  %v10568_v55 = vld [vmem:[#allocation52_spill] sm:$0xff] }
 0x615   : > { %v5741_v15 = vcvt.f32.s32 %v5740_v26 }
 0x616   : > { %v5699_v63 = vadd.s32 %v5698_v53, %v5696_v48  ;;  %v5257_v53 = vmul.f32 %v8001_v17, %v10568_v55  ;;  %v5773_v48 = vshll.u32 %v5772_v34, 16  ;;  %v10577_v17 = vld [vmem:[#allocation51_spill] sm:$0xff] }
 0x617   : > { %v5665_v25 = vpop.xlane.xlu1 %5664  ;;  %v5744_v22 = vadd.s32 %v5743_v47, %v5741_v15  ;;  %v10569_v47 = vld [vmem:[#allocation56_spill] sm:$0xff] }
 0x618   : > { %v5903_v35 = vcvt.s32.f32 %v5699_v63  ;;  %v5666_v29 = vcvt.f32.s32 %v5665_v25  ;;  %v5710_v61 = vpop.xlane.xlu0 %5709  ;;  %v5260_v15 = vmul.f32 %v8003_v14, %v10569_v47  ;;  %v8007_v25 = vpop.eup %8006 }
 0x619   : > { %v5906_v59 = vcvt.s32.f32 %v5744_v22  ;;  %v5711_v2 = vcvt.f32.s32 %v5710_v61  ;;  %v5258_v22 = vmul.f32 %v8007_v25, %v10571_v31  ;;  %v10572_v61 = vld [vmem:[#allocation65_spill] sm:$0xff]  ;;  %v8009_v62 = vpop.eup %8008 }
 0x61a   : > { %v5669_v23 = vadd.s32 %v5668_v12, %v5666_v29  ;;  %v5939_v18 = vsel %vm4869_vm3, %v5253_v13, %v5903_v35  ;;  %v10570_v12 = vld [vmem:[#allocation55_spill] sm:$0xff]  ;;  %8014 = vrcp.f32 %v10572_v61 }
 0x61b   : > { %6034 = vrot.lane.b32.xlu1 %v5939_v18, %s8046_s16  ;;  %v5714_v3 = vadd.s32 %v5713_v51, %v5711_v2  ;;  %v5942_v52 = vsel %vm4869_vm3, %v5256_v33, %v5906_v59  ;;  %v5255_v35 = vmul.f32 %v8005_v4, %v10570_v12  ;;  %v5817_v51 = vcvt.f32.s32 %v10030_v19 }
 0x61c   : > { %v5901_v45 = vcvt.s32.f32 %v5669_v23  ;;  %6040 = vrot.lane.b32.xlu0 %v5942_v52, %s8046_s16  ;;  %v5862_v18 = vcvt.f32.s32 %v10573_v20  ;;  %v5787_v33 = vcvt.f32.s32 %v10574_v42  ;;  %8016 = vrcp.f32 %v10577_v17 }
 0x61d   : > { %v5904_v56 = vcvt.s32.f32 %v5714_v3  ;;  %v5818_v2 = vshll.u32 %v5817_v51, 16 }
 0x61e   : > { %v5937_v43 = vsel %vm4869_vm3, %v5251_v16, %v5901_v45  ;;  %v10575_v45 = vld [vmem:[#allocation48_spill] sm:$0xff]  ;;  %v5863_v52 = vshll.u32 %v5862_v18, 16  ;;  %v5788_v8 = vshll.u32 %v5787_v33, 16 }
 0x61f   : > { %6030 = vrot.lane.b32.xlu1 %v5937_v43, %s8046_s16  ;;  %v5940_v36 = vsel %vm4869_vm3, %v5254_v1, %v5904_v56  ;;  %v5832_v37 = vcvt.f32.s32 %v10575_v45  ;;  %v8011_v56 = vpop.eup %8010 }
 0x620   : > { %6036 = vrot.lane.b32.xlu0 %v5940_v36, %s8046_s16  ;;  %v10576_v36 = vld [vmem:[#allocation57_spill] sm:$0xff]  ;;  %v8013_v41 = vpop.eup %8012 }
 0x621   : > { %v5261_v24 = vmul.f32 %v8009_v62, %v10576_v36 }
 0x623   : > { %v5755_v30 = vpop.xlane.xlu1 %5754 }
 0x624   : > { %v5756_v49 = vcvt.f32.s32 %v5755_v30  ;;  %v5800_v54 = vpop.xlane.xlu0 %5799 }
 0x625   : > { %v5801_v9 = vcvt.f32.s32 %v5800_v54 }
 0x626   : > { %v5759_v38 = vadd.s32 %v5758_v32, %v5756_v49  ;;  %v5833_v32 = vshll.u32 %v5832_v37, 16 }
 0x627   : > { %v5725_v57 = vpop.xlane.xlu1 %5724  ;;  %v5804_v27 = vadd.s32 %v5803_v10, %v5801_v9  ;;  %v8015_v10 = vpop.eup %8014 }
 0x628   : > { %v5907_v46 = vcvt.s32.f32 %v5759_v38  ;;  %v5726_v50 = vcvt.f32.s32 %v5725_v57  ;;  %v5770_v6 = vpop.xlane.xlu0 %5769  ;;  %v10578_v38 = vld [vmem:[#allocation62_spill] sm:$0xff]  ;;  %v10579_v57 = vld [vmem:[#allocation59_spill] sm:$0xff]  ;;  %v8017_v12 = vpop.eup %8016 }
 0x629   : > { %v5910_v63 = vcvt.s32.f32 %v5804_v27  ;;  %v5771_v26 = vcvt.f32.s32 %v5770_v6  ;;  %v5264_v54 = vmul.f32 %v8011_v56, %v10578_v38  ;;  %v5259_v14 = vmul.f32 %v8013_v41, %v10579_v57  ;;  %v10581_v27 = vld [vmem:[#allocation63_spill] sm:$0xff] }
 0x62a   : > { %v5729_v0 = vadd.s32 %v5728_v28, %v5726_v50  ;;  %v5943_v60 = vsel %vm4869_vm3, %v5257_v53, %v5907_v46  ;;  %v10580_v53 = vld [vmem:[#allocation64_spill] sm:$0xff] }
 0x62b   : > { %6042 = vrot.lane.b32.xlu1 %v5943_v60, %s8046_s16  ;;  %v5774_v29 = vadd.s32 %v5773_v48, %v5771_v26  ;;  %v5946_v5 = vsel %vm4869_vm3, %v5260_v15, %v5910_v63  ;;  %8018 = vrcp.f32 %v10580_v53  ;;  %v5262_v48 = vmul.f32 %v8015_v10, %v10581_v27  ;;  %v10583_v15 = vld [vmem:[#allocation54_spill] sm:$0xff] }
 0x62c   : > { %v5905_v11 = vcvt.s32.f32 %v5729_v0  ;;  %6048 = vrot.lane.b32.xlu0 %v5946_v5, %s8046_s16  ;;  %v10582_v0 = vld [vmem:[#allocation49_spill] sm:$0xff]  ;;  %v5847_v25 = vcvt.f32.s32 %v10583_v15 }
 0x62d   : > { %v5908_v40 = vcvt.s32.f32 %v5774_v29  ;;  %v5877_v6 = vcvt.f32.s32 %v10582_v0 }
 0x62e   : > { %v5941_v13 = vsel %vm4869_vm3, %v5255_v35, %v5905_v11 }
 0x62f   : > { %6038 = vrot.lane.b32.xlu1 %v5941_v13, %s8046_s16  ;;  %v5944_v23 = vsel %vm4869_vm3, %v5258_v22, %v5908_v40  ;;  %v5878_v47 = vshll.u32 %v5877_v6, 16  ;;  %v5848_v13 = vshll.u32 %v5847_v25, 16  ;;  %v10584_v22 = vld [vmem:[#allocation60_spill] sm:$0xff] }
 0x630   : > { %6044 = vrot.lane.b32.xlu0 %v5944_v23, %s8046_s16  ;;  %v5265_v51 = vmul.f32 %v8017_v12, %v10584_v22 }
 0x633   : > { %v5815_v59 = vpop.xlane.xlu1 %5814 }
 0x634   : > { %v5816_v39 = vcvt.f32.s32 %v5815_v59  ;;  %v5860_v3 = vpop.xlane.xlu0 %5859 }
 0x635   : > { %v5861_v19 = vcvt.f32.s32 %v5860_v3  ;;  %v8019_v23 = vpop.eup %8018 }
 0x636   : > { %v5819_v16 = vadd.s32 %v5818_v2, %v5816_v39  ;;  %v10585_v2 = vld [vmem:[#allocation61_spill] sm:$0xff] }
 0x637   : > { %v5785_v43 = vpop.xlane.xlu1 %5784  ;;  %v5864_v30 = vadd.s32 %v5863_v52, %v5861_v19  ;;  %v5263_v42 = vmul.f32 %v8019_v23, %v10585_v2 }
 0x638   : > { %v5911_v1 = vcvt.s32.f32 %v5819_v16  ;;  %v5786_v7 = vcvt.f32.s32 %v5785_v43  ;;  %v5830_v44 = vpop.xlane.xlu0 %5829 }
 0x639   : > { %v5914_v21 = vcvt.s32.f32 %v5864_v30  ;;  %v5831_v34 = vcvt.f32.s32 %v5830_v44 }
 0x63a   : > { %v5789_v58 = vadd.s32 %v5788_v8, %v5786_v7  ;;  %v5947_v49 = vsel %vm4869_vm3, %v5261_v24, %v5911_v1 }
 0x63b   : > { %6050 = vrot.lane.b32.xlu1 %v5947_v49, %s8046_s16  ;;  %v5834_v28 = vadd.s32 %v5833_v32, %v5831_v34  ;;  %v5950_v46 = vsel %vm4869_vm3, %v5264_v54, %v5914_v21 }
 0x63c   : > { %v5909_v9 = vcvt.s32.f32 %v5789_v58  ;;  %v5989_v50 = vpop.permute.xlu0 %5988 }
 0x63d   : > { %v5912_v4 = vcvt.s32.f32 %v5834_v28  ;;  %6097 = vst.msk [vmem:[%s8122_s13] sm:$0xff] %vm6096_vm0, %v5989_v50 }
 0x63e   : > { %v5945_v55 = vsel %vm4869_vm3, %v5259_v14, %v5909_v9 }
 0x63f   : > { %6046 = vrot.lane.b32.xlu1 %v5945_v55, %s8046_s16  ;;  %v5948_v60 = vsel %vm4869_vm3, %v5262_v48, %v5912_v4 }
 0x640   : > { %6052 = vrot.lane.b32.xlu0 %v5948_v60, %s8046_s16  ;;  %v6001_v63 = vpop.permute.xlu0 %6000 }
 0x641   : > { %6103 = vst.msk [vmem:[%s8122_s13 + $0x30] sm:$0xff] %vm6096_vm0, %v6001_v63 }
 0x643   : > { %v5875_v26 = vpop.xlane.xlu1 %5874 }
 0x644   : > { %v5876_v11 = vcvt.f32.s32 %v5875_v26  ;;  %6056 = vrot.lane.b32.xlu0 %v5950_v46, %s8046_s16  ;;  %v5997_v29 = vpop.permute.xlu0 %5996 }
 0x645   : > { %6101 = vst.msk [vmem:[%s8122_s13 + $0x20] sm:$0xff] %vm6096_vm0, %v5997_v29 }
 0x646   : > { %v5879_v35 = vadd.s32 %v5878_v47, %v5876_v11 }
 0x647   : > { %v5845_v5 = vpop.xlane.xlu1 %5844 }
 0x648   : > { %v5915_v40 = vcvt.s32.f32 %v5879_v35  ;;  %v5846_v31 = vcvt.f32.s32 %v5845_v5 }
 0x64a   : > { %v5849_v61 = vadd.s32 %v5848_v13, %v5846_v31  ;;  %v5951_v20 = vsel %vm4869_vm3, %v5265_v51, %v5915_v40 }
 0x64b   : > { %v5993_v18 = vpop.permute.xlu1 %5992 }
 0x64c   : > { %v5913_v59 = vcvt.s32.f32 %v5849_v61  ;;  %6099 = vst.msk [vmem:[%s8122_s13 + $0x10] sm:$0xff] %vm6096_vm0, %v5993_v18 }
 0x64e   : > { %v5949_v33 = vsel %vm4869_vm3, %v5263_v42, %v5913_v59  ;;  %v6009_v62 = vpop.permute.xlu0 %6008 }
 0x64f   : > { %6054 = vrot.lane.b32.xlu1 %v5949_v33, %s8046_s16  ;;  %v5995_v39 = vpop.permute.xlu1 %5994  ;;  %6107 = vst.msk [vmem:[%s8122_s13 + $0x50] sm:$0xff] %vm6096_vm0, %v6009_v62 }
 0x650   : > { %6100 = vst.msk [vmem:[%s8122_s13 + $0x18] sm:$0xff] %vm6096_vm0, %v5995_v39 }
 0x652   : > { %v6005_v37 = vpop.permute.xlu0 %6004 }
 0x653   : > { %6058 = vrot.lane.b32.xlu1 %v5951_v20, %s8046_s16  ;;  %v5991_v45 = vpop.permute.xlu1 %5990  ;;  %6105 = vst.msk [vmem:[%s8122_s13 + $0x40] sm:$0xff] %vm6096_vm0, %v6005_v37 }
 0x654   : > { %6098 = vst.msk [vmem:[%s8122_s13 + $0x8] sm:$0xff] %vm6096_vm0, %v5991_v45 }
 0x657   : > { %v6003_v16 = vpop.permute.xlu1 %6002 }
 0x658   : > { %6104 = vst.msk [vmem:[%s8122_s13 + $0x38] sm:$0xff] %vm6096_vm0, %v6003_v16 }
 0x65b   : > { %v5999_v3 = vpop.permute.xlu1 %5998 }
 0x65c   : > { %6102 = vst.msk [vmem:[%s8122_s13 + $0x28] sm:$0xff] %vm6096_vm0, %v5999_v3 }
 0x65e   : > { %v6017_v19 = vpop.permute.xlu0 %6016 }
 0x65f   : > { %v6011_v52 = vpop.permute.xlu1 %6010  ;;  %6111 = vst.msk [vmem:[%s8122_s13 + $0x70] sm:$0xff] %vm6096_vm0, %v6017_v19 }
 0x660   : > { %6108 = vst.msk [vmem:[%s8122_s13 + $0x58] sm:$0xff] %vm6096_vm0, %v6011_v52 }
 0x662   : > { %v6013_v56 = vpop.permute.xlu0 %6012 }
 0x663   : > { %v6007_v43 = vpop.permute.xlu1 %6006  ;;  %6109 = vst.msk [vmem:[%s8122_s13 + $0x60] sm:$0xff] %vm6096_vm0, %v6013_v56 }
 0x664   : > { %6106 = vst.msk [vmem:[%s8122_s13 + $0x48] sm:$0xff] %vm6096_vm0, %v6007_v43 }
 0x66d   : > { %v6019_v8 = vpop.permute.xlu1 %6018 }
 0x66e   : > { %6112 = vst.msk [vmem:[%s8122_s13 + $0x78] sm:$0xff] %vm6096_vm0, %v6019_v8  ;;  %v6025_v1 = vpop.permute.xlu0 %6024 }
 0x66f   : > { %6115 = vst.msk [vmem:[%s8122_s13 + $0x90] sm:$0xff] %vm6096_vm0, %v6025_v1 }
 0x671   : > { %v6015_v7 = vpop.permute.xlu1 %6014 }
 0x672   : > { %6110 = vst.msk [vmem:[%s8122_s13 + $0x68] sm:$0xff] %vm6096_vm0, %v6015_v7  ;;  %v6021_v36 = vpop.permute.xlu0 %6020 }
 0x673   : > { %6113 = vst.msk [vmem:[%s8122_s13 + $0x80] sm:$0xff] %vm6096_vm0, %v6021_v36 }
 0x67d   : > { %v6027_v24 = vpop.permute.xlu1 %6026 }
 0x67e   : > { %6116 = vst.msk [vmem:[%s8122_s13 + $0x98] sm:$0xff] %vm6096_vm0, %v6027_v24  ;;  %v6033_v41 = vpop.permute.xlu0 %6032 }
 0x67f   : > { %6119 = vst.msk [vmem:[%s8122_s13 + $0xb0] sm:$0xff] %vm6096_vm0, %v6033_v41 }
 0x681   : > { %v6023_v30 = vpop.permute.xlu1 %6022 }
 0x682   : > { %6114 = vst.msk [vmem:[%s8122_s13 + $0x88] sm:$0xff] %vm6096_vm0, %v6023_v30  ;;  %v6029_v32 = vpop.permute.xlu0 %6028 }
 0x683   : > { %6117 = vst.msk [vmem:[%s8122_s13 + $0xa0] sm:$0xff] %vm6096_vm0, %v6029_v32 }
 0x68d   : > { %v6035_v58 = vpop.permute.xlu1 %6034 }
 0x68e   : > { %6120 = vst.msk [vmem:[%s8122_s13 + $0xb8] sm:$0xff] %vm6096_vm0, %v6035_v58  ;;  %v6041_v44 = vpop.permute.xlu0 %6040 }
 0x68f   : > { %6123 = vst.msk [vmem:[%s8122_s13 + $0xd0] sm:$0xff] %vm6096_vm0, %v6041_v44 }
 0x691   : > { %v6031_v49 = vpop.permute.xlu1 %6030 }
 0x692   : > { %6118 = vst.msk [vmem:[%s8122_s13 + $0xa8] sm:$0xff] %vm6096_vm0, %v6031_v49  ;;  %v6037_v17 = vpop.permute.xlu0 %6036 }
 0x693   : > { %6121 = vst.msk [vmem:[%s8122_s13 + $0xc0] sm:$0xff] %vm6096_vm0, %v6037_v17 }
 0x69d   : > { %v6043_v21 = vpop.permute.xlu1 %6042 }
 0x69e   : > { %6124 = vst.msk [vmem:[%s8122_s13 + $0xd8] sm:$0xff] %vm6096_vm0, %v6043_v21  ;;  %v6049_v34 = vpop.permute.xlu0 %6048 }
 0x69f   : > { %6127 = vst.msk [vmem:[%s8122_s13 + $0xf0] sm:$0xff] %vm6096_vm0, %v6049_v34 }
 0x6a1   : > { %v6039_v38 = vpop.permute.xlu1 %6038 }
 0x6a2   : > { %6122 = vst.msk [vmem:[%s8122_s13 + $0xc8] sm:$0xff] %vm6096_vm0, %v6039_v38  ;;  %v6045_v54 = vpop.permute.xlu0 %6044 }
 0x6a3   : > { %6125 = vst.msk [vmem:[%s8122_s13 + $0xe0] sm:$0xff] %vm6096_vm0, %v6045_v54 }
 0x6ad   : > { %v6051_v10 = vpop.permute.xlu1 %6050 }
 0x6ae   : > { %6128 = vst.msk [vmem:[%s8122_s13 + $0xf8] sm:$0xff] %vm6096_vm0, %v6051_v10 }
 0x6b1   : > { %v6047_v9 = vpop.permute.xlu1 %6046 }
 0x6b2   : > { %6126 = vst.msk [vmem:[%s8122_s13 + $0xe8] sm:$0xff] %vm6096_vm0, %v6047_v9  ;;  %v6053_v57 = vpop.permute.xlu0 %6052 }
 0x6b3   : > { %6129 = vst.msk [vmem:[%s8122_s13 + $0x100] sm:$0xff] %vm6096_vm0, %v6053_v57 }
 0x6b6   : > { %v6057_v14 = vpop.permute.xlu0 %6056 }
 0x6b7   : > { %6131 = vst.msk [vmem:[%s8122_s13 + $0x110] sm:$0xff] %vm6096_vm0, %v6057_v14 }
 0x6c1   : > { %v6055_v28 = vpop.permute.xlu1 %6054 }
 0x6c2   : > { %6130 = vst.msk [vmem:[%s8122_s13 + $0x108] sm:$0xff] %vm6096_vm0, %v6055_v28 }
 0x6c5   : > { %v6059_v46 = vpop.permute.xlu1 %6058 }
 0x6c6   : > { %6132 = vst.msk [vmem:[%s8122_s13 + $0x118] sm:$0xff] %vm6096_vm0, %v6059_v46 }
 0x6c7 PF: > { %s17_s26 = sadd.s32 1, %s8044_s26   ;;  %s10586_s24 = smov %s8040_s25 }
 0x6c8   : > { %p14_p5 = scmp.ge.s32.totalorder %s17_s26, 4   ;;  %s10587_s25 = smov %s10589_s27 }
 0x6ca   :  { %16 = sbr.rel (!%p14_p5) target bundleno = 2 (0x2), region = 131 }
 0x6d1   :  { %6158 = vsyncmov [#allocation3] }
 0x6d4   :  { %s6159_s17 = vpop.sfrf %6158 }
 0x6d5   :  { %p6603_p6 = scmp.ne.s32.totalorder %s6159_s17, 0 }
 0x6d7   :  { %6163 = shalt.err (%p6603_p6)  }

</bundles_post_ra>
